<compile_context>
chip_gen: v7x
topology: tpu7x:2x2x1
jax: 0.10.0
libtpu: 0.0.40
codegen_flags: <defaults>
</compile_context>

<pallas_src>
import jax
import jax.numpy as jnp
from jax.experimental import pallas as pl
from jax.experimental.pallas import tpu as pltpu


# ------------------------------ Pallas kernel ------------------------------- #

def _conv3x3_bias_relu(pad_ref, cin, w_ref, b_ref):
    """SAME 3x3 conv over the padded VMEM scratch as 9 accumulating MXU taps.

    pad_ref: (H+2, W+2, Cmax) VMEM scratch (only channels [:cin] are valid)
    w_ref  : (9*cin, Cout)    rows ordered (kh, kw, cin)
    b_ref  : (1, Cout)        f32
    returns: (H*W, Cout)      f32
    """
    Hp2, Wp2, _ = pad_ref.shape
    H, W = Hp2 - 2, Wp2 - 2
    M = H * W
    acc = None
    for kh in range(3):
        for kw in range(3):
            t = kh * 3 + kw
            # (H, W, cin) tap slab; reshape merges the two sublane-major dims
            # (no relayout, cin stays on the lane dim).
            slab = pad_ref[kh:kh + H, kw:kw + W, :cin].reshape(M, cin)
            tap = jnp.dot(slab, w_ref[t * cin:(t + 1) * cin, :],
                          preferred_element_type=jnp.float32)
            acc = tap if acc is None else acc + tap
    return jnp.maximum(acc + b_ref[...].astype(jnp.float32), 0.0)


def _block_kernel(x_ref, w1_ref, b1_ref, w2_ref, b2_ref, o_ref, pad_ref):
    # x_ref  : (1, H, W, Cin_p)   one image, NHWC, channel-padded, unpadded spatially
    # w1_ref : (9*Cin_p, C1_p)    conv1 weights, rows ordered (kh, kw, cin)
    # b1_ref : (1, C1_p)          f32
    # w2_ref : (9*C1_p, C2_p)     conv2 weights
    # b2_ref : (1, C2_p)          f32
    # o_ref  : (1, H*W, C2_p)     lane-dense output; NHWC/NCHW reshape done in XLA
    # pad_ref: (H+2, W+2, Cmax)   shared zero-halo VMEM scratch for both convs
    _, H, W, cin_p = x_ref.shape
    c1_p = w1_ref.shape[1]
    cmax = pad_ref.shape[-1]
    zdt = pad_ref.dtype

    # Zero only the 1-pixel halo border; the interior is overwritten right after.
    # Re-done every grid step so it is safe under "parallel" core sharding.
    pad_ref[0, :, :] = jnp.zeros((W + 2, cmax), zdt)
    pad_ref[H + 1, :, :] = jnp.zeros((W + 2, cmax), zdt)
    pad_ref[:, 0:1, :] = jnp.zeros((H + 2, 1, cmax), zdt)
    pad_ref[:, W + 1:W + 2, :] = jnp.zeros((H + 2, 1, cmax), zdt)

    # conv1 + bias + ReLU (halo built directly in VMEM, no HBM pad).
    pad_ref[1:H + 1, 1:W + 1, :cin_p] = x_ref[0]
    h = _conv3x3_bias_relu(pad_ref, cin_p, w1_ref, b1_ref)      # (H*W, C1_p) f32

    # conv2 + bias + ReLU: intermediate stays resident in VMEM, scratch reused.
    pad_ref[1:H + 1, 1:W + 1, :c1_p] = h.reshape(H, W, c1_p).astype(zdt)
    y = _conv3x3_bias_relu(pad_ref, c1_p, w2_ref, b2_ref)       # (H*W, C2_p) f32

    o_ref[0] = y.astype(o_ref.dtype)


# --------------------------------- wrapper ---------------------------------- #

def _round_up(c, m):
    return (c + m - 1) // m * m


def block_forward(x_nchw, w1, b1, w2, b2, *, matmul_dtype=jnp.float32, lane=128):
    """Fused Block: ReLU(conv2(ReLU(conv1(x)))), 3x3 convs, SAME padding, bias.

    x_nchw: (N, Cin, H, W); w*: (3, 3, Cin_i, Cout_i) HWIO; b*: (Cout_i,).
    Returns (N, Cout2, H, W) in x_nchw.dtype.
    """
    N, Cin, H, W = x_nchw.shape
    C1, C2 = w1.shape[-1], w2.shape[-1]
    assert w1.shape[:3] == (3, 3, Cin) and w2.shape[:3] == (3, 3, C1)

    # Pad every channel axis to a multiple of 128 (zero weights / zero bias for
    # the padded slots) so all vregs / DMAs / stores are lane-dense.
    cin_p = _round_up(Cin, lane)
    c1_p = _round_up(C1, lane)
    c2_p = _round_up(C2, lane)
    cmax = max(cin_p, c1_p)

    x = jnp.transpose(x_nchw, (0, 2, 3, 1)).astype(matmul_dtype)      # NHWC
    x = jnp.pad(x, ((0, 0), (0, 0), (0, 0), (0, cin_p - Cin)))

    w1p = jnp.pad(w1, ((0, 0), (0, 0), (0, cin_p - Cin), (0, c1_p - C1)))
    w2p = jnp.pad(w2, ((0, 0), (0, 0), (0, c1_p - C1), (0, c2_p - C2)))
    w1f = w1p.reshape(9 * cin_p, c1_p).astype(matmul_dtype)   # rows = (kh, kw, cin)
    w2f = w2p.reshape(9 * c1_p, c2_p).astype(matmul_dtype)
    b1r = jnp.pad(b1, (0, c1_p - C1)).reshape(1, c1_p).astype(jnp.float32)
    b2r = jnp.pad(b2, (0, c2_p - C2)).reshape(1, c2_p).astype(jnp.float32)

    itemsize = jnp.dtype(matmul_dtype).itemsize
    out_itemsize = jnp.dtype(x_nchw.dtype).itemsize
    flops = 2 * N * H * W * 9 * (cin_p * c1_p + c1_p * c2_p)
    bytes_accessed = (itemsize * (x.size + w1f.size + w2f.size)
                      + 4 * (b1r.size + b2r.size)
                      + out_itemsize * N * H * W * c2_p)

    out = pl.pallas_call(
        _block_kernel,
        out_shape=jax.ShapeDtypeStruct((N, H * W, c2_p), x_nchw.dtype),
        grid=(N,),
        in_specs=[
            pl.BlockSpec((1, H, W, cin_p), lambda n: (n, 0, 0, 0)),
            pl.BlockSpec((9 * cin_p, c1_p), lambda n: (0, 0)),
            pl.BlockSpec((1, c1_p), lambda n: (0, 0)),
            pl.BlockSpec((9 * c1_p, c2_p), lambda n: (0, 0)),
            pl.BlockSpec((1, c2_p), lambda n: (0, 0)),
        ],
        out_specs=pl.BlockSpec((1, H * W, c2_p), lambda n: (n, 0, 0)),
        scratch_shapes=[
            pltpu.VMEM((H + 2, W + 2, cmax), matmul_dtype),   # shared halo scratch
        ],
        compiler_params=pltpu.CompilerParams(
            dimension_semantics=("parallel",)),
        cost_estimate=pl.CostEstimate(
            flops=flops, transcendentals=0, bytes_accessed=bytes_accessed),
    )(x, w1f, b1r, w2f, b2r)

    out = out.reshape(N, H, W, c2_p)[..., :C2]                 # drop padded channels
    return jnp.transpose(out, (0, 3, 1, 2))                    # NHWC -> NCHW


# ------------------------------- reference ---------------------------------- #

def block_reference(x_nchw, w1, b1, w2, b2):
    """Pure-JAX reference for correctness checking."""
    x = jnp.transpose(x_nchw, (0, 2, 3, 1))
    for w, b in ((w1, b1), (w2, b2)):
        x = jax.lax.conv_general_dilated(
            x, w, window_strides=(1, 1), padding="SAME",
            dimension_numbers=("NHWC", "HWIO", "NHWC"))
        x = jnp.maximum(x + b, 0.0)
    return jnp.transpose(x, (0, 3, 1, 2))


# ---------------------------------- main ------------------------------------ #

if __name__ == "__main__":
    key = jax.random.PRNGKey(0)
    kx, k1, k2, k3, k4 = jax.random.split(key, 5)

    N, Cin, H, W = 2, 4, 16, 16          # NCHW, like PyTorch
    features = 8                         # Block(features=8): conv1 4->8, conv2 8->8

    x = jax.random.normal(kx, (N, Cin, H, W), jnp.float32)

    # PyTorch Conv2d default init: U(-1/sqrt(fan_in), 1/sqrt(fan_in)), fan_in = Cin*3*3.
    bound1 = 1.0 / float(Cin * 9) ** 0.5
    w1 = jax.random.uniform(k1, (3, 3, Cin, features), jnp.float32, -bound1, bound1)
    b1 = jax.random.uniform(k2, (features,), jnp.float32, -bound1, bound1)
    bound2 = 1.0 / float(features * 9) ** 0.5
    w2 = jax.random.uniform(k3, (3, 3, features, features), jnp.float32, -bound2, bound2)
    b2 = jax.random.uniform(k4, (features,), jnp.float32, -bound2, bound2)

    ref = jax.block_until_ready(block_reference(x, w1, b1, w2, b2))

    # Default: f32 matmul (safe on all generations, tight tolerance).
    out = jax.block_until_ready(block_forward(x, w1, b1, w2, b2))
    assert out.shape == (N, features, H, W), out.shape
    assert jnp.allclose(out, ref, rtol=1e-3, atol=1e-3), \
        float(jnp.max(jnp.abs(out - ref)))

    # v6e/v7x MXU path: bf16 x / weights / scratch, f32 accumulate + bias + ReLU.
    out_bf16 = jax.block_until_ready(
        block_forward(x, w1, b1, w2, b2, matmul_dtype=jnp.bfloat16))
    assert out_bf16.shape == (N, features, H, W), out_bf16.shape
    assert jnp.allclose(out_bf16, ref, rtol=5e-2, atol=5e-2), \
        float(jnp.max(jnp.abs(out_bf16 - ref)))

    print("KERNEL_OK")
</pallas_src>

<mosaic_0001>
module attributes {stable_mosaic.version = 11 : i64} {
  func.func @_block_kernel(%arg0: i32, %arg1: memref<1x16x16x128xf32, #tpu.memory_space<vmem>>, %arg2: memref<1152x128xf32, #tpu.memory_space<vmem>>, %arg3: memref<1x128xf32, #tpu.memory_space<vmem>>, %arg4: memref<1152x128xf32, #tpu.memory_space<vmem>>, %arg5: memref<1x128xf32, #tpu.memory_space<vmem>>, %arg6: memref<1x256x128xf32, #tpu.memory_space<vmem>>, %arg7: memref<18x18x128xf32, #tpu.memory_space<vmem>>) attributes {dimension_semantics = [#tpu.dimension_semantics<parallel>], iteration_bounds = array<i64: 2>, scalar_prefetch = 0 : i64, scratch_operands = 1 : i64, tpu.core_type = #tpu.core_type<tc>, window_params = [{transform_indices = @transform_0, window_bounds = array<i64: 1, 16, 16, 128>}, {pipeline_mode = #tpu.pipeline_mode<synchronous>, transform_indices = @transform_1, window_bounds = array<i64: 1152, 128>}, {pipeline_mode = #tpu.pipeline_mode<synchronous>, transform_indices = @transform_2, window_bounds = array<i64: 1, 128>}, {pipeline_mode = #tpu.pipeline_mode<synchronous>, transform_indices = @transform_3, window_bounds = array<i64: 1152, 128>}, {pipeline_mode = #tpu.pipeline_mode<synchronous>, transform_indices = @transform_4, window_bounds = array<i64: 1, 128>}, {transform_indices = @transform_5, window_bounds = array<i64: 1, 256, 128>}]} {
    %cst = arith.constant 0.000000e+00 : f32
    %0 = vector.broadcast %cst : f32 to vector<18x128xf32>
    %c0 = arith.constant 0 : index
    %c0_0 = arith.constant 0 : index
    %c0_1 = arith.constant 0 : index
    %1 = vector.load %arg7[%c0, %c0_0, %c0_1] : memref<18x18x128xf32, #tpu.memory_space<vmem>>, vector<1x18x128xf32>
    %2 = vector.shape_cast %1 : vector<1x18x128xf32> to vector<18x128xf32>
    %3 = vector.shape_cast %0 : vector<18x128xf32> to vector<1x18x128xf32>
    tpu.vector_store %arg7[%c0, %c0_0, %c0_1], %3 {strides = array<i32>} : memref<18x18x128xf32, #tpu.memory_space<vmem>>, vector<1x18x128xf32>,
    %cst_2 = arith.constant 0.000000e+00 : f32
    %4 = vector.broadcast %cst_2 : f32 to vector<18x128xf32>
    %c17 = arith.constant 17 : index
    %c0_3 = arith.constant 0 : index
    %c0_4 = arith.constant 0 : index
    %5 = vector.load %arg7[%c17, %c0_3, %c0_4] : memref<18x18x128xf32, #tpu.memory_space<vmem>>, vector<1x18x128xf32>
    %6 = vector.shape_cast %5 : vector<1x18x128xf32> to vector<18x128xf32>
    %7 = vector.shape_cast %4 : vector<18x128xf32> to vector<1x18x128xf32>
    tpu.vector_store %arg7[%c17, %c0_3, %c0_4], %7 {strides = array<i32>} : memref<18x18x128xf32, #tpu.memory_space<vmem>>, vector<1x18x128xf32>,
    %cst_5 = arith.constant 0.000000e+00 : f32
    %8 = vector.broadcast %cst_5 : f32 to vector<18x1x128xf32>
    %c0_6 = arith.constant 0 : index
    %c0_7 = arith.constant 0 : index
    %c0_8 = arith.constant 0 : index
    %9 = vector.load %arg7[%c0_6, %c0_7, %c0_8] : memref<18x18x128xf32, #tpu.memory_space<vmem>>, vector<18x1x128xf32>
    tpu.vector_store %arg7[%c0_6, %c0_7, %c0_8], %8 {strides = array<i32>} : memref<18x18x128xf32, #tpu.memory_space<vmem>>, vector<18x1x128xf32>,
    %cst_9 = arith.constant 0.000000e+00 : f32
    %10 = vector.broadcast %cst_9 : f32 to vector<18x1x128xf32>
    %c0_10 = arith.constant 0 : index
    %c17_11 = arith.constant 17 : index
    %c0_12 = arith.constant 0 : index
    %11 = vector.load %arg7[%c0_10, %c17_11, %c0_12] : memref<18x18x128xf32, #tpu.memory_space<vmem>>, vector<18x1x128xf32>
    tpu.vector_store %arg7[%c0_10, %c17_11, %c0_12], %10 {strides = array<i32>} : memref<18x18x128xf32, #tpu.memory_space<vmem>>, vector<18x1x128xf32>,
    %c0_13 = arith.constant 0 : index
    %c0_14 = arith.constant 0 : index
    %c0_15 = arith.constant 0 : index
    %c0_16 = arith.constant 0 : index
    %12 = vector.load %arg1[%c0_13, %c0_14, %c0_15, %c0_16] : memref<1x16x16x128xf32, #tpu.memory_space<vmem>>, vector<1x16x16x128xf32>
    %13 = vector.shape_cast %12 : vector<1x16x16x128xf32> to vector<16x16x128xf32>
    %c1 = arith.constant 1 : index
    %c1_17 = arith.constant 1 : index
    %c0_18 = arith.constant 0 : index
    %14 = vector.load %arg7[%c1, %c1_17, %c0_18] : memref<18x18x128xf32, #tpu.memory_space<vmem>>, vector<16x16x128xf32>
    tpu.vector_store %arg7[%c1, %c1_17, %c0_18], %13 {strides = array<i32>} : memref<18x18x128xf32, #tpu.memory_space<vmem>>, vector<16x16x128xf32>,
    %c0_19 = arith.constant 0 : index
    %c0_20 = arith.constant 0 : index
    %c0_21 = arith.constant 0 : index
    %15 = vector.load %arg7[%c0_19, %c0_20, %c0_21] : memref<18x18x128xf32, #tpu.memory_space<vmem>>, vector<16x16x128xf32>
    %16 = vector.shape_cast %15 : vector<16x16x128xf32> to vector<256x128xf32>
    %c0_22 = arith.constant 0 : index
    %c0_23 = arith.constant 0 : index
    %17 = vector.load %arg2[%c0_22, %c0_23] : memref<1152x128xf32, #tpu.memory_space<vmem>>, vector<128x128xf32>
    %cst_24 = arith.constant dense<0.000000e+00> : vector<256x128xf32>
    %18 = tpu.matmul %16, %17, %cst_24 {dimension_numbers = #tpu.dot_dimension_numbers<[1], [0], [0], [1], [0, 0, 1, 1], [], []>} : vector<256x128xf32>, vector<128x128xf32>, vector<256x128xf32> -> vector<256x128xf32>
    %c0_25 = arith.constant 0 : index
    %c1_26 = arith.constant 1 : index
    %c0_27 = arith.constant 0 : index
    %19 = vector.load %arg7[%c0_25, %c1_26, %c0_27] : memref<18x18x128xf32, #tpu.memory_space<vmem>>, vector<16x16x128xf32>
    %20 = vector.shape_cast %19 : vector<16x16x128xf32> to vector<256x128xf32>
    %c128 = arith.constant 128 : index
    %c0_28 = arith.constant 0 : index
    %21 = vector.load %arg2[%c128, %c0_28] : memref<1152x128xf32, #tpu.memory_space<vmem>>, vector<128x128xf32>
    %cst_29 = arith.constant dense<0.000000e+00> : vector<256x128xf32>
    %22 = tpu.matmul %20, %21, %cst_29 {dimension_numbers = #tpu.dot_dimension_numbers<[1], [0], [0], [1], [0, 0, 1, 1], [], []>} : vector<256x128xf32>, vector<128x128xf32>, vector<256x128xf32> -> vector<256x128xf32>
    %23 = arith.addf %18, %22 : vector<256x128xf32>
    %c0_30 = arith.constant 0 : index
    %c2 = arith.constant 2 : index
    %c0_31 = arith.constant 0 : index
    %24 = vector.load %arg7[%c0_30, %c2, %c0_31] : memref<18x18x128xf32, #tpu.memory_space<vmem>>, vector<16x16x128xf32>
    %25 = vector.shape_cast %24 : vector<16x16x128xf32> to vector<256x128xf32>
    %c256 = arith.constant 256 : index
    %c0_32 = arith.constant 0 : index
    %26 = vector.load %arg2[%c256, %c0_32] : memref<1152x128xf32, #tpu.memory_space<vmem>>, vector<128x128xf32>
    %cst_33 = arith.constant dense<0.000000e+00> : vector<256x128xf32>
    %27 = tpu.matmul %25, %26, %cst_33 {dimension_numbers = #tpu.dot_dimension_numbers<[1], [0], [0], [1], [0, 0, 1, 1], [], []>} : vector<256x128xf32>, vector<128x128xf32>, vector<256x128xf32> -> vector<256x128xf32>
    %28 = arith.addf %23, %27 : vector<256x128xf32>
    %c1_34 = arith.constant 1 : index
    %c0_35 = arith.constant 0 : index
    %c0_36 = arith.constant 0 : index
    %29 = vector.load %arg7[%c1_34, %c0_35, %c0_36] : memref<18x18x128xf32, #tpu.memory_space<vmem>>, vector<16x16x128xf32>
    %30 = vector.shape_cast %29 : vector<16x16x128xf32> to vector<256x128xf32>
    %c384 = arith.constant 384 : index
    %c0_37 = arith.constant 0 : index
    %31 = vector.load %arg2[%c384, %c0_37] : memref<1152x128xf32, #tpu.memory_space<vmem>>, vector<128x128xf32>
    %cst_38 = arith.constant dense<0.000000e+00> : vector<256x128xf32>
    %32 = tpu.matmul %30, %31, %cst_38 {dimension_numbers = #tpu.dot_dimension_numbers<[1], [0], [0], [1], [0, 0, 1, 1], [], []>} : vector<256x128xf32>, vector<128x128xf32>, vector<256x128xf32> -> vector<256x128xf32>
    %33 = arith.addf %28, %32 : vector<256x128xf32>
    %c1_39 = arith.constant 1 : index
    %c1_40 = arith.constant 1 : index
    %c0_41 = arith.constant 0 : index
    %34 = vector.load %arg7[%c1_39, %c1_40, %c0_41] : memref<18x18x128xf32, #tpu.memory_space<vmem>>, vector<16x16x128xf32>
    %35 = vector.shape_cast %34 : vector<16x16x128xf32> to vector<256x128xf32>
    %c512 = arith.constant 512 : index
    %c0_42 = arith.constant 0 : index
    %36 = vector.load %arg2[%c512, %c0_42] : memref<1152x128xf32, #tpu.memory_space<vmem>>, vector<128x128xf32>
    %cst_43 = arith.constant dense<0.000000e+00> : vector<256x128xf32>
    %37 = tpu.matmul %35, %36, %cst_43 {dimension_numbers = #tpu.dot_dimension_numbers<[1], [0], [0], [1], [0, 0, 1, 1], [], []>} : vector<256x128xf32>, vector<128x128xf32>, vector<256x128xf32> -> vector<256x128xf32>
    %38 = arith.addf %33, %37 : vector<256x128xf32>
    %c1_44 = arith.constant 1 : index
    %c2_45 = arith.constant 2 : index
    %c0_46 = arith.constant 0 : index
    %39 = vector.load %arg7[%c1_44, %c2_45, %c0_46] : memref<18x18x128xf32, #tpu.memory_space<vmem>>, vector<16x16x128xf32>
    %40 = vector.shape_cast %39 : vector<16x16x128xf32> to vector<256x128xf32>
    %c640 = arith.constant 640 : index
    %c0_47 = arith.constant 0 : index
    %41 = vector.load %arg2[%c640, %c0_47] : memref<1152x128xf32, #tpu.memory_space<vmem>>, vector<128x128xf32>
    %cst_48 = arith.constant dense<0.000000e+00> : vector<256x128xf32>
    %42 = tpu.matmul %40, %41, %cst_48 {dimension_numbers = #tpu.dot_dimension_numbers<[1], [0], [0], [1], [0, 0, 1, 1], [], []>} : vector<256x128xf32>, vector<128x128xf32>, vector<256x128xf32> -> vector<256x128xf32>
    %43 = arith.addf %38, %42 : vector<256x128xf32>
    %c2_49 = arith.constant 2 : index
    %c0_50 = arith.constant 0 : index
    %c0_51 = arith.constant 0 : index
    %44 = vector.load %arg7[%c2_49, %c0_50, %c0_51] : memref<18x18x128xf32, #tpu.memory_space<vmem>>, vector<16x16x128xf32>
    %45 = vector.shape_cast %44 : vector<16x16x128xf32> to vector<256x128xf32>
    %c768 = arith.constant 768 : index
    %c0_52 = arith.constant 0 : index
    %46 = vector.load %arg2[%c768, %c0_52] : memref<1152x128xf32, #tpu.memory_space<vmem>>, vector<128x128xf32>
    %cst_53 = arith.constant dense<0.000000e+00> : vector<256x128xf32>
    %47 = tpu.matmul %45, %46, %cst_53 {dimension_numbers = #tpu.dot_dimension_numbers<[1], [0], [0], [1], [0, 0, 1, 1], [], []>} : vector<256x128xf32>, vector<128x128xf32>, vector<256x128xf32> -> vector<256x128xf32>
    %48 = arith.addf %43, %47 : vector<256x128xf32>
    %c2_54 = arith.constant 2 : index
    %c1_55 = arith.constant 1 : index
    %c0_56 = arith.constant 0 : index
    %49 = vector.load %arg7[%c2_54, %c1_55, %c0_56] : memref<18x18x128xf32, #tpu.memory_space<vmem>>, vector<16x16x128xf32>
    %50 = vector.shape_cast %49 : vector<16x16x128xf32> to vector<256x128xf32>
    %c896 = arith.constant 896 : index
    %c0_57 = arith.constant 0 : index
    %51 = vector.load %arg2[%c896, %c0_57] : memref<1152x128xf32, #tpu.memory_space<vmem>>, vector<128x128xf32>
    %cst_58 = arith.constant dense<0.000000e+00> : vector<256x128xf32>
    %52 = tpu.matmul %50, %51, %cst_58 {dimension_numbers = #tpu.dot_dimension_numbers<[1], [0], [0], [1], [0, 0, 1, 1], [], []>} : vector<256x128xf32>, vector<128x128xf32>, vector<256x128xf32> -> vector<256x128xf32>
    %53 = arith.addf %48, %52 : vector<256x128xf32>
    %c2_59 = arith.constant 2 : index
    %c2_60 = arith.constant 2 : index
    %c0_61 = arith.constant 0 : index
    %54 = vector.load %arg7[%c2_59, %c2_60, %c0_61] : memref<18x18x128xf32, #tpu.memory_space<vmem>>, vector<16x16x128xf32>
    %55 = vector.shape_cast %54 : vector<16x16x128xf32> to vector<256x128xf32>
    %c1024 = arith.constant 1024 : index
    %c0_62 = arith.constant 0 : index
    %56 = vector.load %arg2[%c1024, %c0_62] : memref<1152x128xf32, #tpu.memory_space<vmem>>, vector<128x128xf32>
    %cst_63 = arith.constant dense<0.000000e+00> : vector<256x128xf32>
    %57 = tpu.matmul %55, %56, %cst_63 {dimension_numbers = #tpu.dot_dimension_numbers<[1], [0], [0], [1], [0, 0, 1, 1], [], []>} : vector<256x128xf32>, vector<128x128xf32>, vector<256x128xf32> -> vector<256x128xf32>
    %58 = arith.addf %53, %57 : vector<256x128xf32>
    %c0_64 = arith.constant 0 : index
    %c0_65 = arith.constant 0 : index
    %59 = vector.load %arg3[%c0_64, %c0_65] : memref<1x128xf32, #tpu.memory_space<vmem>>, vector<1x128xf32>
    %60 = vector.broadcast %59 : vector<1x128xf32> to vector<256x128xf32>
    %61 = arith.addf %58, %60 : vector<256x128xf32>
    %cst_66 = arith.constant 0.000000e+00 : f32
    %62 = vector.broadcast %cst_66 : f32 to vector<256x128xf32>
    %63 = arith.maximumf %61, %62 : vector<256x128xf32>
    %64 = vector.shape_cast %63 : vector<256x128xf32> to vector<16x16x128xf32>
    %c1_67 = arith.constant 1 : index
    %c1_68 = arith.constant 1 : index
    %c0_69 = arith.constant 0 : index
    %65 = vector.load %arg7[%c1_67, %c1_68, %c0_69] : memref<18x18x128xf32, #tpu.memory_space<vmem>>, vector<16x16x128xf32>
    tpu.vector_store %arg7[%c1_67, %c1_68, %c0_69], %64 {strides = array<i32>} : memref<18x18x128xf32, #tpu.memory_space<vmem>>, vector<16x16x128xf32>,
    %c0_70 = arith.constant 0 : index
    %c0_71 = arith.constant 0 : index
    %c0_72 = arith.constant 0 : index
    %66 = vector.load %arg7[%c0_70, %c0_71, %c0_72] : memref<18x18x128xf32, #tpu.memory_space<vmem>>, vector<16x16x128xf32>
    %67 = vector.shape_cast %66 : vector<16x16x128xf32> to vector<256x128xf32>
    %c0_73 = arith.constant 0 : index
    %c0_74 = arith.constant 0 : index
    %68 = vector.load %arg4[%c0_73, %c0_74] : memref<1152x128xf32, #tpu.memory_space<vmem>>, vector<128x128xf32>
    %cst_75 = arith.constant dense<0.000000e+00> : vector<256x128xf32>
    %69 = tpu.matmul %67, %68, %cst_75 {dimension_numbers = #tpu.dot_dimension_numbers<[1], [0], [0], [1], [0, 0, 1, 1], [], []>} : vector<256x128xf32>, vector<128x128xf32>, vector<256x128xf32> -> vector<256x128xf32>
    %c0_76 = arith.constant 0 : index
    %c1_77 = arith.constant 1 : index
    %c0_78 = arith.constant 0 : index
    %70 = vector.load %arg7[%c0_76, %c1_77, %c0_78] : memref<18x18x128xf32, #tpu.memory_space<vmem>>, vector<16x16x128xf32>
    %71 = vector.shape_cast %70 : vector<16x16x128xf32> to vector<256x128xf32>
    %c128_79 = arith.constant 128 : index
    %c0_80 = arith.constant 0 : index
    %72 = vector.load %arg4[%c128_79, %c0_80] : memref<1152x128xf32, #tpu.memory_space<vmem>>, vector<128x128xf32>
    %cst_81 = arith.constant dense<0.000000e+00> : vector<256x128xf32>
    %73 = tpu.matmul %71, %72, %cst_81 {dimension_numbers = #tpu.dot_dimension_numbers<[1], [0], [0], [1], [0, 0, 1, 1], [], []>} : vector<256x128xf32>, vector<128x128xf32>, vector<256x128xf32> -> vector<256x128xf32>
    %74 = arith.addf %69, %73 : vector<256x128xf32>
    %c0_82 = arith.constant 0 : index
    %c2_83 = arith.constant 2 : index
    %c0_84 = arith.constant 0 : index
    %75 = vector.load %arg7[%c0_82, %c2_83, %c0_84] : memref<18x18x128xf32, #tpu.memory_space<vmem>>, vector<16x16x128xf32>
    %76 = vector.shape_cast %75 : vector<16x16x128xf32> to vector<256x128xf32>
    %c256_85 = arith.constant 256 : index
    %c0_86 = arith.constant 0 : index
    %77 = vector.load %arg4[%c256_85, %c0_86] : memref<1152x128xf32, #tpu.memory_space<vmem>>, vector<128x128xf32>
    %cst_87 = arith.constant dense<0.000000e+00> : vector<256x128xf32>
    %78 = tpu.matmul %76, %77, %cst_87 {dimension_numbers = #tpu.dot_dimension_numbers<[1], [0], [0], [1], [0, 0, 1, 1], [], []>} : vector<256x128xf32>, vector<128x128xf32>, vector<256x128xf32> -> vector<256x128xf32>
    %79 = arith.addf %74, %78 : vector<256x128xf32>
    %c1_88 = arith.constant 1 : index
    %c0_89 = arith.constant 0 : index
    %c0_90 = arith.constant 0 : index
    %80 = vector.load %arg7[%c1_88, %c0_89, %c0_90] : memref<18x18x128xf32, #tpu.memory_space<vmem>>, vector<16x16x128xf32>
    %81 = vector.shape_cast %80 : vector<16x16x128xf32> to vector<256x128xf32>
    %c384_91 = arith.constant 384 : index
    %c0_92 = arith.constant 0 : index
    %82 = vector.load %arg4[%c384_91, %c0_92] : memref<1152x128xf32, #tpu.memory_space<vmem>>, vector<128x128xf32>
    %cst_93 = arith.constant dense<0.000000e+00> : vector<256x128xf32>
    %83 = tpu.matmul %81, %82, %cst_93 {dimension_numbers = #tpu.dot_dimension_numbers<[1], [0], [0], [1], [0, 0, 1, 1], [], []>} : vector<256x128xf32>, vector<128x128xf32>, vector<256x128xf32> -> vector<256x128xf32>
    %84 = arith.addf %79, %83 : vector<256x128xf32>
    %c1_94 = arith.constant 1 : index
    %c1_95 = arith.constant 1 : index
    %c0_96 = arith.constant 0 : index
    %85 = vector.load %arg7[%c1_94, %c1_95, %c0_96] : memref<18x18x128xf32, #tpu.memory_space<vmem>>, vector<16x16x128xf32>
    %86 = vector.shape_cast %85 : vector<16x16x128xf32> to vector<256x128xf32>
    %c512_97 = arith.constant 512 : index
    %c0_98 = arith.constant 0 : index
    %87 = vector.load %arg4[%c512_97, %c0_98] : memref<1152x128xf32, #tpu.memory_space<vmem>>, vector<128x128xf32>
    %cst_99 = arith.constant dense<0.000000e+00> : vector<256x128xf32>
    %88 = tpu.matmul %86, %87, %cst_99 {dimension_numbers = #tpu.dot_dimension_numbers<[1], [0], [0], [1], [0, 0, 1, 1], [], []>} : vector<256x128xf32>, vector<128x128xf32>, vector<256x128xf32> -> vector<256x128xf32>
    %89 = arith.addf %84, %88 : vector<256x128xf32>
    %c1_100 = arith.constant 1 : index
    %c2_101 = arith.constant 2 : index
    %c0_102 = arith.constant 0 : index
    %90 = vector.load %arg7[%c1_100, %c2_101, %c0_102] : memref<18x18x128xf32, #tpu.memory_space<vmem>>, vector<16x16x128xf32>
    %91 = vector.shape_cast %90 : vector<16x16x128xf32> to vector<256x128xf32>
    %c640_103 = arith.constant 640 : index
    %c0_104 = arith.constant 0 : index
    %92 = vector.load %arg4[%c640_103, %c0_104] : memref<1152x128xf32, #tpu.memory_space<vmem>>, vector<128x128xf32>
    %cst_105 = arith.constant dense<0.000000e+00> : vector<256x128xf32>
    %93 = tpu.matmul %91, %92, %cst_105 {dimension_numbers = #tpu.dot_dimension_numbers<[1], [0], [0], [1], [0, 0, 1, 1], [], []>} : vector<256x128xf32>, vector<128x128xf32>, vector<256x128xf32> -> vector<256x128xf32>
    %94 = arith.addf %89, %93 : vector<256x128xf32>
    %c2_106 = arith.constant 2 : index
    %c0_107 = arith.constant 0 : index
    %c0_108 = arith.constant 0 : index
    %95 = vector.load %arg7[%c2_106, %c0_107, %c0_108] : memref<18x18x128xf32, #tpu.memory_space<vmem>>, vector<16x16x128xf32>
    %96 = vector.shape_cast %95 : vector<16x16x128xf32> to vector<256x128xf32>
    %c768_109 = arith.constant 768 : index
    %c0_110 = arith.constant 0 : index
    %97 = vector.load %arg4[%c768_109, %c0_110] : memref<1152x128xf32, #tpu.memory_space<vmem>>, vector<128x128xf32>
    %cst_111 = arith.constant dense<0.000000e+00> : vector<256x128xf32>
    %98 = tpu.matmul %96, %97, %cst_111 {dimension_numbers = #tpu.dot_dimension_numbers<[1], [0], [0], [1], [0, 0, 1, 1], [], []>} : vector<256x128xf32>, vector<128x128xf32>, vector<256x128xf32> -> vector<256x128xf32>
    %99 = arith.addf %94, %98 : vector<256x128xf32>
    %c2_112 = arith.constant 2 : index
    %c1_113 = arith.constant 1 : index
    %c0_114 = arith.constant 0 : index
    %100 = vector.load %arg7[%c2_112, %c1_113, %c0_114] : memref<18x18x128xf32, #tpu.memory_space<vmem>>, vector<16x16x128xf32>
    %101 = vector.shape_cast %100 : vector<16x16x128xf32> to vector<256x128xf32>
    %c896_115 = arith.constant 896 : index
    %c0_116 = arith.constant 0 : index
    %102 = vector.load %arg4[%c896_115, %c0_116] : memref<1152x128xf32, #tpu.memory_space<vmem>>, vector<128x128xf32>
    %cst_117 = arith.constant dense<0.000000e+00> : vector<256x128xf32>
    %103 = tpu.matmul %101, %102, %cst_117 {dimension_numbers = #tpu.dot_dimension_numbers<[1], [0], [0], [1], [0, 0, 1, 1], [], []>} : vector<256x128xf32>, vector<128x128xf32>, vector<256x128xf32> -> vector<256x128xf32>
    %104 = arith.addf %99, %103 : vector<256x128xf32>
    %c2_118 = arith.constant 2 : index
    %c2_119 = arith.constant 2 : index
    %c0_120 = arith.constant 0 : index
    %105 = vector.load %arg7[%c2_118, %c2_119, %c0_120] : memref<18x18x128xf32, #tpu.memory_space<vmem>>, vector<16x16x128xf32>
    %106 = vector.shape_cast %105 : vector<16x16x128xf32> to vector<256x128xf32>
    %c1024_121 = arith.constant 1024 : index
    %c0_122 = arith.constant 0 : index
    %107 = vector.load %arg4[%c1024_121, %c0_122] : memref<1152x128xf32, #tpu.memory_space<vmem>>, vector<128x128xf32>
    %cst_123 = arith.constant dense<0.000000e+00> : vector<256x128xf32>
    %108 = tpu.matmul %106, %107, %cst_123 {dimension_numbers = #tpu.dot_dimension_numbers<[1], [0], [0], [1], [0, 0, 1, 1], [], []>} : vector<256x128xf32>, vector<128x128xf32>, vector<256x128xf32> -> vector<256x128xf32>
    %109 = arith.addf %104, %108 : vector<256x128xf32>
    %c0_124 = arith.constant 0 : index
    %c0_125 = arith.constant 0 : index
    %110 = vector.load %arg5[%c0_124, %c0_125] : memref<1x128xf32, #tpu.memory_space<vmem>>, vector<1x128xf32>
    %111 = vector.broadcast %110 : vector<1x128xf32> to vector<256x128xf32>
    %112 = arith.addf %109, %111 : vector<256x128xf32>
    %cst_126 = arith.constant 0.000000e+00 : f32
    %113 = vector.broadcast %cst_126 : f32 to vector<256x128xf32>
    %114 = arith.maximumf %112, %113 : vector<256x128xf32>
    %c0_127 = arith.constant 0 : index
    %c0_128 = arith.constant 0 : index
    %c0_129 = arith.constant 0 : index
    %115 = vector.load %arg6[%c0_127, %c0_128, %c0_129] : memref<1x256x128xf32, #tpu.memory_space<vmem>>, vector<1x256x128xf32>
    %116 = vector.shape_cast %115 : vector<1x256x128xf32> to vector<256x128xf32>
    %117 = vector.shape_cast %114 : vector<256x128xf32> to vector<1x256x128xf32>
    tpu.vector_store %arg6[%c0_127, %c0_128, %c0_129], %117 {strides = array<i32>} : memref<1x256x128xf32, #tpu.memory_space<vmem>>, vector<1x256x128xf32>,
    return
  }
  func.func @transform_0(%arg0: i32) -> (i32, i32, i32, i32) {
    %c0_i32 = arith.constant 0 : i32
    %c0_i32_0 = arith.constant 0 : i32
    %c0_i32_1 = arith.constant 0 : i32
    %c0_i32_2 = arith.constant 0 : i32
    return %arg0, %c0_i32, %c0_i32_0, %c0_i32_1 : i32, i32, i32, i32
  }
  func.func @transform_1(%arg0: i32) -> (i32, i32) {
    %c0_i32 = arith.constant 0 : i32
    %c0_i32_0 = arith.constant 0 : i32
    %c0_i32_1 = arith.constant 0 : i32
    return %c0_i32, %c0_i32_0 : i32, i32
  }
  func.func @transform_2(%arg0: i32) -> (i32, i32) {
    %c0_i32 = arith.constant 0 : i32
    %c0_i32_0 = arith.constant 0 : i32
    %c0_i32_1 = arith.constant 0 : i32
    return %c0_i32, %c0_i32_0 : i32, i32
  }
  func.func @transform_3(%arg0: i32) -> (i32, i32) {
    %c0_i32 = arith.constant 0 : i32
    %c0_i32_0 = arith.constant 0 : i32
    %c0_i32_1 = arith.constant 0 : i32
    return %c0_i32, %c0_i32_0 : i32, i32
  }
  func.func @transform_4(%arg0: i32) -> (i32, i32) {
    %c0_i32 = arith.constant 0 : i32
    %c0_i32_0 = arith.constant 0 : i32
    %c0_i32_1 = arith.constant 0 : i32
    return %c0_i32, %c0_i32_0 : i32, i32
  }
  func.func @transform_5(%arg0: i32) -> (i32, i32, i32) {
    %c0_i32 = arith.constant 0 : i32
    %c0_i32_0 = arith.constant 0 : i32
    %c0_i32_1 = arith.constant 0 : i32
    return %arg0, %c0_i32, %c0_i32_0 : i32, i32, i32
  }
}

</mosaic_0001>

<bundles_post_ra>
// kernel: tpu_custom_call.1
= control target key start
LH: loop header
LB: loop body
LE: loop exit
PB: predicated region body
PF: predicated region fallthrough
CT: control target
= control target key end

     0   :  { %10 = vsyncpa [#allocation4], 0  ;;  %s11054_s0 = inlined_call_operand.hbm [shape: f32[2,16,16,128], index: 0, kind: input, shape index: {}]   ;;  %s11055_s1 = inlined_call_operand.hbm [shape: f32[1152,128], index: 1, kind: input, shape index: {}]   ;;  %s11056_s2 = inlined_call_operand.vmem [shape: f32[1,128], index: 2, kind: input, shape index: {}]   ;;  %s11057_s3 = inlined_call_operand.hbm [shape: f32[1152,128], index: 3, kind: input, shape index: {}]   ;;  %s11058_s4 = inlined_call_operand.vmem [shape: f32[1,128], index: 4, kind: input, shape index: {}]   ;;  %s11059_s5 = inlined_call_operand.hbm [shape: f32[2,256,128], index: 5, kind: output, shape index: {}]  }
   0x1   :  { %12 = vsyncpa [#allocation4 + $0x1], 0 }
   0x2   :  { %13 = vsyncpa [#allocation7], 0 }
   0x3   :  { %14 = vsyncpa [#allocation5], 0 }
   0x4   :  { %16 = vsyncpa [#allocation5 + $0x1], 0  ;;  %s9742_s18 = smov 0   ;;  %s9744_s19 = smov 0  }
   0x5   :  { %s9746_s20 = smov 0   ;;  %s9748_s21 = smov 0  }
   0x6 LB: > { %s9763_s22 = sadd.s32 4294967295, %s9701_s21   ;;  %s6055_s23 = sadd.s32 4294967294, %s9701_s21   ;;  %s9701_s21 = sphi %s9748_s21, %s11305_s21   ;;  %s9697_s20 = sphi %s9746_s20, %s11304_s20   ;;  %s9693_s19 = sphi %s9744_s19, %s11303_s19   ;;  %s9689_s18 = sphi %s9742_s18, %s11302_s18  }
   0x7   : > { %p42_p0 = scmp.ne.s32.totalorder %s9693_s19, %s9689_s18  ;;  %p11060_p1 = scmp.eq.s32.totalorder %s9763_s22, 0 }
   0x8   : > { %p156_p3 = scmp.eq.s32.totalorder %s6055_s23, 1  ;;  %p6056_p5 = scmp.ge.s32.totalorder %s9701_s21, 1 }
   0x9   : > { %p9772_p4 = por %p11060_p1, %p42_p0  ;;  %p163_p7 = scmp.lt.s32.totalorder %s9701_s21, 3 }
   0xa   : > { %p9777_p6 = por %p156_p3, %p42_p0  ;;  %s9703_s27 = smov [#allocation6]  }
   0xb   : > { %s11139_s24 = scalar_select %p9772_p4, 1, 0 }
   0xc   : > { %s11140_s25 = scalar_select %p9777_p6, 1, 0 }
   0xd   : > { %p9782_p8 = pnand %p6056_p5, %p163_p7  ;;  %s175_s28 = sshll.u32 %s9703_s27, 4  ;;  %s9786_s28 = int_to_ptr.vmem [resolvable:$true] %s175_s28 }
   0xe   : > { %s9704_s30 = smov [#allocation8]   ;;  %s9545_s9 = scalar_lea.hbm %s11055_s1, 18432 }
   0xf   : > { %p9481_p9 = pneg %p9782_p8  ;;  %s191_s6 = sshll.u32 %s9704_s30, 4  ;;  %s9797_s6 = int_to_ptr.vmem [resolvable:$true] %s191_s6 }
  0x10   : > { %p9546_p12 = scmp.ne.s32.totalorder %s11055_s1, %s9545_s9  ;;  %p9552_p5 = scmp.lt.u32.totalorder %s9545_s9, %s11055_s1 }
  0x11   : > { %p9793_p11 = pnand %p9481_p9, %p11060_p1 }
  0x13   : > { %p9547_p13 = pneg %p9793_p11 }
  0x15   : > { %p9548_p0 = pnand %p9547_p13, %p9546_p12 }
  0x17   : > { %p9549_p3 = pneg %p9548_p0 }
  0x19   : > { %p9554_p7 = pnand %p9552_p5, %p9549_p3 }
  0x1b   : > { %9557 = shalt.err (!%p9554_p7)
}
  0x1c   : > { %s9558_s14 = scalar_lea.vmem %s9786_s28, 18432  ;;  %p9566_p2 = scmp.lt.s32.totalorder %s9786_s28, %s9786_s28 }
  0x1d   : > { %p9559_p9 = scmp.ne.s32.totalorder %s9786_s28, %s9558_s14  ;;  %p9567_p12 = scmp.lt.s32.totalorder %s9558_s14, %s9558_s14 }
  0x1f   : > { %p9561_p10 = pnand %p9559_p9, %p9547_p13  ;;  %p9568_p0 = por %p9567_p12, %p9566_p2 }
  0x21   : > { %p9562_p1 = pneg %p9561_p10 }
  0x23   : > { %p9569_p6 = pnand %p9568_p0, %p9562_p1 }
  0x25   : > { %9572 = shalt.err (!%p9569_p6)
}
  0x26   : > { %s9705_s15 = smov 128   ;;  %s9706_s16 = smov 8  }
  0x27   : > { %9484 = dma.hbm_to_vmem [thread:$0]  (!%p9793_p11), %s11055_s1, 18432, %s9786_s28, [#allocation7], %s9705_s15, %s9705_s15, %s9706_s16  }
  0x28   : > { %s9573_s7 = scalar_lea.hbm %s11057_s3, 18432 }
  0x29   : > { %p9574_p1 = scmp.ne.s32.totalorder %s11057_s3, %s9573_s7  ;;  %p9580_p10 = scmp.lt.u32.totalorder %s9573_s7, %s11057_s3 }
  0x2b   : > { %p9576_p2 = pnand %p9574_p1, %p9547_p13 }
  0x2d   : > { %p9577_p6 = pneg %p9576_p2 }
  0x2f   : > { %p9582_p3 = pnand %p9580_p10, %p9577_p6 }
  0x31   : > { %9585 = shalt.err (!%p9582_p3)
}
  0x32   : > { %s9586_s28 = scalar_lea.vmem %s9797_s6, 18432  ;;  %p9594_p12 = scmp.lt.s32.totalorder %s9797_s6, %s9797_s6 }
  0x33   : > { %p9587_p5 = scmp.ne.s32.totalorder %s9797_s6, %s9586_s28  ;;  %p9595_p0 = scmp.lt.s32.totalorder %s9586_s28, %s9586_s28 }
  0x35   : > { %p9589_p7 = pnand %p9587_p5, %p9547_p13  ;;  %p9596_p1 = por %p9595_p0, %p9594_p12 }
  0x37   : > { %p9590_p9 = pneg %p9589_p7 }
  0x39   : > { %p9597_p2 = pnand %p9596_p1, %p9590_p9 }
  0x3b   : > { %9600 = shalt.err (!%p9597_p2)
}
  0x3c   : > { %9487 = dma.hbm_to_vmem [thread:$0]  (!%p9793_p11), %s11057_s3, 18432, %s9797_s6, [#allocation7], %s9705_s15, %s9705_s15, %s9706_s16  }
  0x3d   : > { %s9858_s29 = sadd.s32 1, %s9701_s21   ;;  %s29_s14 = sadd.s32 1, %s9697_s20 }
  0x3e   : > { %s26_s17 = ssub.s32 %s9701_s21, %s9858_s29  ;;  %p36_p13 = scmp.ne.s32.totalorder %s9697_s20, %s9693_s19 }
  0x3f   : > { %p27_p6 = scmp.eq.s32.totalorder %s26_s17, 0  ;;  %p37_p10 = scmp.eq.s32.totalorder %s9701_s21, 0 }
  0x40   : > { %p11143_p3 = scmp.eq.s32.totalorder %s9763_s22, 1  ;;  %p9498_p7 = scmp.lt.s32.totalorder %s9701_s21, 2 }
  0x41   : > { %s9874_s27 = scalar_select %p27_p6, %s9697_s20, %s29_s14  }
  0x42   : > { %p9868_p5 = por %p11143_p3, %p36_p13  ;;  %p38_p9 = por %p37_p10, %p36_p13 }
  0x43   : > { %s208_s30 = sand.u32 1, %s9697_s20   ;;  %s6075_s6 = sshll.u32 %s9701_s21, 12 }
  0x44   : > { %s11144_s23 = scalar_select %p9868_p5, 1, 0 }
  0x45   : > { %s6060_s7 = sshll.u32 %s208_s30, 8  ;;  %s9881_s10 = scalar_lea.hbm %s11054_s0, %s6075_s6 }
  0x46   : > { %s212_s11 = scalar_lea.vmem [#allocation3], %s6060_s7  ;;  %p9885_p11 = pnand %p9498_p7, %p38_p9 }
  0x47   : > { %s219_s28 = sshll.u32 %s212_s11, 4  ;;  %s9889_s13 = scalar_lea.sflag [#allocation4], %s208_s30  ;;  %s9883_s28 = int_to_ptr.vmem [resolvable:$true] %s219_s28 }
  0x48   : > { %s9601_s14 = scalar_lea.hbm %s9881_s10, 4096  ;;  %p9603_p0 = pneg %p9885_p11 }
  0x49   : > { %p9602_p12 = scmp.ne.s32.totalorder %s9881_s10, %s9601_s14  ;;  %s9606_s6 = scalar_lea.hbm %s11054_s0, 8192 }
  0x4a   : > { %p9607_p13 = scmp.lt.u32.totalorder %s9881_s10, %s11054_s0  ;;  %p9608_p6 = scmp.lt.u32.totalorder %s9606_s6, %s9601_s14 }
  0x4b   : > { %p9604_p1 = pnand %p9603_p0, %p9602_p12  ;;  %p9610_p3 = scmp.lt.u32.totalorder %s9601_s14, %s9881_s10 }
  0x4c   : > { %p9609_p10 = por %p9608_p6, %p9607_p13 }
  0x4d   : > { %p9605_p2 = pneg %p9604_p1 }
  0x4e   : > { %p9611_p7 = por %p9610_p3, %p9609_p10 }
  0x50   : > { %p9612_p9 = pnand %p9611_p7, %p9605_p2 }
  0x52   : > { %9615 = shalt.err (!%p9612_p9)
}
  0x53   : > { %s9616_s30 = scalar_lea.vmem %s9883_s28, 4096  ;;  %s9707_s11 = smov [#allocation3]  }
  0x54   : > { %p9617_p12 = scmp.ne.s32.totalorder %s9883_s28, %s9616_s30  ;;  %s9621_s17 = sshll.u32 %s9707_s11, 4  ;;  %s9622_s17 = int_to_ptr.vmem [resolvable:$false] %s9621_s17 }
  0x55   : > { %s9623_s7 = scalar_lea.vmem %s9622_s17, 8192  ;;  %p9624_p4 = scmp.lt.s32.totalorder %s9883_s28, %s9622_s17 }
  0x56   : > { %p9619_p1 = pnand %p9617_p12, %p9603_p0  ;;  %p9625_p13 = scmp.lt.s32.totalorder %s9623_s7, %s9616_s30 }
  0x58   : > { %p9620_p5 = pneg %p9619_p1  ;;  %p9626_p6 = por %p9625_p13, %p9624_p4 }
  0x5a   : > { %p9627_p10 = pnand %p9626_p6, %p9620_p5 }
  0x5c   : > { %9630 = shalt.err (!%p9627_p10)
}
  0x5d   : > { %9491 = dma.hbm_to_vmem [thread:$0]  (!%p9885_p11), %s9881_s10, 4096, %s9883_s28, %s9889_s13, %s9705_s15, %s9705_s15, %s9706_s16  }
  0x5e   : > { %231 = sbr.rel (%p9782_p8) target bundleno = 1673 (0x689), region = 40 }
  0x65   : > { %s9923_s14 = sand.u32 1, %s9693_s19   ;;  %p11146_p4 = scmp.ne.s32.totalorder %s11139_s24, 0 }
  0x66   : > { %s6064_s6 = sshll.u32 %s9923_s14, 8  ;;  %s234_s8 = scalar_lea.sflag [#allocation4], %s9923_s14 }
  0x67   : > { %s9929_s12 = scalar_lea.vmem [#allocation3], %s6064_s6 }
  0x68   : > { %9676 = dma.done.wait (%p11146_p4), %s234_s8, 4096  }
  0x69   : > { %9678 = vsyncadd (%p11146_p4), %s234_s8, 4294963200  ;;  %p11147_p5 = scmp.eq.s32.totalorder %s9763_s22, 0 }
  0x6b   : > { %9680 = dma.done.wait (%p11147_p5), [#allocation7], 36864   ;;  %p11148_p8 = pmov %p11147_p5 }
  0x6c   : > { %v9708_v0 = vmov 0.0   ;;  %v460_v1 = vld [vmem:[#allocation6 + $0x80] sm:$0xff]  ;;  %v461_v2 = vld [vmem:[#allocation6 + $0x88] sm:$0xff]  ;;  %v462_v3 = vld [vmem:[#allocation6 + $0x90] sm:$0xff]  ;;  %s10939_s10 = scalar_lea.vmem [#allocation9], %s6064_s6  ;;  %s6076_s28 = sshll.u32 %s9763_s22, 12 }
  0x6d   : > { %9682 = vsyncadd (%p11148_p8), [#allocation7], 4294930432  ;;  %272 = vst [vmem:[#allocation2] sm:$0xff] %v9708_v0  ;;  %v8381_v4 = vpack.c.bf16 %v461_v2, %v460_v1  ;;  %v463_v5 = vld [vmem:[#allocation6 + $0x98] sm:$0xff]  ;;  %v464_v7 = vld [vmem:[#allocation6 + $0xa0] sm:$0xff]  ;;  %s5963_s13 = sshll.u32 %s10939_s10, 4  ;;  %s11006_s11 = scalar_lea.hbm %s11059_s5, %s6076_s28  ;;  %s11008_s13 = int_to_ptr.vmem [resolvable:$true] %s5963_s13 }
  0x6e   : > { %273 = vst [vmem:[#allocation2 + $0x8] sm:$0xff] %v9708_v0  ;;  %274 = vst [vmem:[#allocation2 + $0x10] sm:$0x3] %v9708_v0  ;;  %v8385_v6 = vpack.c.bf16 %v463_v5, %v462_v3  ;;  %v465_v8 = vld [vmem:[#allocation6 + $0xa8] sm:$0xff]  ;;  %v466_v11 = vld [vmem:[#allocation6 + $0xb0] sm:$0xff]  ;;  %s5950_s22 = scalar_lea.sflag [#allocation5], %s9923_s14 }
  0x6f   : > { %276 = vst [vmem:[#allocation2 + $0x198] sm:$0xff] %v9708_v0  ;;  %277 = vst [vmem:[#allocation2 + $0x1a0] sm:$0xff] %v9708_v0  ;;  %8382 = vmatprep.subr.bf16.mxu0 %v8381_v4  ;;  %v8389_v9 = vpack.c.bf16 %v465_v8, %v464_v7  ;;  %v467_v12 = vld [vmem:[#allocation6 + $0xb8] sm:$0xff]  ;;  %v9982_v13 = vld [vmem:[%s9929_s12] sm:$0xff]  ;;  %s9631_s17 = scalar_lea.vmem %s11008_s13, 4096  ;;  %p11299_p0 = scmp.ne.s32.totalorder %s11144_s23, 0 }
  0x70   : > { %278 = vst [vmem:[#allocation2 + $0x1a8] sm:$0x3] %v9708_v0  ;;  %280 = vst [vmem:[#allocation2 + $0x18] sm:$0x1] %v9708_v0  ;;  %8384 = vmatpush3.bf16.msra.mxu0 %v8381_v4  ;;  %v9986_v14 = vld [vmem:[%s9929_s12 + $0x8] sm:$0xff]  ;;  %v9989_v15 = vld [vmem:[%s9929_s12 + $0x10] sm:$0xff]  ;;  %v8393_v18 = vpack.c.bf16 %v467_v12, %v466_v11  ;;  %p9632_p11 = scmp.ne.s32.totalorder %s11008_s13, %s9631_s17 }
  0x71   : > { %281 = vst [vmem:[#allocation2 + $0x30] sm:$0x1] %v9708_v0  ;;  %282 = vst [vmem:[#allocation2 + $0x48] sm:$0x1] %v9708_v0  ;;  %8386 = vmatprep.subr.bf16.mxu0 %v8385_v6  ;;  %v9992_v16 = vld [vmem:[%s9929_s12 + $0x18] sm:$0xff]  ;;  %v9998_v17 = vld [vmem:[%s9929_s12 + $0x20] sm:$0xff] }
  0x72   : > { %283 = vst [vmem:[#allocation2 + $0x60] sm:$0x1] %v9708_v0  ;;  %284 = vst [vmem:[#allocation2 + $0x78] sm:$0x1] %v9708_v0  ;;  %v10002_v19 = vld [vmem:[%s9929_s12 + $0x28] sm:$0xff]  ;;  %v10005_v20 = vld [vmem:[%s9929_s12 + $0x30] sm:$0xff]  ;;  %p9633_p2 = pnand %p9632_p11, %p11299_p0 }
  0x73   : > { %285 = vst [vmem:[#allocation2 + $0x90] sm:$0x1] %v9708_v0  ;;  %286 = vst [vmem:[#allocation2 + $0xa8] sm:$0x1] %v9708_v0  ;;  %v10008_v21 = vld [vmem:[%s9929_s12 + $0x38] sm:$0xff]  ;;  %v468_v22 = vld [vmem:[#allocation6 + $0xc0] sm:$0xff] }
  0x74   : > { %287 = vst [vmem:[#allocation2 + $0xc0] sm:$0x1] %v9708_v0  ;;  %288 = vst [vmem:[#allocation2 + $0xd8] sm:$0x1] %v9708_v0  ;;  %8388 = vmatpush3.bf16.msra.mxu0 %v8385_v6  ;;  %v469_v23 = vld [vmem:[#allocation6 + $0xc8] sm:$0xff]  ;;  %v10014_v24 = vld [vmem:[%s9929_s12 + $0x40] sm:$0xff]  ;;  %p9634_p3 = pneg %p9633_p2 }
  0x75   : > { %289 = vst [vmem:[#allocation2 + $0xf0] sm:$0x1] %v9708_v0  ;;  %290 = vst [vmem:[#allocation2 + $0x108] sm:$0x1] %v9708_v0  ;;  %v428_v10 = vld [vmem:[#allocation2 + $0x1] sm:$0xff]  ;;  %8390 = vmatprep.subr.bf16.mxu0 %v8389_v9  ;;  %v10018_v25 = vld [vmem:[%s9929_s12 + $0x48] sm:$0xff]  ;;  %v8397_v29 = vpack.c.bf16 %v469_v23, %v468_v22 }
  0x76   : > { %291 = vst [vmem:[#allocation2 + $0x120] sm:$0x1] %v9708_v0  ;;  %292 = vst [vmem:[#allocation2 + $0x138] sm:$0x1] %v9708_v0  ;;  %6973 = vmatprep.mubr.f32.mxu0 %v428_v10  ;;  %v10021_v26 = vld [vmem:[%s9929_s12 + $0x50] sm:$0xff]  ;;  %v10024_v27 = vld [vmem:[%s9929_s12 + $0x58] sm:$0xff] }
  0x77   : > { %293 = vst [vmem:[#allocation2 + $0x150] sm:$0x1] %v9708_v0  ;;  %294 = vst [vmem:[#allocation2 + $0x168] sm:$0x1] %v9708_v0  ;;  %v10030_v28 = vld [vmem:[%s9929_s12 + $0x60] sm:$0xff]  ;;  %v10034_v30 = vld [vmem:[%s9929_s12 + $0x68] sm:$0xff] }
  0x78   : > { %295 = vst [vmem:[#allocation2 + $0x180] sm:$0x1] %v9708_v0  ;;  %298 = vst [vmem:[#allocation2 + $0x29] sm:$0x1] %v9708_v0  ;;  %8392 = vmatpush3.bf16.msra.mxu0 %v8389_v9  ;;  %v10037_v31 = vld [vmem:[%s9929_s12 + $0x70] sm:$0xff]  ;;  %v10040_v32 = vld [vmem:[%s9929_s12 + $0x78] sm:$0xff] }
  0x79   : > { %299 = vst [vmem:[#allocation2 + $0x41] sm:$0x1] %v9708_v0  ;;  %300 = vst [vmem:[#allocation2 + $0x59] sm:$0x1] %v9708_v0  ;;  %8394 = vmatprep.subr.bf16.mxu0 %v8393_v18  ;;  %v470_v33 = vld [vmem:[#allocation6 + $0xd0] sm:$0xff]  ;;  %v471_v34 = vld [vmem:[#allocation6 + $0xd8] sm:$0xff] }
  0x7a   : > { %301 = vst [vmem:[#allocation2 + $0x71] sm:$0x1] %v9708_v0  ;;  %302 = vst [vmem:[#allocation2 + $0x89] sm:$0x1] %v9708_v0  ;;  %v10046_v35 = vld [vmem:[%s9929_s12 + $0x80] sm:$0xff]  ;;  %v10050_v36 = vld [vmem:[%s9929_s12 + $0x88] sm:$0xff]  ;;  %v8401_v40 = vpack.c.bf16 %v471_v34, %v470_v33 }
  0x7b   : > { %303 = vst [vmem:[#allocation2 + $0xa1] sm:$0x1] %v9708_v0  ;;  %304 = vst [vmem:[#allocation2 + $0xb9] sm:$0x1] %v9708_v0  ;;  %v10053_v37 = vld [vmem:[%s9929_s12 + $0x90] sm:$0xff]  ;;  %v10056_v38 = vld [vmem:[%s9929_s12 + $0x98] sm:$0xff] }
  0x7c   : > { %305 = vst [vmem:[#allocation2 + $0xd1] sm:$0x1] %v9708_v0  ;;  %306 = vst [vmem:[#allocation2 + $0xe9] sm:$0x1] %v9708_v0  ;;  %8396 = vmatpush3.bf16.msra.mxu0 %v8393_v18  ;;  %v10062_v39 = vld [vmem:[%s9929_s12 + $0xa0] sm:$0xff]  ;;  %v10066_v41 = vld [vmem:[%s9929_s12 + $0xa8] sm:$0xff] }
  0x7d   : > { %307 = vst [vmem:[#allocation2 + $0x101] sm:$0x1] %v9708_v0  ;;  %308 = vst [vmem:[#allocation2 + $0x119] sm:$0x1] %v9708_v0  ;;  %8398 = vmatprep.subr.bf16.mxu0 %v8397_v29  ;;  %v10069_v42 = vld [vmem:[%s9929_s12 + $0xb0] sm:$0xff]  ;;  %v10072_v43 = vld [vmem:[%s9929_s12 + $0xb8] sm:$0xff] }
  0x7e   : > { %309 = vst [vmem:[#allocation2 + $0x131] sm:$0x1] %v9708_v0  ;;  %310 = vst [vmem:[#allocation2 + $0x149] sm:$0x1] %v9708_v0  ;;  %v472_v44 = vld [vmem:[#allocation6 + $0xe0] sm:$0xff]  ;;  %v473_v45 = vld [vmem:[#allocation6 + $0xe8] sm:$0xff] }
  0x7f   : > { %311 = vst [vmem:[#allocation2 + $0x161] sm:$0x1] %v9708_v0  ;;  %312 = vst [vmem:[#allocation2 + $0x179] sm:$0x1] %v9708_v0  ;;  %v10078_v46 = vld [vmem:[%s9929_s12 + $0xc0] sm:$0xff]  ;;  %v10082_v47 = vld [vmem:[%s9929_s12 + $0xc8] sm:$0xff]  ;;  %v8405_v51 = vpack.c.bf16 %v473_v45, %v472_v44 }
  0x80   : > { %313 = vst [vmem:[#allocation2 + $0x191] sm:$0x1] %v9708_v0  ;;  %279 = vst [vmem:[#allocation2] sm:$0x1] %v9708_v0  ;;  %v10085_v48 = vld [vmem:[%s9929_s12 + $0xd0] sm:$0xff]  ;;  %v10088_v49 = vld [vmem:[%s9929_s12 + $0xd8] sm:$0xff]  ;;  %8400 = vmatpush3.bf16.msra.mxu0 %v8397_v29 }
  0x81   : > { %296 = vst [vmem:[#allocation2 + $0x198] sm:$0x1] %v9708_v0  ;;  %297 = vst [vmem:[#allocation2 + $0x11] sm:$0x1] %v9708_v0  ;;  %v10094_v50 = vld [vmem:[%s9929_s12 + $0xe0] sm:$0xff]  ;;  %8402 = vmatprep.subr.bf16.mxu0 %v8401_v40  ;;  %v10098_v52 = vld [vmem:[%s9929_s12 + $0xe8] sm:$0xff] }
  0x82   : > { %314 = vst [vmem:[#allocation2 + $0x1a9] sm:$0x1] %v9708_v0  ;;  %348 = vst [vmem:[#allocation2 + $0x19] sm:$0xff] %v9982_v13  ;;  %v474_v53 = vld [vmem:[#allocation6 + $0xf0] sm:$0xff]  ;;  %v475_v54 = vld [vmem:[#allocation6 + $0xf8] sm:$0xff]  ;;  %s9709_s7 = smov [#allocation9]  }
  0x83   : > { %349 = vst [vmem:[#allocation2 + $0x21] sm:$0xff] %v9986_v14  ;;  %350 = vst [vmem:[#allocation2 + $0x31] sm:$0xff] %v9989_v15  ;;  %v8409_v55 = vpack.c.bf16 %v475_v54, %v474_v53  ;;  %v412_v56 = vld [vmem:[#allocation6] sm:$0xff]  ;;  %v413_v57 = vld [vmem:[#allocation6 + $0x8] sm:$0xff]  ;;  %s9635_s6 = sshll.u32 %s9709_s7, 4  ;;  %s9636_s6 = int_to_ptr.vmem [resolvable:$false] %s9635_s6 }
  0x84   : > { %351 = vst [vmem:[#allocation2 + $0x39] sm:$0xff] %v9992_v16  ;;  %352 = vst [vmem:[#allocation2 + $0x49] sm:$0xff] %v9998_v17  ;;  %8404 = vmatpush3.bf16.msra.mxu0 %v8401_v40  ;;  %v8413_v58 = vpack.c.bf16 %v413_v57, %v412_v56  ;;  %v414_v59 = vld [vmem:[#allocation6 + $0x10] sm:$0xff]  ;;  %v415_v60 = vld [vmem:[#allocation6 + $0x18] sm:$0xff]  ;;  %s9637_s8 = scalar_lea.vmem %s9636_s6, 8192  ;;  %p9638_p7 = scmp.lt.s32.totalorder %s11008_s13, %s9636_s6 }
  0x85   : > { %353 = vst [vmem:[#allocation2 + $0x51] sm:$0xff] %v10002_v19  ;;  %354 = vst [vmem:[#allocation2 + $0x61] sm:$0xff] %v10005_v20  ;;  %8406 = vmatprep.subr.bf16.mxu0 %v8405_v51  ;;  %v429_v61 = vld [vmem:[#allocation2 + $0x9] sm:$0xff]  ;;  %v8417_v62 = vpack.c.bf16 %v415_v60, %v414_v59  ;;  %v417_v1 = vld [vmem:[#allocation6 + $0x28] sm:$0xff]  ;;  %p9639_p9 = scmp.lt.s32.totalorder %s9637_s8, %s9631_s17 }
  0x86   : > { %355 = vst [vmem:[#allocation2 + $0x69] sm:$0xff] %v10008_v21  ;;  %356 = vst [vmem:[#allocation2 + $0x79] sm:$0xff] %v10014_v24  ;;  %v416_v63 = vld [vmem:[#allocation6 + $0x20] sm:$0xff]  ;;  %v418_v3 = vld [vmem:[#allocation6 + $0x30] sm:$0xff] }
  0x87   : > { %357 = vst [vmem:[#allocation2 + $0x81] sm:$0xff] %v10018_v25  ;;  %358 = vst [vmem:[#allocation2 + $0x91] sm:$0xff] %v10021_v26  ;;  %v8421_v2 = vpack.c.bf16 %v417_v1, %v416_v63  ;;  %v419_v4 = vld [vmem:[#allocation6 + $0x38] sm:$0xff]  ;;  %v420_v6 = vld [vmem:[#allocation6 + $0x40] sm:$0xff]  ;;  %p9640_p12 = por %p9639_p9, %p9638_p7 }
  0x88   : > { %359 = vst [vmem:[#allocation2 + $0x99] sm:$0xff] %v10024_v27  ;;  %360 = vst [vmem:[#allocation2 + $0xa9] sm:$0xff] %v10030_v28  ;;  %8408 = vmatpush3.bf16.msra.mxu0 %v8405_v51  ;;  %v8425_v5 = vpack.c.bf16 %v419_v4, %v418_v3  ;;  %v421_v7 = vld [vmem:[#allocation6 + $0x48] sm:$0xff]  ;;  %v422_v9 = vld [vmem:[#allocation6 + $0x50] sm:$0xff] }
  0x89   : > { %361 = vst [vmem:[#allocation2 + $0xb1] sm:$0xff] %v10034_v30  ;;  %362 = vst [vmem:[#allocation2 + $0xc1] sm:$0xff] %v10037_v31  ;;  %8410 = vmatprep.subr.bf16.mxu0 %v8409_v55  ;;  %v8429_v8 = vpack.c.bf16 %v421_v7, %v420_v6  ;;  %v423_v10 = vld [vmem:[#allocation6 + $0x58] sm:$0xff]  ;;  %v424_v12 = vld [vmem:[#allocation6 + $0x60] sm:$0xff]  ;;  %p9641_p1 = pnand %p9640_p12, %p9634_p3 }
  0x8a   : > { %363 = vst [vmem:[#allocation2 + $0xc9] sm:$0xff] %v10040_v32  ;;  %364 = vst [vmem:[#allocation2 + $0xd9] sm:$0xff] %v10046_v35  ;;  %v8433_v11 = vpack.c.bf16 %v423_v10, %v422_v9  ;;  %v425_v18 = vld [vmem:[#allocation6 + $0x68] sm:$0xff]  ;;  %v426_v23 = vld [vmem:[#allocation6 + $0x70] sm:$0xff] }
  0x8b   : > { %365 = vst [vmem:[#allocation2 + $0xe1] sm:$0xff] %v10050_v36  ;;  %366 = vst [vmem:[#allocation2 + $0xf1] sm:$0xff] %v10053_v37  ;;  %v8437_v22 = vpack.c.bf16 %v425_v18, %v424_v12  ;;  %v427_v29 = vld [vmem:[#allocation6 + $0x78] sm:$0xff]  ;;  %v958_v34 = vld [vmem:[#allocation6 + $0x100] sm:$0xff] }
  0x8c   : > { %367 = vst [vmem:[#allocation2 + $0xf9] sm:$0xff] %v10056_v38  ;;  %11149 = vst [vmem:[#allocation13_spill] sm:$0xff] %v10062_v39  ;;  %8412 = vmatpush3.bf16.msra.mxu0 %v8409_v55  ;;  %v8441_v33 = vpack.c.bf16 %v427_v29, %v426_v23  ;;  %v959_v40 = vld [vmem:[#allocation6 + $0x108] sm:$0xff]  ;;  %v380_v45 = vld [vmem:[#allocation2] sm:$0xff] }
  0x8d   : > { %368 = vst [vmem:[#allocation2 + $0x109] sm:$0xff] %v10062_v39  ;;  %11150 = vst [vmem:[#allocation14_spill] sm:$0xff] %v10066_v41  ;;  %8414 = vmatprep.subr.bf16.mxu0 %v8413_v58  ;;  %v8445_v44 = vpack.c.bf16 %v959_v40, %v958_v34  ;;  %v960_v51 = vld [vmem:[#allocation6 + $0x110] sm:$0xff]  ;;  %v961_v53 = vld [vmem:[#allocation6 + $0x118] sm:$0xff] }
  0x8e   : > { %11151 = vst [vmem:[#allocation15_spill] sm:$0xff] %v10069_v42  ;;  %11152 = vst [vmem:[#allocation16_spill] sm:$0xff] %v10072_v43  ;;  %v10131_v54 = vld [vmem:[#allocation2 + $0x18] sm:$0xff]  ;;  %v8449_v55 = vpack.c.bf16 %v961_v53, %v960_v51  ;;  %v962_v56 = vld [vmem:[#allocation6 + $0x120] sm:$0xff] }
  0x8f   : > { %369 = vst [vmem:[#allocation2 + $0x111] sm:$0xff] %v10066_v41  ;;  %370 = vst [vmem:[#allocation2 + $0x121] sm:$0xff] %v10069_v42  ;;  %6974 = vmatmul.mubr.f32.vlgmr.msra.gmra.mrb[0].mxu0 %v429_v61  ;;  %v963_v57 = vld [vmem:[#allocation6 + $0x128] sm:$0xff]  ;;  %v10137_v59 = vld [vmem:[#allocation2 + $0x30] sm:$0xff] }
  0x90   : > { %371 = vst [vmem:[#allocation2 + $0x129] sm:$0xff] %v10072_v43  ;;  %11153 = vst [vmem:[#allocation17_spill] sm:$0xff] %v10078_v46  ;;  %8416 = vmatpush3.bf16.msra.mxu0 %v8413_v58  ;;  %6976 = vmatprep.mubr.f32.mxu0 %v9982_v13  ;;  %v10135_v58 = vld [vmem:[#allocation2 + $0x20] sm:$0xff]  ;;  %v8453_v60 = vpack.c.bf16 %v963_v57, %v962_v56  ;;  %v10141_v63 = vld [vmem:[#allocation2 + $0x38] sm:$0xff] }
  0x91   : > { %372 = vst [vmem:[#allocation2 + $0x139] sm:$0xff] %v10078_v46  ;;  %11154 = vst [vmem:[#allocation18_spill] sm:$0xff] %v10082_v47  ;;  %8418 = vmatprep.subr.bf16.mxu0 %v8417_v62  ;;  %v964_v61 = vld [vmem:[#allocation6 + $0x130] sm:$0xff]  ;;  %v10143_v1 = vld [vmem:[#allocation2 + $0x48] sm:$0xff] }
  0x92   : > { %11155 = vst [vmem:[#allocation19_spill] sm:$0xff] %v10085_v48  ;;  %11156 = vst [vmem:[#allocation20_spill] sm:$0xff] %v10088_v49  ;;  %v967_v3 = vld [vmem:[#allocation6 + $0x148] sm:$0xff]  ;;  %v10147_v4 = vld [vmem:[#allocation2 + $0x50] sm:$0xff] }
  0x93   : > { %373 = vst [vmem:[#allocation2 + $0x141] sm:$0xff] %v10082_v47  ;;  %374 = vst [vmem:[#allocation2 + $0x151] sm:$0xff] %v10085_v48  ;;  %6977 = vmatmul.mubr.f32.gmra.mrb[2].mxu0 %v9986_v14  ;;  %v968_v7 = vld [vmem:[#allocation6 + $0x150] sm:$0xff]  ;;  %v10153_v9 = vld [vmem:[#allocation2 + $0x68] sm:$0xff] }
  0x94   : > { %375 = vst [vmem:[#allocation2 + $0x159] sm:$0xff] %v10088_v49  ;;  %11157 = vst [vmem:[#allocation21_spill] sm:$0xff] %v10094_v50  ;;  %6979 = vmatprep.mubr.f32.mxu0 %v9989_v15  ;;  %8420 = vmatpush3.bf16.msra.mxu0 %v8417_v62  ;;  %v965_v62 = vld [vmem:[#allocation6 + $0x138] sm:$0xff]  ;;  %v10155_v10 = vld [vmem:[#allocation2 + $0x78] sm:$0xff] }
  0x95   : > { %376 = vst [vmem:[#allocation2 + $0x169] sm:$0xff] %v10094_v50  ;;  %11158 = vst [vmem:[#allocation22_spill] sm:$0xff] %v10098_v52  ;;  %8422 = vmatprep.subr.bf16.mxu0 %v8421_v2  ;;  %v970_v12 = vld [vmem:[#allocation6 + $0x160] sm:$0xff]  ;;  %v971_v18 = vld [vmem:[#allocation6 + $0x168] sm:$0xff] }
  0x96   : > { %377 = vst [vmem:[#allocation2 + $0x171] sm:$0xff] %v10098_v52  ;;  %v10161_v23 = vld [vmem:[#allocation2 + $0x90] sm:$0xff]  ;;  %v8469_v29 = vpack.c.bf16 %v971_v18, %v970_v12  ;;  %v973_v34 = vld [vmem:[#allocation6 + $0x178] sm:$0xff]  ;;  %v10165_v40 = vld [vmem:[#allocation2 + $0x98] sm:$0xff] }
  0x97   : > { %6980 = vmatmul.mubr.f32.gmra.mrb[4].mxu0 %v9992_v16  ;;  %v1263_v51 = vld [vmem:[#allocation6 + $0x180] sm:$0xff]  ;;  %v1264_v53 = vld [vmem:[#allocation6 + $0x188] sm:$0xff]  ;;  %v10173_v56 = vld [vmem:[#allocation2 + $0xc0] sm:$0xff] }
  0x98   : > { %6982 = vmatprep.mubr.f32.mxu0 %v9998_v17  ;;  %8424 = vmatpush3.bf16.msra.mxu0 %v8421_v2  ;;  %v966_v2 = vld [vmem:[#allocation6 + $0x140] sm:$0xff]  ;;  %v8477_v57 = vpack.c.bf16 %v1264_v53, %v1263_v51  ;;  %v926_v53 = vld [vmem:[#allocation2 + $0x2] sm:$0xff] }
  0x99   : > { %8426 = vmatprep.subr.bf16.mxu0 %v8425_v5  ;;  %v8461_v6 = vpack.c.bf16 %v967_v3, %v966_v2  ;;  %v10189_v2 = vld [vmem:[#allocation2 + $0xf8] sm:$0xff]  ;;  %v10191_v3 = vld [vmem:[#allocation2 + $0x108] sm:$0xff] }
  0x9a   : > { %v10207_v12 = vld [vmem:[#allocation2 + $0x140] sm:$0xff]  ;;  %v10209_v18 = vld [vmem:[#allocation2 + $0x150] sm:$0xff] }
  0x9b   : > { %6983 = vmatmul.mubr.f32.gmra.mrb[6].mxu0 %v10002_v19 }
  0x9c   : > { %6985 = vmatprep.mubr.f32.mxu0 %v10005_v20  ;;  %8428 = vmatpush3.bf16.msra.mxu0 %v8425_v5  ;;  %v10149_v5 = vld [vmem:[#allocation2 + $0x60] sm:$0xff] }
  0x9d   : > { %8430 = vmatprep.subr.bf16.mxu0 %v8429_v8  ;;  %v10227_v51 = vld [vmem:[#allocation2 + $0x170] sm:$0xff] }
  0x9f   : > { %6986 = vmatmul.mubr.f32.gmra.mrb[8].mxu0 %v10008_v21 }
  0xa0   : > { %6988 = vmatprep.mubr.f32.mxu0 %v10014_v24  ;;  %8432 = vmatpush3.bf16.msra.mxu0 %v8429_v8  ;;  %v969_v8 = vld [vmem:[#allocation6 + $0x158] sm:$0xff] }
  0xa1   : > { %8434 = vmatprep.subr.bf16.mxu0 %v8433_v11 }
  0xa3   : > { %6989 = vmatmul.mubr.f32.gmra.mrb[10].mxu0 %v10018_v25 }
  0xa4   : > { %6991 = vmatprep.mubr.f32.mxu0 %v10021_v26  ;;  %8436 = vmatpush3.bf16.msra.mxu0 %v8433_v11  ;;  %v8465_v11 = vpack.c.bf16 %v969_v8, %v968_v7  ;;  %v10197_v7 = vld [vmem:[#allocation2 + $0x120] sm:$0xff]  ;;  %v10201_v8 = vld [vmem:[#allocation2 + $0x128] sm:$0xff] }
  0xa5   : > { %8438 = vmatprep.subr.bf16.mxu0 %v8437_v22 }
  0xa7   : > { %6992 = vmatmul.mubr.f32.gmra.mrb[12].mxu0 %v10024_v27 }
  0xa8   : > { %6994 = vmatprep.mubr.f32.mxu0 %v10030_v28  ;;  %8440 = vmatpush3.bf16.msra.mxu0 %v8437_v22  ;;  %v10159_v22 = vld [vmem:[#allocation2 + $0x80] sm:$0xff] }
  0xa9   : > { %8442 = vmatprep.subr.bf16.mxu0 %v8441_v33 }
  0xab   : > { %6995 = vmatmul.mubr.f32.gmra.mrb[14].mxu0 %v10034_v30 }
  0xac   : > { %6997 = vmatprep.mubr.f32.mxu0 %v10037_v31  ;;  %8444 = vmatpush3.bf16.msra.mxu0 %v8441_v33  ;;  %v972_v33 = vld [vmem:[#allocation6 + $0x170] sm:$0xff] }
  0xad   : > { %8446 = vmatprep.subr.bf16.mxu0 %v8445_v44 }
  0xaf   : > { %6998 = vmatmul.mubr.f32.gmra.mrb[16].mxu0 %v10040_v32 }
  0xb0   : > { %7000 = vmatprep.mubr.f32.mxu0 %v10046_v35 }
  0xb3   : > { %7001 = vmatmul.mubr.f32.gmra.mrb[18].mxu0 %v10050_v36 }
  0xb4   : > { %7003 = vmatprep.mubr.f32.mxu0 %v10053_v37 }
  0xb7   : > { %7004 = vmatmul.mubr.f32.gmra.mrb[20].mxu0 %v10056_v38 }
  0xb8   : > { %7006 = vmatprep.mubr.f32.mxu0 %v10062_v39  ;;  %v1270_v39 = vld [vmem:[#allocation6 + $0x1b8] sm:$0xff] }
  0xbb   : > { %7007 = vmatmul.mubr.f32.gmra.mrb[22].mxu0 %v10066_v41  ;;  %v1269_v41 = vld [vmem:[#allocation6 + $0x1b0] sm:$0xff] }
  0xbc   : > { %7009 = vmatprep.mubr.f32.mxu0 %v10069_v42 }
  0xbf   : > { %7010 = vmatmul.mubr.f32.gmra.mrb[24].mxu0 %v10072_v43  ;;  %v10235_v43 = vld [vmem:[#allocation2 + $0x32] sm:$0xff] }
  0xc0   : > { %7012 = vmatprep.mubr.f32.mxu0 %v10078_v46  ;;  %v10233_v46 = vld [vmem:[#allocation2 + $0x22] sm:$0xff]  ;;  %11163 = vst [vmem:[#allocation27_spill] sm:$0xff] %v10235_v43 }
  0xc1   : > { %11162 = vst [vmem:[#allocation26_spill] sm:$0xff] %v10233_v46 }
  0xc3   : > { %7013 = vmatmul.mubr.f32.gmra.mrb[26].mxu0 %v10082_v47  ;;  %v1268_v47 = vld [vmem:[#allocation6 + $0x1a8] sm:$0xff] }
  0xc4   : > { %7015 = vmatprep.mubr.f32.mxu0 %v10085_v48  ;;  %v1267_v48 = vld [vmem:[#allocation6 + $0x1a0] sm:$0xff] }
  0xc5   : > { %v8485_v42 = vpack.c.bf16 %v1268_v47, %v1267_v48  ;;  %v10245_v47 = vld [vmem:[#allocation2 + $0x52] sm:$0xff]  ;;  %v10247_v48 = vld [vmem:[#allocation2 + $0x62] sm:$0xff] }
  0xc6   : > { %11166 = vst [vmem:[#allocation30_spill] sm:$0xff] %v10245_v47  ;;  %11167 = vst [vmem:[#allocation31_spill] sm:$0xff] %v10247_v48 }
  0xc7   : > { %7016 = vmatmul.mubr.f32.gmra.mrb[28].mxu0 %v10088_v49 }
  0xc8   : > { %7018 = vmatprep.mubr.f32.mxu0 %v10094_v50  ;;  %v927_v50 = vld [vmem:[#allocation2 + $0xa] sm:$0xff] }
  0xcb   : > { %7019 = vmatmul.mubr.f32.gmra.mrb[30].mxu0 %v10098_v52  ;;  %v1266_v52 = vld [vmem:[#allocation6 + $0x198] sm:$0xff] }
  0xcc   : > { %7053 = vmatprep.mubr.f32.mxu0 %v380_v45  ;;  %v8473_v45 = vpack.c.bf16 %v973_v34, %v972_v33  ;;  %v10216_v33 = vld [vmem:[%s9929_s12 + $0xf8] sm:$0xff]  ;;  %v10221_v34 = vld [vmem:[#allocation2 + $0x158] sm:$0xff] }
  0xcd   : > { %11160 = vst [vmem:[#allocation24_spill] sm:$0xff] %v10216_v33  ;;  %379 = vst [vmem:[#allocation2 + $0x189] sm:$0xff] %v10216_v33  ;;  %v10230_v33 = vld [vmem:[#allocation2 + $0x1a] sm:$0xff] }
  0xce   : > { %11161 = vst [vmem:[#allocation25_spill] sm:$0xff] %v10230_v33 }
  0xcf   : > { %7054 = vmatmul.mubr.f32.vlgmr.msra.gmra.mrb[0].mxu0 %v9708_v0  ;;  %v8457_v0 = vpack.c.bf16 %v965_v62, %v964_v61  ;;  %v10179_v61 = vld [vmem:[#allocation2 + $0xd8] sm:$0xff]  ;;  %v10183_v62 = vld [vmem:[#allocation2 + $0xe0] sm:$0xff] }
  0xd0   : > { %8448 = vmatpush3.bf16.msra.mxu0 %v8445_v44  ;;  %7056 = vmatprep.mubr.f32.mxu0 %v10131_v54  ;;  %v10167_v44 = vld [vmem:[#allocation2 + $0xa8] sm:$0xff] }
  0xd1   : > { %8450 = vmatprep.subr.bf16.mxu0 %v8449_v55 }
  0xd3   : > { %7057 = vmatmul.mubr.f32.gmra.mrb[2].mxu0 %v10135_v58 }
  0xd4   : > { %7059 = vmatprep.mubr.f32.mxu0 %v10137_v59  ;;  %8452 = vmatpush3.bf16.msra.mxu0 %v8449_v55  ;;  %v10171_v55 = vld [vmem:[#allocation2 + $0xb0] sm:$0xff] }
  0xd5   : > { %8454 = vmatprep.subr.bf16.mxu0 %v8453_v60 }
  0xd7   : > { %7060 = vmatmul.mubr.f32.gmra.mrb[4].mxu0 %v10141_v63 }
  0xd8   : > { %7062 = vmatprep.mubr.f32.mxu0 %v10143_v1  ;;  %8456 = vmatpush3.bf16.msra.mxu0 %v8453_v60  ;;  %v10177_v60 = vld [vmem:[#allocation2 + $0xc8] sm:$0xff] }
  0xd9   : > { %8458 = vmatprep.subr.bf16.mxu0 %v8457_v0 }
  0xdb   : > { %7063 = vmatmul.mubr.f32.gmra.mrb[6].mxu0 %v10147_v4 }
  0xdc   : > { %7065 = vmatprep.mubr.f32.mxu0 %v10149_v5  ;;  %8460 = vmatpush3.bf16.msra.mxu0 %v8457_v0  ;;  %v10185_v0 = vld [vmem:[#allocation2 + $0xf0] sm:$0xff] }
  0xdd   : > { %8462 = vmatprep.subr.bf16.mxu0 %v8461_v6 }
  0xdf   : > { %7066 = vmatmul.mubr.f32.gmra.mrb[8].mxu0 %v10153_v9 }
  0xe0   : > { %7068 = vmatprep.mubr.f32.mxu0 %v10155_v10  ;;  %8464 = vmatpush3.bf16.msra.mxu0 %v8461_v6  ;;  %v10195_v6 = vld [vmem:[#allocation2 + $0x110] sm:$0xff] }
  0xe1   : > { %8466 = vmatprep.subr.bf16.mxu0 %v8465_v11 }
  0xe3   : > { %7069 = vmatmul.mubr.f32.gmra.mrb[10].mxu0 %v10159_v22 }
  0xe4   : > { %7071 = vmatprep.mubr.f32.mxu0 %v10161_v23  ;;  %8468 = vmatpush3.bf16.msra.mxu0 %v8465_v11  ;;  %v10203_v11 = vld [vmem:[#allocation2 + $0x138] sm:$0xff] }
  0xe5   : > { %8470 = vmatprep.subr.bf16.mxu0 %v8469_v29 }
  0xe7   : > { %7072 = vmatmul.mubr.f32.gmra.mrb[12].mxu0 %v10165_v40 }
  0xe8   : > { %7074 = vmatprep.mubr.f32.mxu0 %v10167_v44  ;;  %8472 = vmatpush3.bf16.msra.mxu0 %v8469_v29  ;;  %v10212_v29 = vld [vmem:[%s9929_s12 + $0xf0] sm:$0xff] }
  0xe9   : > { %8474 = vmatprep.subr.bf16.mxu0 %v8473_v45  ;;  %11159 = vst [vmem:[#allocation23_spill] sm:$0xff] %v10212_v29  ;;  %378 = vst [vmem:[#allocation2 + $0x181] sm:$0xff] %v10212_v29  ;;  %v1265_v29 = vld [vmem:[#allocation6 + $0x190] sm:$0xff] }
  0xea   : > { %v8481_v49 = vpack.c.bf16 %v1266_v52, %v1265_v29  ;;  %v10241_v52 = vld [vmem:[#allocation2 + $0x4a] sm:$0xff]  ;;  %v1272_v29 = vld [vmem:[#allocation6 + $0x1c8] sm:$0xff] }
  0xeb   : > { %7075 = vmatmul.mubr.f32.gmra.mrb[14].mxu0 %v10171_v55  ;;  %11165 = vst [vmem:[#allocation29_spill] sm:$0xff] %v10241_v52 }
  0xec   : > { %7077 = vmatprep.mubr.f32.mxu0 %v10173_v56  ;;  %8476 = vmatpush3.bf16.msra.mxu0 %v8473_v45  ;;  %v10223_v45 = vld [vmem:[#allocation2 + $0x168] sm:$0xff] }
  0xed   : > { %8478 = vmatprep.subr.bf16.mxu0 %v8477_v57 }
  0xef   : > { %7078 = vmatmul.mubr.f32.gmra.mrb[16].mxu0 %v10177_v60 }
  0xf0   : > { %7080 = vmatprep.mubr.f32.mxu0 %v10179_v61 }
  0xf3   : > { %7081 = vmatmul.mubr.f32.gmra.mrb[18].mxu0 %v10183_v62 }
  0xf4   : > { %7083 = vmatprep.mubr.f32.mxu0 %v10185_v0 }
  0xf7   : > { %7084 = vmatmul.mubr.f32.gmra.mrb[20].mxu0 %v10189_v2 }
  0xf8   : > { %7086 = vmatprep.mubr.f32.mxu0 %v10191_v3 }
  0xfb   : > { %7087 = vmatmul.mubr.f32.gmra.mrb[22].mxu0 %v10195_v6 }
  0xfc   : > { %7089 = vmatprep.mubr.f32.mxu0 %v10197_v7 }
  0xff   : > { %7090 = vmatmul.mubr.f32.gmra.mrb[24].mxu0 %v10201_v8 }
 0x100   : > { %7092 = vmatprep.mubr.f32.mxu0 %v10203_v11 }
 0x103   : > { %7093 = vmatmul.mubr.f32.gmra.mrb[26].mxu0 %v10207_v12 }
 0x104   : > { %7095 = vmatprep.mubr.f32.mxu0 %v10209_v18 }
 0x107   : > { %7096 = vmatmul.mubr.f32.gmra.mrb[28].mxu0 %v10221_v34 }
 0x108   : > { %7098 = vmatprep.mubr.f32.mxu0 %v10223_v45 }
 0x10b   : > { %7099 = vmatmul.mubr.f32.gmra.mrb[30].mxu0 %v10227_v51 }
 0x10c   : > { %7133 = vmatprep.mubr.f32.mxu0 %v926_v53  ;;  %v10239_v53 = vld [vmem:[#allocation2 + $0x3a] sm:$0xff] }
 0x10d   : > { %11164 = vst [vmem:[#allocation28_spill] sm:$0xff] %v10239_v53 }
 0x10f   : > { %7134 = vmatmul.mubr.f32.vlgmr.msra.gmra.mrb[0].mxu0 %v927_v50  ;;  %v8489_v50 = vpack.c.bf16 %v1270_v39, %v1269_v41  ;;  %v10251_v39 = vld [vmem:[#allocation2 + $0x6a] sm:$0xff]  ;;  %v10253_v41 = vld [vmem:[#allocation2 + $0x7a] sm:$0xff] }
 0x110   : > { %8480 = vmatpush3.bf16.msra.mxu0 %v8477_v57  ;;  %7136 = vmatprep.mubr.f32.mxu0 %v10230_v33  ;;  %v1271_v57 = vld [vmem:[#allocation6 + $0x1c0] sm:$0xff]  ;;  %v1274_v33 = vld [vmem:[#allocation6 + $0x1d8] sm:$0xff]  ;;  %11168 = vst [vmem:[#allocation32_spill] sm:$0xff] %v10251_v39  ;;  %11169 = vst [vmem:[#allocation33_spill] sm:$0xff] %v10253_v41 }
 0x111   : > { %8482 = vmatprep.subr.bf16.mxu0 %v8481_v49 }
 0x113   : > { %7137 = vmatmul.mubr.f32.gmra.mrb[2].mxu0 %v10233_v46  ;;  %v1273_v46 = vld [vmem:[#allocation6 + $0x1d0] sm:$0xff] }
 0x114   : > { %7139 = vmatprep.mubr.f32.mxu0 %v10235_v43  ;;  %8484 = vmatpush3.bf16.msra.mxu0 %v8481_v49  ;;  %v8493_v43 = vpack.c.bf16 %v1272_v29, %v1271_v57  ;;  %v8497_v49 = vpack.c.bf16 %v1274_v33, %v1273_v46  ;;  %v10259_v57 = vld [vmem:[#allocation2 + $0x92] sm:$0xff]  ;;  %v10263_v46 = vld [vmem:[#allocation2 + $0x9a] sm:$0xff]  ;;  %v10265_v33 = vld [vmem:[#allocation2 + $0xaa] sm:$0xff] }
 0x115   : > { %8486 = vmatprep.subr.bf16.mxu0 %v8485_v42 }
 0x117   : > { %7140 = vmatmul.mubr.f32.gmra.mrb[4].mxu0 %v10239_v53  ;;  %v1276_v53 = vld [vmem:[#allocation6 + $0x1e8] sm:$0xff] }
 0x118   : > { %7142 = vmatprep.mubr.f32.mxu0 %v10241_v52  ;;  %8488 = vmatpush3.bf16.msra.mxu0 %v8485_v42  ;;  %v1275_v52 = vld [vmem:[#allocation6 + $0x1e0] sm:$0xff]  ;;  %v10257_v42 = vld [vmem:[#allocation2 + $0x82] sm:$0xff] }
 0x119   : > { %8490 = vmatprep.subr.bf16.mxu0 %v8489_v50  ;;  %v8501_v29 = vpack.c.bf16 %v1276_v53, %v1275_v52  ;;  %v10271_v53 = vld [vmem:[#allocation2 + $0xc2] sm:$0xff] }
 0x11a   : > { %11171 = vst [vmem:[#allocation35_spill] sm:$0xff] %v10271_v53 }
 0x11b   : > { %7143 = vmatmul.mubr.f32.gmra.mrb[6].mxu0 %v10245_v47  ;;  %v1278_v47 = vld [vmem:[#allocation6 + $0x1f8] sm:$0xff] }
 0x11c   : > { %7145 = vmatprep.mubr.f32.mxu0 %v10247_v48  ;;  %8492 = vmatpush3.bf16.msra.mxu0 %v8489_v50  ;;  %v1277_v48 = vld [vmem:[#allocation6 + $0x1f0] sm:$0xff] }
 0x11d   : > { %8494 = vmatprep.subr.bf16.mxu0 %v8493_v43  ;;  %v8505_v50 = vpack.c.bf16 %v1278_v47, %v1277_v48  ;;  %v10277_v47 = vld [vmem:[#allocation2 + $0xda] sm:$0xff]  ;;  %v10281_v48 = vld [vmem:[#allocation2 + $0xe2] sm:$0xff] }
 0x11e   : > { %11173 = vst [vmem:[#allocation37_spill] sm:$0xff] %v10277_v47  ;;  %11174 = vst [vmem:[#allocation38_spill] sm:$0xff] %v10281_v48 }
 0x11f   : > { %7146 = vmatmul.mubr.f32.gmra.mrb[8].mxu0 %v10251_v39  ;;  %v1569_v39 = vld [vmem:[#allocation6 + $0x208] sm:$0xff] }
 0x120   : > { %7148 = vmatprep.mubr.f32.mxu0 %v10253_v41  ;;  %8496 = vmatpush3.bf16.msra.mxu0 %v8493_v43  ;;  %v1568_v41 = vld [vmem:[#allocation6 + $0x200] sm:$0xff] }
 0x121   : > { %8498 = vmatprep.subr.bf16.mxu0 %v8497_v49  ;;  %v10269_v43 = vld [vmem:[#allocation2 + $0xb2] sm:$0xff]  ;;  %v8509_v52 = vpack.c.bf16 %v1569_v39, %v1568_v41  ;;  %v10287_v39 = vld [vmem:[#allocation2 + $0xfa] sm:$0xff]  ;;  %v10289_v41 = vld [vmem:[#allocation2 + $0x10a] sm:$0xff] }
 0x122   : > { %11170 = vst [vmem:[#allocation34_spill] sm:$0xff] %v10269_v43  ;;  %11176 = vst [vmem:[#allocation40_spill] sm:$0xff] %v10287_v39 }
 0x123   : > { %7149 = vmatmul.mubr.f32.gmra.mrb[10].mxu0 %v10257_v42  ;;  %11177 = vst [vmem:[#allocation41_spill] sm:$0xff] %v10289_v41 }
 0x124   : > { %7151 = vmatprep.mubr.f32.mxu0 %v10259_v57  ;;  %8500 = vmatpush3.bf16.msra.mxu0 %v8497_v49  ;;  %v10275_v49 = vld [vmem:[#allocation2 + $0xca] sm:$0xff] }
 0x125   : > { %8502 = vmatprep.subr.bf16.mxu0 %v8501_v29  ;;  %11172 = vst [vmem:[#allocation36_spill] sm:$0xff] %v10275_v49 }
 0x127   : > { %7152 = vmatmul.mubr.f32.gmra.mrb[12].mxu0 %v10263_v46 }
 0x128   : > { %7154 = vmatprep.mubr.f32.mxu0 %v10265_v33  ;;  %8504 = vmatpush3.bf16.msra.mxu0 %v8501_v29  ;;  %v10283_v29 = vld [vmem:[#allocation2 + $0xf2] sm:$0xff] }
 0x129   : > { %8506 = vmatprep.subr.bf16.mxu0 %v8505_v50  ;;  %11175 = vst [vmem:[#allocation39_spill] sm:$0xff] %v10283_v29 }
 0x12b   : > { %7155 = vmatmul.mubr.f32.gmra.mrb[14].mxu0 %v10269_v43  ;;  %v1573_v43 = vld [vmem:[#allocation6 + $0x228] sm:$0xff] }
 0x12c   : > { %7157 = vmatprep.mubr.f32.mxu0 %v10271_v53  ;;  %8508 = vmatpush3.bf16.msra.mxu0 %v8505_v50  ;;  %v10293_v50 = vld [vmem:[#allocation2 + $0x112] sm:$0xff] }
 0x12d   : > { %8510 = vmatprep.subr.bf16.mxu0 %v8509_v52  ;;  %11178 = vst [vmem:[#allocation42_spill] sm:$0xff] %v10293_v50 }
 0x12f   : > { %7158 = vmatmul.mubr.f32.gmra.mrb[16].mxu0 %v10275_v49  ;;  %v10295_v49 = vld [vmem:[#allocation2 + $0x122] sm:$0xff] }
 0x130   : > { %7160 = vmatprep.mubr.f32.mxu0 %v10277_v47  ;;  %11179 = vst [vmem:[#allocation43_spill] sm:$0xff] %v10295_v49  ;;  %v10299_v47 = vld [vmem:[#allocation2 + $0x12a] sm:$0xff] }
 0x131   : > { %11180 = vst [vmem:[#allocation44_spill] sm:$0xff] %v10299_v47 }
 0x133   : > { %7161 = vmatmul.mubr.f32.gmra.mrb[18].mxu0 %v10281_v48  ;;  %v10301_v48 = vld [vmem:[#allocation2 + $0x13a] sm:$0xff] }
 0x134   : > { %7163 = vmatprep.mubr.f32.mxu0 %v10283_v29  ;;  %11181 = vst [vmem:[#allocation45_spill] sm:$0xff] %v10301_v48  ;;  %v10305_v29 = vld [vmem:[#allocation2 + $0x142] sm:$0xff] }
 0x135   : > { %11182 = vst [vmem:[#allocation46_spill] sm:$0xff] %v10305_v29 }
 0x137   : > { %7164 = vmatmul.mubr.f32.gmra.mrb[20].mxu0 %v10287_v39  ;;  %v10307_v39 = vld [vmem:[#allocation2 + $0x152] sm:$0xff] }
 0x138   : > { %7166 = vmatprep.mubr.f32.mxu0 %v10289_v41  ;;  %11183 = vst [vmem:[#allocation47_spill] sm:$0xff] %v10307_v39  ;;  %v10311_v41 = vld [vmem:[#allocation2 + $0x15a] sm:$0xff] }
 0x139   : > { %11184 = vst [vmem:[#allocation48_spill] sm:$0xff] %v10311_v41 }
 0x13b   : > { %7167 = vmatmul.mubr.f32.gmra.mrb[22].mxu0 %v10293_v50  ;;  %v10313_v50 = vld [vmem:[#allocation2 + $0x16a] sm:$0xff] }
 0x13c   : > { %7169 = vmatprep.mubr.f32.mxu0 %v10295_v49  ;;  %11185 = vst [vmem:[#allocation49_spill] sm:$0xff] %v10313_v50  ;;  %v10317_v49 = vld [vmem:[#allocation2 + $0x172] sm:$0xff] }
 0x13d   : > { %11186 = vst [vmem:[#allocation50_spill] sm:$0xff] %v10317_v49 }
 0x13f   : > { %7170 = vmatmul.mubr.f32.gmra.mrb[24].mxu0 %v10299_v47  ;;  %v1570_v47 = vld [vmem:[#allocation6 + $0x210] sm:$0xff] }
 0x140   : > { %7172 = vmatprep.mubr.f32.mxu0 %v10301_v48  ;;  %v1571_v48 = vld [vmem:[#allocation6 + $0x218] sm:$0xff] }
 0x141   : > { %v8513_v53 = vpack.c.bf16 %v1571_v48, %v1570_v47  ;;  %v1577_v47 = vld [vmem:[#allocation6 + $0x248] sm:$0xff]  ;;  %v1580_v48 = vld [vmem:[#allocation6 + $0x260] sm:$0xff] }
 0x143   : > { %7173 = vmatmul.mubr.f32.gmra.mrb[26].mxu0 %v10305_v29  ;;  %v1572_v29 = vld [vmem:[#allocation6 + $0x220] sm:$0xff] }
 0x144   : > { %7175 = vmatprep.mubr.f32.mxu0 %v10307_v39  ;;  %v1574_v39 = vld [vmem:[#allocation6 + $0x230] sm:$0xff] }
 0x147   : > { %7176 = vmatmul.mubr.f32.gmra.mrb[28].mxu0 %v10311_v41  ;;  %v8517_v41 = vpack.c.bf16 %v1573_v43, %v1572_v29  ;;  %v1579_v43 = vld [vmem:[#allocation6 + $0x258] sm:$0xff]  ;;  %v1581_v29 = vld [vmem:[#allocation6 + $0x268] sm:$0xff] }
 0x148   : > { %7178 = vmatprep.mubr.f32.mxu0 %v10313_v50  ;;  %v1575_v50 = vld [vmem:[#allocation6 + $0x238] sm:$0xff] }
 0x14b   : > { %7179 = vmatmul.mubr.f32.gmra.mrb[30].mxu0 %v10317_v49  ;;  %v8521_v49 = vpack.c.bf16 %v1575_v50, %v1574_v39  ;;  %v8533_v39 = vpack.c.bf16 %v1581_v29, %v1580_v48  ;;  %v1583_v50 = vld [vmem:[#allocation6 + $0x278] sm:$0xff] }
 0x14c   : > { %7213 = vmatprep.mubr.f32.mxu0 %v10131_v54  ;;  %v1576_v54 = vld [vmem:[#allocation6 + $0x240] sm:$0xff]  ;;  %v1876_v48 = vld [vmem:[#allocation6 + $0x298] sm:$0xff] }
 0x14f   : > { %7214 = vmatmul.mubr.f32.vlgmr.msra.gmra.mrb[0].mxu0 %v10135_v58  ;;  %v8525_v58 = vpack.c.bf16 %v1577_v47, %v1576_v54  ;;  %v1873_v54 = vld [vmem:[#allocation6 + $0x280] sm:$0xff]  ;;  %v1874_v47 = vld [vmem:[#allocation6 + $0x288] sm:$0xff] }
 0x150   : > { %8512 = vmatpush3.bf16.msra.mxu0 %v8509_v52  ;;  %7216 = vmatprep.mubr.f32.mxu0 %v10137_v59  ;;  %v1578_v52 = vld [vmem:[#allocation6 + $0x250] sm:$0xff] }
 0x151   : > { %8514 = vmatprep.subr.bf16.mxu0 %v8513_v53 }
 0x153   : > { %7217 = vmatmul.mubr.f32.gmra.mrb[2].mxu0 %v10141_v63 }
 0x154   : > { %7219 = vmatprep.mubr.f32.mxu0 %v10143_v1  ;;  %8516 = vmatpush3.bf16.msra.mxu0 %v8513_v53  ;;  %v8529_v53 = vpack.c.bf16 %v1579_v43, %v1578_v52  ;;  %v10349_v52 = vld [vmem:[#allocation2 + $0x180] sm:$0xff]  ;;  %v10353_v43 = vld [vmem:[#allocation2 + $0x188] sm:$0xff] }
 0x155   : > { %8518 = vmatprep.subr.bf16.mxu0 %v8517_v41 }
 0x157   : > { %7220 = vmatmul.mubr.f32.gmra.mrb[4].mxu0 %v10147_v4 }
 0x158   : > { %7222 = vmatprep.mubr.f32.mxu0 %v10149_v5  ;;  %8520 = vmatpush3.bf16.msra.mxu0 %v8517_v41  ;;  %v1582_v41 = vld [vmem:[#allocation6 + $0x270] sm:$0xff] }
 0x159   : > { %8522 = vmatprep.subr.bf16.mxu0 %v8521_v49 }
 0x15b   : > { %7223 = vmatmul.mubr.f32.gmra.mrb[6].mxu0 %v10153_v9 }
 0x15c   : > { %7225 = vmatprep.mubr.f32.mxu0 %v10155_v10  ;;  %8524 = vmatpush3.bf16.msra.mxu0 %v8521_v49  ;;  %v8537_v49 = vpack.c.bf16 %v1583_v50, %v1582_v41  ;;  %v1878_v41 = vld [vmem:[#allocation6 + $0x2a8] sm:$0xff] }
 0x15d   : > { %8526 = vmatprep.subr.bf16.mxu0 %v8525_v58 }
 0x15f   : > { %7226 = vmatmul.mubr.f32.gmra.mrb[8].mxu0 %v10159_v22 }
 0x160   : > { %7228 = vmatprep.mubr.f32.mxu0 %v10161_v23  ;;  %8528 = vmatpush3.bf16.msra.mxu0 %v8525_v58  ;;  %v8541_v58 = vpack.c.bf16 %v1874_v47, %v1873_v54  ;;  %v1880_v54 = vld [vmem:[#allocation6 + $0x2b8] sm:$0xff] }
 0x161   : > { %8530 = vmatprep.subr.bf16.mxu0 %v8529_v53 }
 0x163   : > { %7229 = vmatmul.mubr.f32.gmra.mrb[10].mxu0 %v10165_v40 }
 0x164   : > { %7231 = vmatprep.mubr.f32.mxu0 %v10167_v44  ;;  %8532 = vmatpush3.bf16.msra.mxu0 %v8529_v53  ;;  %v1875_v53 = vld [vmem:[#allocation6 + $0x290] sm:$0xff] }
 0x165   : > { %8534 = vmatprep.subr.bf16.mxu0 %v8533_v39  ;;  %v8545_v29 = vpack.c.bf16 %v1876_v48, %v1875_v53  ;;  %v1882_v53 = vld [vmem:[#allocation6 + $0x2c8] sm:$0xff] }
 0x166   : > { %v1886_v48 = vld [vmem:[#allocation6 + $0x2e8] sm:$0xff] }
 0x167   : > { %7232 = vmatmul.mubr.f32.gmra.mrb[12].mxu0 %v10171_v55 }
 0x168   : > { %7234 = vmatprep.mubr.f32.mxu0 %v10173_v56  ;;  %8536 = vmatpush3.bf16.msra.mxu0 %v8533_v39  ;;  %v1877_v39 = vld [vmem:[#allocation6 + $0x2a0] sm:$0xff] }
 0x169   : > { %8538 = vmatprep.subr.bf16.mxu0 %v8537_v49  ;;  %v8549_v50 = vpack.c.bf16 %v1878_v41, %v1877_v39  ;;  %v2180_v39 = vld [vmem:[#allocation6 + $0x308] sm:$0xff]  ;;  %v11194_v41 = vld [vmem:[#allocation20_spill] sm:$0xff] }
 0x16b   : > { %7235 = vmatmul.mubr.f32.gmra.mrb[14].mxu0 %v10177_v60 }
 0x16c   : > { %7237 = vmatprep.mubr.f32.mxu0 %v10179_v61  ;;  %8540 = vmatpush3.bf16.msra.mxu0 %v8537_v49  ;;  %v1879_v49 = vld [vmem:[#allocation6 + $0x2b0] sm:$0xff] }
 0x16d   : > { %8542 = vmatprep.subr.bf16.mxu0 %v8541_v58  ;;  %v8553_v47 = vpack.c.bf16 %v1880_v54, %v1879_v49  ;;  %v2182_v49 = vld [vmem:[#allocation6 + $0x318] sm:$0xff] }
 0x16e   : > { %v11198_v54 = vld [vmem:[#allocation24_spill] sm:$0xff] }
 0x16f   : > { %7238 = vmatmul.mubr.f32.gmra.mrb[16].mxu0 %v10183_v62 }
 0x170   : > { %7240 = vmatprep.mubr.f32.mxu0 %v10185_v0 }
 0x173   : > { %7241 = vmatmul.mubr.f32.gmra.mrb[18].mxu0 %v10189_v2 }
 0x174   : > { %7243 = vmatprep.mubr.f32.mxu0 %v10191_v3 }
 0x177   : > { %7244 = vmatmul.mubr.f32.gmra.mrb[20].mxu0 %v10195_v6 }
 0x178   : > { %7246 = vmatprep.mubr.f32.mxu0 %v10197_v7 }
 0x17b   : > { %7247 = vmatmul.mubr.f32.gmra.mrb[22].mxu0 %v10201_v8 }
 0x17c   : > { %7249 = vmatprep.mubr.f32.mxu0 %v10203_v11 }
 0x17f   : > { %7250 = vmatmul.mubr.f32.gmra.mrb[24].mxu0 %v10207_v12 }
 0x180   : > { %7252 = vmatprep.mubr.f32.mxu0 %v10209_v18 }
 0x183   : > { %7253 = vmatmul.mubr.f32.gmra.mrb[26].mxu0 %v10221_v34 }
 0x184   : > { %7255 = vmatprep.mubr.f32.mxu0 %v10223_v45 }
 0x187   : > { %7256 = vmatmul.mubr.f32.gmra.mrb[28].mxu0 %v10227_v51 }
 0x188   : > { %7258 = vmatprep.mubr.f32.mxu0 %v10349_v52 }
 0x18b   : > { %7259 = vmatmul.mubr.f32.gmra.mrb[30].mxu0 %v10353_v43 }
 0x18c   : > { %7293 = vmatprep.mubr.f32.mxu0 %v9982_v13  ;;  %v1881_v13 = vld [vmem:[#allocation6 + $0x2c0] sm:$0xff] }
 0x18f   : > { %7294 = vmatmul.mubr.f32.vlgmr.msra.gmra.mrb[0].mxu0 %v9986_v14  ;;  %v8557_v14 = vpack.c.bf16 %v1882_v53, %v1881_v13  ;;  %v2183_v53 = vld [vmem:[#allocation6 + $0x320] sm:$0xff] }
 0x190   : > { %8544 = vmatpush3.bf16.msra.mxu0 %v8541_v58  ;;  %7296 = vmatprep.mubr.f32.mxu0 %v9989_v15  ;;  %v1883_v15 = vld [vmem:[#allocation6 + $0x2d0] sm:$0xff]  ;;  %v1884_v58 = vld [vmem:[#allocation6 + $0x2d8] sm:$0xff] }
 0x191   : > { %8546 = vmatprep.subr.bf16.mxu0 %v8545_v29 }
 0x193   : > { %7297 = vmatmul.mubr.f32.gmra.mrb[2].mxu0 %v9992_v16  ;;  %v8561_v16 = vpack.c.bf16 %v1884_v58, %v1883_v15  ;;  %v11200_v15 = vld [vmem:[#allocation26_spill] sm:$0xff]  ;;  %v11201_v58 = vld [vmem:[#allocation27_spill] sm:$0xff] }
 0x194   : > { %7299 = vmatprep.mubr.f32.mxu0 %v9998_v17  ;;  %8548 = vmatpush3.bf16.msra.mxu0 %v8545_v29  ;;  %v1885_v17 = vld [vmem:[#allocation6 + $0x2e0] sm:$0xff]  ;;  %v1888_v29 = vld [vmem:[#allocation6 + $0x2f8] sm:$0xff] }
 0x195   : > { %8550 = vmatprep.subr.bf16.mxu0 %v8549_v50 }
 0x197   : > { %7300 = vmatmul.mubr.f32.gmra.mrb[4].mxu0 %v10002_v19  ;;  %v8565_v19 = vpack.c.bf16 %v1886_v48, %v1885_v17  ;;  %v2185_v17 = vld [vmem:[#allocation6 + $0x330] sm:$0xff]  ;;  %v2186_v48 = vld [vmem:[#allocation6 + $0x338] sm:$0xff] }
 0x198   : > { %7302 = vmatprep.mubr.f32.mxu0 %v10005_v20  ;;  %8552 = vmatpush3.bf16.msra.mxu0 %v8549_v50  ;;  %v1887_v20 = vld [vmem:[#allocation6 + $0x2f0] sm:$0xff] }
 0x199   : > { %8554 = vmatprep.subr.bf16.mxu0 %v8553_v47  ;;  %v2181_v50 = vld [vmem:[#allocation6 + $0x310] sm:$0xff] }
 0x19a   : > { %v8577_v13 = vpack.c.bf16 %v2182_v49, %v2181_v50  ;;  %v2484_v49 = vld [vmem:[#allocation6 + $0x380] sm:$0xff] }
 0x19b   : > { %7303 = vmatmul.mubr.f32.gmra.mrb[6].mxu0 %v10008_v21  ;;  %v8569_v21 = vpack.c.bf16 %v1888_v29, %v1887_v20  ;;  %v11203_v20 = vld [vmem:[#allocation29_spill] sm:$0xff]  ;;  %v8585_v29 = vpack.c.bf16 %v2186_v48, %v2185_v17  ;;  %v11218_v17 = vld [vmem:[#allocation44_spill] sm:$0xff] }
 0x19c   : > { %7305 = vmatprep.mubr.f32.mxu0 %v10014_v24  ;;  %8556 = vmatpush3.bf16.msra.mxu0 %v8553_v47  ;;  %v2179_v24 = vld [vmem:[#allocation6 + $0x300] sm:$0xff] }
 0x19d   : > { %8558 = vmatprep.subr.bf16.mxu0 %v8557_v14  ;;  %v11199_v47 = vld [vmem:[#allocation25_spill] sm:$0xff] }
 0x19e   : > { %v11219_v48 = vld [vmem:[#allocation45_spill] sm:$0xff] }
 0x19f   : > { %7306 = vmatmul.mubr.f32.gmra.mrb[8].mxu0 %v10018_v25  ;;  %v8573_v25 = vpack.c.bf16 %v2180_v39, %v2179_v24  ;;  %v2188_v24 = vld [vmem:[#allocation6 + $0x348] sm:$0xff] }
 0x1a0   : > { %7308 = vmatprep.mubr.f32.mxu0 %v10021_v26  ;;  %8560 = vmatpush3.bf16.msra.mxu0 %v8557_v14  ;;  %v11187_v26 = vld [vmem:[#allocation13_spill] sm:$0xff]  ;;  %v2184_v14 = vld [vmem:[#allocation6 + $0x328] sm:$0xff] }
 0x1a1   : > { %8562 = vmatprep.subr.bf16.mxu0 %v8561_v16  ;;  %v11204_v39 = vld [vmem:[#allocation30_spill] sm:$0xff] }
 0x1a3   : > { %7309 = vmatmul.mubr.f32.gmra.mrb[10].mxu0 %v10024_v27  ;;  %v11188_v27 = vld [vmem:[#allocation14_spill] sm:$0xff] }
 0x1a4   : > { %7311 = vmatprep.mubr.f32.mxu0 %v10030_v28  ;;  %8564 = vmatpush3.bf16.msra.mxu0 %v8561_v16  ;;  %v11189_v28 = vld [vmem:[#allocation15_spill] sm:$0xff]  ;;  %v8581_v16 = vpack.c.bf16 %v2184_v14, %v2183_v53  ;;  %v11211_v53 = vld [vmem:[#allocation37_spill] sm:$0xff]  ;;  %v11214_v14 = vld [vmem:[#allocation40_spill] sm:$0xff] }
 0x1a5   : > { %8566 = vmatprep.subr.bf16.mxu0 %v8565_v19 }
 0x1a7   : > { %7312 = vmatmul.mubr.f32.gmra.mrb[12].mxu0 %v10034_v30  ;;  %v11190_v30 = vld [vmem:[#allocation16_spill] sm:$0xff] }
 0x1a8   : > { %7314 = vmatprep.mubr.f32.mxu0 %v10037_v31  ;;  %8568 = vmatpush3.bf16.msra.mxu0 %v8565_v19  ;;  %v11191_v31 = vld [vmem:[#allocation17_spill] sm:$0xff]  ;;  %v11202_v19 = vld [vmem:[#allocation28_spill] sm:$0xff] }
 0x1a9   : > { %8570 = vmatprep.subr.bf16.mxu0 %v8569_v21 }
 0x1ab   : > { %7315 = vmatmul.mubr.f32.gmra.mrb[14].mxu0 %v10040_v32  ;;  %v11192_v32 = vld [vmem:[#allocation18_spill] sm:$0xff] }
 0x1ac   : > { %7317 = vmatprep.mubr.f32.mxu0 %v10046_v35  ;;  %8572 = vmatpush3.bf16.msra.mxu0 %v8569_v21  ;;  %v11193_v35 = vld [vmem:[#allocation19_spill] sm:$0xff]  ;;  %v2187_v21 = vld [vmem:[#allocation6 + $0x340] sm:$0xff] }
 0x1ad   : > { %8574 = vmatprep.subr.bf16.mxu0 %v8573_v25 }
 0x1af   : > { %7318 = vmatmul.mubr.f32.gmra.mrb[16].mxu0 %v10050_v36  ;;  %v11195_v36 = vld [vmem:[#allocation21_spill] sm:$0xff] }
 0x1b0   : > { %7320 = vmatprep.mubr.f32.mxu0 %v10053_v37  ;;  %v11196_v37 = vld [vmem:[#allocation22_spill] sm:$0xff] }
 0x1b3   : > { %7321 = vmatmul.mubr.f32.gmra.mrb[18].mxu0 %v10056_v38  ;;  %v11197_v38 = vld [vmem:[#allocation23_spill] sm:$0xff] }
 0x1b4   : > { %7323 = vmatprep.mubr.f32.mxu0 %v11187_v26  ;;  %v11205_v26 = vld [vmem:[#allocation31_spill] sm:$0xff] }
 0x1b7   : > { %7324 = vmatmul.mubr.f32.gmra.mrb[20].mxu0 %v11188_v27  ;;  %v2189_v27 = vld [vmem:[#allocation6 + $0x350] sm:$0xff] }
 0x1b8   : > { %7326 = vmatprep.mubr.f32.mxu0 %v11189_v28  ;;  %v2190_v28 = vld [vmem:[#allocation6 + $0x358] sm:$0xff] }
 0x1bb   : > { %7327 = vmatmul.mubr.f32.gmra.mrb[22].mxu0 %v11190_v30  ;;  %v11206_v30 = vld [vmem:[#allocation32_spill] sm:$0xff] }
 0x1bc   : > { %7329 = vmatprep.mubr.f32.mxu0 %v11191_v31  ;;  %v11207_v31 = vld [vmem:[#allocation33_spill] sm:$0xff] }
 0x1bf   : > { %7330 = vmatmul.mubr.f32.gmra.mrb[24].mxu0 %v11192_v32  ;;  %v8593_v32 = vpack.c.bf16 %v2190_v28, %v2189_v27  ;;  %v2487_v27 = vld [vmem:[#allocation6 + $0x398] sm:$0xff] }
 0x1c0   : > { %7332 = vmatprep.mubr.f32.mxu0 %v11193_v35  ;;  %v2191_v35 = vld [vmem:[#allocation6 + $0x360] sm:$0xff] }
 0x1c3   : > { %7333 = vmatmul.mubr.f32.gmra.mrb[26].mxu0 %v11194_v41  ;;  %v2192_v41 = vld [vmem:[#allocation6 + $0x368] sm:$0xff] }
 0x1c4   : > { %7335 = vmatprep.mubr.f32.mxu0 %v11195_v36  ;;  %v8597_v36 = vpack.c.bf16 %v2192_v41, %v2191_v35  ;;  %v2490_v35 = vld [vmem:[#allocation6 + $0x3b0] sm:$0xff]  ;;  %v2491_v41 = vld [vmem:[#allocation6 + $0x3b8] sm:$0xff] }
 0x1c7   : > { %7336 = vmatmul.mubr.f32.gmra.mrb[28].mxu0 %v11196_v37  ;;  %v2193_v37 = vld [vmem:[#allocation6 + $0x370] sm:$0xff] }
 0x1c8   : > { %7338 = vmatprep.mubr.f32.mxu0 %v11197_v38  ;;  %v2194_v38 = vld [vmem:[#allocation6 + $0x378] sm:$0xff] }
 0x1c9   : > { %v8601_v50 = vpack.c.bf16 %v2194_v38, %v2193_v37  ;;  %v2493_v37 = vld [vmem:[#allocation6 + $0x3c8] sm:$0xff]  ;;  %v2495_v38 = vld [vmem:[#allocation6 + $0x3d8] sm:$0xff] }
 0x1cb   : > { %7339 = vmatmul.mubr.f32.gmra.mrb[30].mxu0 %v11198_v54  ;;  %v2485_v54 = vld [vmem:[#allocation6 + $0x388] sm:$0xff] }
 0x1cc   : > { %7373 = vmatprep.mubr.f32.mxu0 %v11199_v47  ;;  %v11208_v47 = vld [vmem:[#allocation34_spill] sm:$0xff] }
 0x1cf   : > { %7374 = vmatmul.mubr.f32.vlgmr.msra.gmra.mrb[0].mxu0 %v11200_v15  ;;  %v11215_v15 = vld [vmem:[#allocation41_spill] sm:$0xff] }
 0x1d0   : > { %8576 = vmatpush3.bf16.msra.mxu0 %v8573_v25  ;;  %7376 = vmatprep.mubr.f32.mxu0 %v11201_v58  ;;  %v8589_v25 = vpack.c.bf16 %v2188_v24, %v2187_v21  ;;  %v11216_v58 = vld [vmem:[#allocation42_spill] sm:$0xff]  ;;  %v11223_v21 = vld [vmem:[#allocation49_spill] sm:$0xff]  ;;  %v10417_v24 = vld [vmem:[#allocation2 + $0x182] sm:$0xff] }
 0x1d1   : > { %8578 = vmatprep.subr.bf16.mxu0 %v8577_v13 }
 0x1d3   : > { %7377 = vmatmul.mubr.f32.gmra.mrb[2].mxu0 %v11202_v19  ;;  %v11220_v19 = vld [vmem:[#allocation46_spill] sm:$0xff] }
 0x1d4   : > { %7379 = vmatprep.mubr.f32.mxu0 %v11203_v20  ;;  %8580 = vmatpush3.bf16.msra.mxu0 %v8577_v13  ;;  %v11209_v13 = vld [vmem:[#allocation35_spill] sm:$0xff] }
 0x1d5   : > { %8582 = vmatprep.subr.bf16.mxu0 %v8581_v16  ;;  %v11221_v20 = vld [vmem:[#allocation47_spill] sm:$0xff] }
 0x1d7   : > { %7380 = vmatmul.mubr.f32.gmra.mrb[4].mxu0 %v11204_v39  ;;  %v11224_v39 = vld [vmem:[#allocation50_spill] sm:$0xff] }
 0x1d8   : > { %7382 = vmatprep.mubr.f32.mxu0 %v11205_v26  ;;  %8584 = vmatpush3.bf16.msra.mxu0 %v8581_v16  ;;  %v11217_v16 = vld [vmem:[#allocation43_spill] sm:$0xff]  ;;  %v10421_v26 = vld [vmem:[#allocation2 + $0x18a] sm:$0xff] }
 0x1d9   : > { %8586 = vmatprep.subr.bf16.mxu0 %v8585_v29 }
 0x1db   : > { %7383 = vmatmul.mubr.f32.gmra.mrb[6].mxu0 %v11206_v30  ;;  %v2488_v30 = vld [vmem:[#allocation6 + $0x3a0] sm:$0xff] }
 0x1dc   : > { %7385 = vmatprep.mubr.f32.mxu0 %v11207_v31  ;;  %8588 = vmatpush3.bf16.msra.mxu0 %v8585_v29  ;;  %v11222_v29 = vld [vmem:[#allocation48_spill] sm:$0xff]  ;;  %v2489_v31 = vld [vmem:[#allocation6 + $0x3a8] sm:$0xff] }
 0x1dd   : > { %8590 = vmatprep.subr.bf16.mxu0 %v8589_v25 }
 0x1df   : > { %7386 = vmatmul.mubr.f32.gmra.mrb[8].mxu0 %v10257_v42  ;;  %v8605_v42 = vpack.c.bf16 %v2485_v54, %v2484_v49  ;;  %v2499_v49 = vld [vmem:[#allocation6 + $0x3f8] sm:$0xff]  ;;  %v2790_v54 = vld [vmem:[#allocation6 + $0x408] sm:$0xff] }
 0x1e0   : > { %7388 = vmatprep.mubr.f32.mxu0 %v10259_v57  ;;  %8592 = vmatpush3.bf16.msra.mxu0 %v8589_v25  ;;  %v11210_v57 = vld [vmem:[#allocation36_spill] sm:$0xff]  ;;  %v2486_v25 = vld [vmem:[#allocation6 + $0x390] sm:$0xff] }
 0x1e1   : > { %8594 = vmatprep.subr.bf16.mxu0 %v8593_v32  ;;  %v8609_v28 = vpack.c.bf16 %v2487_v27, %v2486_v25  ;;  %v2800_v27 = vld [vmem:[#allocation6 + $0x458] sm:$0xff] }
 0x1e3   : > { %7389 = vmatmul.mubr.f32.gmra.mrb[10].mxu0 %v10263_v46  ;;  %v11212_v46 = vld [vmem:[#allocation38_spill] sm:$0xff] }
 0x1e4   : > { %7391 = vmatprep.mubr.f32.mxu0 %v10265_v33  ;;  %8596 = vmatpush3.bf16.msra.mxu0 %v8593_v32  ;;  %v11213_v33 = vld [vmem:[#allocation39_spill] sm:$0xff]  ;;  %v8613_v32 = vpack.c.bf16 %v2489_v31, %v2488_v30  ;;  %v3256_v30 = vld [vmem:[#allocation8 + $0xd8] sm:$0xff] }
 0x1e5   : > { %8598 = vmatprep.subr.bf16.mxu0 %v8597_v36  ;;  %v2461_v31 = vld [vmem:[#allocation2 + $0x99] sm:$0xff] }
 0x1e7   : > { %7392 = vmatmul.mubr.f32.gmra.mrb[12].mxu0 %v11208_v47 }
 0x1e8   : > { %7394 = vmatprep.mubr.f32.mxu0 %v11209_v13  ;;  %8600 = vmatpush3.bf16.msra.mxu0 %v8597_v36  ;;  %v8617_v36 = vpack.c.bf16 %v2491_v41, %v2490_v35  ;;  %v2795_v13 = vld [vmem:[#allocation6 + $0x430] sm:$0xff] }
 0x1e9   : > { %8602 = vmatprep.subr.bf16.mxu0 %v8601_v50 }
 0x1eb   : > { %7395 = vmatmul.mubr.f32.gmra.mrb[14].mxu0 %v11210_v57  ;;  %v2796_v57 = vld [vmem:[#allocation6 + $0x438] sm:$0xff] }
 0x1ec   : > { %7397 = vmatprep.mubr.f32.mxu0 %v11211_v53  ;;  %8604 = vmatpush3.bf16.msra.mxu0 %v8601_v50  ;;  %v2497_v50 = vld [vmem:[#allocation6 + $0x3e8] sm:$0xff]  ;;  %v3251_v53 = vld [vmem:[#allocation8 + $0xb0] sm:$0xff] }
 0x1ed   : > { %8606 = vmatprep.subr.bf16.mxu0 %v8605_v42 }
 0x1ef   : > { %7398 = vmatmul.mubr.f32.gmra.mrb[16].mxu0 %v11212_v46  ;;  %v3252_v46 = vld [vmem:[#allocation8 + $0xb8] sm:$0xff] }
 0x1f0   : > { %7400 = vmatprep.mubr.f32.mxu0 %v11213_v33  ;;  %v2457_v33 = vld [vmem:[#allocation2 + $0x69] sm:$0xff] }
 0x1f3   : > { %7401 = vmatmul.mubr.f32.gmra.mrb[18].mxu0 %v11214_v14  ;;  %v2458_v14 = vld [vmem:[#allocation2 + $0x79] sm:$0xff] }
 0x1f4   : > { %7403 = vmatprep.mubr.f32.mxu0 %v11215_v15  ;;  %v8649_v15 = vpack.c.bf16 %v2796_v57, %v2795_v13  ;;  %v2766_v13 = vld [vmem:[#allocation2 + $0x9a] sm:$0xff]  ;;  %v2768_v57 = vld [vmem:[#allocation2 + $0xb2] sm:$0xff] }
 0x1f7   : > { %7404 = vmatmul.mubr.f32.gmra.mrb[20].mxu0 %v11216_v58  ;;  %v2797_v58 = vld [vmem:[#allocation6 + $0x440] sm:$0xff] }
 0x1f8   : > { %7406 = vmatprep.mubr.f32.mxu0 %v11217_v16  ;;  %v8681_v16 = vpack.c.bf16 %v3252_v46, %v3251_v53  ;;  %v2769_v53 = vld [vmem:[#allocation2 + $0xc2] sm:$0xff]  ;;  %v2770_v46 = vld [vmem:[#allocation2 + $0xca] sm:$0xff] }
 0x1fb   : > { %7407 = vmatmul.mubr.f32.gmra.mrb[22].mxu0 %v11218_v17  ;;  %v2798_v17 = vld [vmem:[#allocation6 + $0x448] sm:$0xff] }
 0x1fc   : > { %7409 = vmatprep.mubr.f32.mxu0 %v11219_v48  ;;  %v3253_v48 = vld [vmem:[#allocation8 + $0xc0] sm:$0xff] }
 0x1ff   : > { %7410 = vmatmul.mubr.f32.gmra.mrb[24].mxu0 %v11220_v19  ;;  %v3254_v19 = vld [vmem:[#allocation8 + $0xc8] sm:$0xff] }
 0x200   : > { %7412 = vmatprep.mubr.f32.mxu0 %v11221_v20  ;;  %v2459_v20 = vld [vmem:[#allocation2 + $0x81] sm:$0xff]  ;;  %v8685_v25 = vpack.c.bf16 %v3254_v19, %v3253_v48  ;;  %v2778_v19 = vld [vmem:[#allocation2 + $0x12a] sm:$0xff] }
 0x201   : > { %v2777_v48 = vld [vmem:[#allocation2 + $0x122] sm:$0xff] }
 0x203   : > { %7413 = vmatmul.mubr.f32.gmra.mrb[26].mxu0 %v11222_v29  ;;  %v2460_v29 = vld [vmem:[#allocation2 + $0x91] sm:$0xff] }
 0x204   : > { %7415 = vmatprep.mubr.f32.mxu0 %v11223_v21  ;;  %v8653_v21 = vpack.c.bf16 %v2798_v17, %v2797_v58  ;;  %v2774_v58 = vld [vmem:[#allocation2 + $0xfa] sm:$0xff]  ;;  %v2776_v17 = vld [vmem:[#allocation2 + $0x112] sm:$0xff] }
 0x207   : > { %7416 = vmatmul.mubr.f32.gmra.mrb[28].mxu0 %v11224_v39  ;;  %v2799_v39 = vld [vmem:[#allocation6 + $0x450] sm:$0xff] }
 0x208   : > { %7418 = vmatprep.mubr.f32.mxu0 %v10417_v24  ;;  %v8657_v35 = vpack.c.bf16 %v2800_v27, %v2799_v39  ;;  %v2782_v39 = vld [vmem:[#allocation2 + $0x15a] sm:$0xff]  ;;  %v2784_v27 = vld [vmem:[#allocation2 + $0x172] sm:$0xff] }
 0x20b   : > { %7419 = vmatmul.mubr.f32.gmra.mrb[30].mxu0 %v10421_v26 }
 0x20c   : > { %7453 = vmatprep.mubr.f32.mxu0 %v10137_v59  ;;  %v2492_v59 = vld [vmem:[#allocation6 + $0x3c0] sm:$0xff] }
 0x20f   : > { %7454 = vmatmul.mubr.f32.vlgmr.msra.gmra.mrb[0].mxu0 %v10141_v63  ;;  %v8621_v63 = vpack.c.bf16 %v2493_v37, %v2492_v59  ;;  %v2802_v59 = vld [vmem:[#allocation6 + $0x468] sm:$0xff] }
 0x210   : > { %8608 = vmatpush3.bf16.msra.mxu0 %v8605_v42  ;;  %7456 = vmatprep.mubr.f32.mxu0 %v10143_v1  ;;  %v2494_v1 = vld [vmem:[#allocation6 + $0x3d0] sm:$0xff]  ;;  %v2463_v37 = vld [vmem:[#allocation2 + $0xb1] sm:$0xff] }
 0x211   : > { %8610 = vmatprep.subr.bf16.mxu0 %v8609_v28 }
 0x213   : > { %7457 = vmatmul.mubr.f32.gmra.mrb[2].mxu0 %v10147_v4  ;;  %v8625_v4 = vpack.c.bf16 %v2495_v38, %v2494_v1  ;;  %v2803_v38 = vld [vmem:[#allocation6 + $0x470] sm:$0xff] }
 0x214   : > { %7459 = vmatprep.mubr.f32.mxu0 %v10149_v5  ;;  %8612 = vmatpush3.bf16.msra.mxu0 %v8609_v28  ;;  %v2496_v5 = vld [vmem:[#allocation6 + $0x3e0] sm:$0xff]  ;;  %v3255_v28 = vld [vmem:[#allocation8 + $0xd0] sm:$0xff] }
 0x215   : > { %8614 = vmatprep.subr.bf16.mxu0 %v8613_v32  ;;  %v8689_v41 = vpack.c.bf16 %v3256_v30, %v3255_v28  ;;  %v2787_v28 = vld [vmem:[#allocation2 + $0x19a] sm:$0xff]  ;;  %v2788_v30 = vld [vmem:[#allocation2 + $0x1a2] sm:$0xff] }
 0x217   : > { %7460 = vmatmul.mubr.f32.gmra.mrb[4].mxu0 %v10153_v9  ;;  %v8629_v9 = vpack.c.bf16 %v2497_v50, %v2496_v5  ;;  %v2465_v5 = vld [vmem:[#allocation2 + $0xc9] sm:$0xff]  ;;  %v2466_v50 = vld [vmem:[#allocation2 + $0xd9] sm:$0xff] }
 0x218   : > { %7462 = vmatprep.mubr.f32.mxu0 %v10155_v10  ;;  %8616 = vmatpush3.bf16.msra.mxu0 %v8613_v32  ;;  %v2498_v10 = vld [vmem:[#allocation6 + $0x3f0] sm:$0xff]  ;;  %v2462_v32 = vld [vmem:[#allocation2 + $0xa9] sm:$0xff] }
 0x219   : > { %8618 = vmatprep.subr.bf16.mxu0 %v8617_v36 }
 0x21b   : > { %7463 = vmatmul.mubr.f32.gmra.mrb[6].mxu0 %v10159_v22  ;;  %v8633_v22 = vpack.c.bf16 %v2499_v49, %v2498_v10  ;;  %v2467_v10 = vld [vmem:[#allocation2 + $0xe1] sm:$0xff]  ;;  %v2468_v49 = vld [vmem:[#allocation2 + $0xf1] sm:$0xff] }
 0x21c   : > { %7465 = vmatprep.mubr.f32.mxu0 %v10161_v23  ;;  %8620 = vmatpush3.bf16.msra.mxu0 %v8617_v36  ;;  %v2789_v23 = vld [vmem:[#allocation6 + $0x400] sm:$0xff] }
 0x21d   : > { %8622 = vmatprep.subr.bf16.mxu0 %v8621_v63  ;;  %v2801_v36 = vld [vmem:[#allocation6 + $0x460] sm:$0xff] }
 0x21e   : > { %v8661_v1 = vpack.c.bf16 %v2802_v59, %v2801_v36  ;;  %v3260_v36 = vld [vmem:[#allocation8 + $0xf8] sm:$0xff] }
 0x21f   : > { %7466 = vmatmul.mubr.f32.gmra.mrb[8].mxu0 %v10165_v40  ;;  %v8637_v40 = vpack.c.bf16 %v2790_v54, %v2789_v23  ;;  %v2470_v23 = vld [vmem:[#allocation2 + $0x109] sm:$0xff]  ;;  %v2471_v54 = vld [vmem:[#allocation2 + $0x111] sm:$0xff] }
 0x220   : > { %7468 = vmatprep.mubr.f32.mxu0 %v10167_v44  ;;  %8624 = vmatpush3.bf16.msra.mxu0 %v8621_v63  ;;  %v2177_v44 = vld [vmem:[#allocation2 + $0x198] sm:$0xff]  ;;  %v2464_v63 = vld [vmem:[#allocation2 + $0xc1] sm:$0xff] }
 0x221   : > { %8626 = vmatprep.subr.bf16.mxu0 %v8625_v4 }
 0x223   : > { %7469 = vmatmul.mubr.f32.gmra.mrb[10].mxu0 %v10171_v55  ;;  %v2452_v55 = vld [vmem:[#allocation2 + $0x31] sm:$0xff] }
 0x224   : > { %7471 = vmatprep.mubr.f32.mxu0 %v10173_v56  ;;  %8628 = vmatpush3.bf16.msra.mxu0 %v8625_v4  ;;  %v2791_v56 = vld [vmem:[#allocation6 + $0x410] sm:$0xff]  ;;  %v2804_v4 = vld [vmem:[#allocation6 + $0x478] sm:$0xff] }
 0x225   : > { %8630 = vmatprep.subr.bf16.mxu0 %v8629_v9 }
 0x227   : > { %7472 = vmatmul.mubr.f32.gmra.mrb[12].mxu0 %v10177_v60  ;;  %v2792_v60 = vld [vmem:[#allocation6 + $0x418] sm:$0xff] }
 0x228   : > { %7474 = vmatprep.mubr.f32.mxu0 %v10179_v61  ;;  %8632 = vmatpush3.bf16.msra.mxu0 %v8629_v9  ;;  %v10454_v61 = vld [vmem:[#allocation2 + $0x8] sm:$0xff]  ;;  %v8665_v9 = vpack.c.bf16 %v2804_v4, %v2803_v38  ;;  %v3199_v38 = vld [vmem:[#allocation8 + $0x10] sm:$0xff] }
 0x229   : > { %8634 = vmatprep.subr.bf16.mxu0 %v8633_v22  ;;  %v3200_v4 = vld [vmem:[#allocation8 + $0x18] sm:$0xff] }
 0x22b   : > { %7475 = vmatmul.mubr.f32.gmra.mrb[14].mxu0 %v10183_v62  ;;  %v3245_v62 = vld [vmem:[#allocation8 + $0x80] sm:$0xff] }
 0x22c   : > { %7477 = vmatprep.mubr.f32.mxu0 %v10185_v0  ;;  %8636 = vmatpush3.bf16.msra.mxu0 %v8633_v22  ;;  %v3246_v0 = vld [vmem:[#allocation8 + $0x88] sm:$0xff] }
 0x22d   : > { %8638 = vmatprep.subr.bf16.mxu0 %v8637_v40  ;;  %v2469_v22 = vld [vmem:[#allocation2 + $0xf9] sm:$0xff] }
 0x22f   : > { %7478 = vmatmul.mubr.f32.gmra.mrb[16].mxu0 %v10189_v2  ;;  %v3247_v2 = vld [vmem:[#allocation8 + $0x90] sm:$0xff] }
 0x230   : > { %7480 = vmatprep.mubr.f32.mxu0 %v10191_v3  ;;  %v2453_v3 = vld [vmem:[#allocation2 + $0x39] sm:$0xff] }
 0x233   : > { %7481 = vmatmul.mubr.f32.gmra.mrb[18].mxu0 %v10195_v6  ;;  %v8669_v6 = vpack.c.bf16 %v3246_v0, %v3245_v62  ;;  %v2477_v62 = vld [vmem:[#allocation2 + $0x159] sm:$0xff]  ;;  %v2478_v0 = vld [vmem:[#allocation2 + $0x169] sm:$0xff] }
 0x234   : > { %7483 = vmatprep.mubr.f32.mxu0 %v10197_v7  ;;  %v3248_v7 = vld [vmem:[#allocation8 + $0x98] sm:$0xff] }
 0x235   : > { %8670 = vmatprep.subr.bf16.mxu1 %v8669_v6 }
 0x236   : > { %8672 = vmatpush3.bf16.msra.mxu1 %v8669_v6  ;;  %v2482_v6 = vld [vmem:[#allocation2 + $0x199] sm:$0xff] }
 0x237   : > { %7484 = vmatmul.mubr.f32.gmra.mrb[20].mxu0 %v10201_v8  ;;  %v2454_v8 = vld [vmem:[#allocation2 + $0x49] sm:$0xff] }
 0x238   : > { %7486 = vmatprep.mubr.f32.mxu0 %v10203_v11  ;;  %v8641_v11 = vpack.c.bf16 %v2792_v60, %v2791_v56  ;;  %v2475_v56 = vld [vmem:[#allocation2 + $0x141] sm:$0xff]  ;;  %v2476_v60 = vld [vmem:[#allocation2 + $0x151] sm:$0xff] }
 0x23b   : > { %7487 = vmatmul.mubr.f32.gmra.mrb[22].mxu0 %v10207_v12  ;;  %v2793_v12 = vld [vmem:[#allocation6 + $0x420] sm:$0xff] }
 0x23c   : > { %7489 = vmatprep.mubr.f32.mxu0 %v10209_v18  ;;  %v8673_v18 = vpack.c.bf16 %v3248_v7, %v3247_v2  ;;  %v2479_v2 = vld [vmem:[#allocation2 + $0x171] sm:$0xff]  ;;  %v9543_v7 = vld [vmem:[#allocation2 + $0x189] sm:$0xff] }
 0x23e   : > { %8674 = vmatprep.subr.bf16.mxu1 %v8673_v18 }
 0x23f   : > { %7490 = vmatmul.mubr.f32.gmra.mrb[24].mxu0 %v10221_v34  ;;  %v2794_v34 = vld [vmem:[#allocation6 + $0x428] sm:$0xff]  ;;  %8676 = vmatpush3.bf16.msra.mxu1 %v8673_v18  ;;  %v2759_v18 = vld [vmem:[#allocation2 + $0x4a] sm:$0xff] }
 0x240   : > { %7492 = vmatprep.mubr.f32.mxu0 %v10223_v45  ;;  %v3249_v45 = vld [vmem:[#allocation8 + $0xa0] sm:$0xff]  ;;  %v8645_v47 = vpack.c.bf16 %v2794_v34, %v2793_v12  ;;  %v2758_v12 = vld [vmem:[#allocation2 + $0x3a] sm:$0xff] }
 0x241   : > { %v2760_v34 = vld [vmem:[#allocation2 + $0x52] sm:$0xff] }
 0x243   : > { %7493 = vmatmul.mubr.f32.gmra.mrb[26].mxu0 %v10227_v51  ;;  %v3250_v51 = vld [vmem:[#allocation8 + $0xa8] sm:$0xff] }
 0x244   : > { %7495 = vmatprep.mubr.f32.mxu0 %v10349_v52  ;;  %v2455_v52 = vld [vmem:[#allocation2 + $0x51] sm:$0xff]  ;;  %v8677_v42 = vpack.c.bf16 %v3250_v51, %v3249_v45  ;;  %v2761_v45 = vld [vmem:[#allocation2 + $0x62] sm:$0xff] }
 0x245   : > { %v2762_v51 = vld [vmem:[#allocation2 + $0x6a] sm:$0xff] }
 0x246   : > { %8678 = vmatprep.subr.bf16.mxu1 %v8677_v42 }
 0x247   : > { %7496 = vmatmul.mubr.f32.gmra.mrb[28].mxu0 %v10353_v43  ;;  %v2456_v43 = vld [vmem:[#allocation2 + $0x61] sm:$0xff]  ;;  %8680 = vmatpush3.bf16.msra.mxu1 %v8677_v42  ;;  %v2767_v42 = vld [vmem:[#allocation2 + $0xaa] sm:$0xff] }
 0x248   : > { %7498 = vmatprep.mubr.f32.mxu0 %v2177_v44  ;;  %8682 = vmatprep.subr.bf16.mxu1 %v8681_v16  ;;  %v2473_v44 = vld [vmem:[#allocation2 + $0x129] sm:$0xff] }
 0x24b   : > { %7499 = vmatmul.mubr.f32.gmra.mrb[30].mxu0 %v10454_v61  ;;  %8684 = vmatpush3.bf16.msra.mxu1 %v8681_v16  ;;  %v2775_v16 = vld [vmem:[#allocation2 + $0x10a] sm:$0xff] }
 0x24c   : > { %7533 = vmatprep.mubr.f32.mxu0 %v2452_v55  ;;  %8686 = vmatprep.subr.bf16.mxu1 %v8685_v25  ;;  %v2474_v55 = vld [vmem:[#allocation2 + $0x139] sm:$0xff] }
 0x24f   : > { %7534 = vmatmul.mubr.f32.vlgmr.msra.gmra.mrb[0].mxu0 %v2453_v3  ;;  %8688 = vmatpush3.bf16.msra.mxu1 %v8685_v25  ;;  %v9542_v3 = vld [vmem:[#allocation2 + $0x181] sm:$0xff]  ;;  %v2783_v25 = vld [vmem:[#allocation2 + $0x16a] sm:$0xff] }
 0x250   : > { %8640 = vmatpush3.bf16.msra.mxu0 %v8637_v40  ;;  %7536 = vmatprep.mubr.f32.mxu0 %v2454_v8  ;;  %v2472_v40 = vld [vmem:[#allocation2 + $0x121] sm:$0xff] }
 0x251   : > { %8642 = vmatprep.subr.bf16.mxu0 %v8641_v11  ;;  %8690 = vmatprep.subr.bf16.mxu1 %v8689_v41  ;;  %v2483_v8 = vld [vmem:[#allocation2 + $0x1a1] sm:$0xff] }
 0x253   : > { %7537 = vmatmul.mubr.f32.gmra.mrb[2].mxu0 %v2455_v52  ;;  %8692 = vmatpush3.bf16.msra.mxu1 %v8689_v41  ;;  %v2763_v52 = vld [vmem:[#allocation2 + $0x7a] sm:$0xff] }
 0x254   : > { %7539 = vmatprep.mubr.f32.mxu0 %v2456_v43  ;;  %8644 = vmatpush3.bf16.msra.mxu0 %v8641_v11  ;;  %v2757_v11 = vld [vmem:[#allocation2 + $0x32] sm:$0xff]  ;;  %v2764_v43 = vld [vmem:[#allocation2 + $0x82] sm:$0xff] }
 0x255   : > { %8646 = vmatprep.subr.bf16.mxu0 %v8645_v47  ;;  %v3259_v41 = vld [vmem:[#allocation8 + $0xf0] sm:$0xff] }
 0x256   : > { %v8697_v59 = vpack.c.bf16 %v3260_v36, %v3259_v41 }
 0x257   : > { %7540 = vmatmul.mubr.f32.gmra.mrb[4].mxu0 %v2457_v33  ;;  %v2771_v33 = vld [vmem:[#allocation2 + $0xda] sm:$0xff] }
 0x258   : > { %7542 = vmatprep.mubr.f32.mxu0 %v2458_v14  ;;  %8648 = vmatpush3.bf16.msra.mxu0 %v8645_v47  ;;  %v2765_v47 = vld [vmem:[#allocation2 + $0x92] sm:$0xff]  ;;  %v2772_v14 = vld [vmem:[#allocation2 + $0xe2] sm:$0xff] }
 0x259   : > { %8650 = vmatprep.subr.bf16.mxu0 %v8649_v15 }
 0x25b   : > { %7543 = vmatmul.mubr.f32.gmra.mrb[6].mxu0 %v2459_v20  ;;  %v2779_v20 = vld [vmem:[#allocation2 + $0x13a] sm:$0xff] }
 0x25c   : > { %7545 = vmatprep.mubr.f32.mxu0 %v2460_v29  ;;  %8652 = vmatpush3.bf16.msra.mxu0 %v8649_v15  ;;  %v2773_v15 = vld [vmem:[#allocation2 + $0xf2] sm:$0xff]  ;;  %v2780_v29 = vld [vmem:[#allocation2 + $0x142] sm:$0xff] }
 0x25d   : > { %8654 = vmatprep.subr.bf16.mxu0 %v8653_v21 }
 0x25f   : > { %7546 = vmatmul.mubr.f32.gmra.mrb[8].mxu0 %v2461_v31  ;;  %v3257_v31 = vld [vmem:[#allocation8 + $0xe0] sm:$0xff] }
 0x260   : > { %7548 = vmatprep.mubr.f32.mxu0 %v2462_v32  ;;  %8656 = vmatpush3.bf16.msra.mxu0 %v8653_v21  ;;  %v2781_v21 = vld [vmem:[#allocation2 + $0x152] sm:$0xff] }
 0x261   : > { %8658 = vmatprep.subr.bf16.mxu0 %v8657_v35  ;;  %v3258_v32 = vld [vmem:[#allocation8 + $0xe8] sm:$0xff] }
 0x263   : > { %7549 = vmatmul.mubr.f32.gmra.mrb[10].mxu0 %v2463_v37  ;;  %v3213_v37 = vld [vmem:[#allocation2 + $0x1] sm:$0xff] }
 0x264   : > { %7551 = vmatprep.mubr.f32.mxu0 %v2464_v63  ;;  %8660 = vmatpush3.bf16.msra.mxu0 %v8657_v35  ;;  %v8693_v35 = vpack.c.bf16 %v3258_v32, %v3257_v31  ;;  %v3214_v63 = vld [vmem:[#allocation2 + $0x9] sm:$0xff] }
 0x265   : > { %8662 = vmatprep.subr.bf16.mxu0 %v8661_v1  ;;  %7693 = vmatprep.mubr.f32.mxu1 %v3213_v37 }
 0x266   : > { %8694 = vmatprep.subr.bf16.mxu1 %v8693_v35 }
 0x267   : > { %7552 = vmatmul.mubr.f32.gmra.mrb[12].mxu0 %v2465_v5  ;;  %8696 = vmatpush3.bf16.msra.mxu1 %v8693_v35  ;;  %v8705_v5 = vpack.c.bf16 %v3200_v4, %v3199_v38 }
 0x268   : > { %7554 = vmatprep.mubr.f32.mxu0 %v2466_v50  ;;  %8664 = vmatpush3.bf16.msra.mxu0 %v8661_v1  ;;  %v3198_v1 = vld [vmem:[#allocation8 + $0x8] sm:$0xff]  ;;  %v3201_v50 = vld [vmem:[#allocation8 + $0x20] sm:$0xff] }
 0x269   : > { %8666 = vmatprep.subr.bf16.mxu0 %v8665_v9  ;;  %8698 = vmatprep.subr.bf16.mxu1 %v8697_v59 }
 0x26b   : > { %7555 = vmatmul.mubr.f32.gmra.mrb[14].mxu0 %v2467_v10  ;;  %8700 = vmatpush3.bf16.msra.mxu1 %v8697_v59 }
 0x26c   : > { %7557 = vmatprep.mubr.f32.mxu0 %v2468_v49  ;;  %8668 = vmatpush3.bf16.msra.mxu0 %v8665_v9  ;;  %v3202_v9 = vld [vmem:[#allocation8 + $0x28] sm:$0xff]  ;;  %v3203_v49 = vld [vmem:[#allocation8 + $0x30] sm:$0xff] }
 0x26d   : > { %v8709_v10 = vpack.c.bf16 %v3202_v9, %v3201_v50 }
 0x26e   : > { %7694 = vmatmul.mubr.f32.vlgmr.msra.gmra.mrb[0].mxu1 %v3214_v63 }
 0x26f   : > { %7558 = vmatmul.mubr.f32.gmra.mrb[16].mxu0 %v2469_v22  ;;  %v3204_v22 = vld [vmem:[#allocation8 + $0x38] sm:$0xff] }
 0x270   : > { %7560 = vmatprep.mubr.f32.mxu0 %v2470_v23  ;;  %v8713_v23 = vpack.c.bf16 %v3204_v22, %v3203_v49 }
 0x273   : > { %7561 = vmatmul.mubr.f32.gmra.mrb[18].mxu0 %v2471_v54  ;;  %v3205_v54 = vld [vmem:[#allocation8 + $0x40] sm:$0xff] }
 0x274   : > { %7563 = vmatprep.mubr.f32.mxu0 %v2472_v40  ;;  %v3206_v40 = vld [vmem:[#allocation8 + $0x48] sm:$0xff] }
 0x277   : > { %7564 = vmatmul.mubr.f32.gmra.mrb[20].mxu0 %v2473_v44  ;;  %v8717_v44 = vpack.c.bf16 %v3206_v40, %v3205_v54 }
 0x278   : > { %7566 = vmatprep.mubr.f32.mxu0 %v2474_v55  ;;  %v3207_v55 = vld [vmem:[#allocation8 + $0x50] sm:$0xff] }
 0x27b   : > { %7567 = vmatmul.mubr.f32.gmra.mrb[22].mxu0 %v2475_v56  ;;  %v3208_v56 = vld [vmem:[#allocation8 + $0x58] sm:$0xff] }
 0x27c   : > { %7569 = vmatprep.mubr.f32.mxu0 %v2476_v60  ;;  %v8721_v60 = vpack.c.bf16 %v3208_v56, %v3207_v55 }
 0x27f   : > { %7570 = vmatmul.mubr.f32.gmra.mrb[24].mxu0 %v2477_v62  ;;  %v3209_v62 = vld [vmem:[#allocation8 + $0x60] sm:$0xff] }
 0x280   : > { %7572 = vmatprep.mubr.f32.mxu0 %v2478_v0  ;;  %v3210_v0 = vld [vmem:[#allocation8 + $0x68] sm:$0xff] }
 0x283   : > { %7573 = vmatmul.mubr.f32.gmra.mrb[26].mxu0 %v2479_v2  ;;  %v8725_v2 = vpack.c.bf16 %v3210_v0, %v3209_v62 }
 0x284   : > { %7575 = vmatprep.mubr.f32.mxu0 %v9542_v3  ;;  %v3211_v3 = vld [vmem:[#allocation8 + $0x70] sm:$0xff] }
 0x287   : > { %7576 = vmatmul.mubr.f32.gmra.mrb[28].mxu0 %v9543_v7 }
 0x288   : > { %7578 = vmatprep.mubr.f32.mxu0 %v2482_v6  ;;  %v3212_v6 = vld [vmem:[#allocation8 + $0x78] sm:$0xff] }
 0x289   : > { %v8729_v7 = vpack.c.bf16 %v3212_v6, %v3211_v3 }
 0x28b   : > { %7579 = vmatmul.mubr.f32.gmra.mrb[30].mxu0 %v2483_v8  ;;  %v3743_v8 = vld [vmem:[#allocation8 + $0x100] sm:$0xff] }
 0x28c   : > { %7613 = vmatprep.mubr.f32.mxu0 %v2757_v11  ;;  %v3744_v11 = vld [vmem:[#allocation8 + $0x108] sm:$0xff] }
 0x28f   : > { %7614 = vmatmul.mubr.f32.vlgmr.msra.gmra.mrb[0].mxu0 %v2758_v12  ;;  %v10459_v12 = vpack.c.bf16 %v3744_v11, %v3743_v8 }
 0x290   : > { %7616 = vmatprep.mubr.f32.mxu0 %v2759_v18  ;;  %v10465_v18 = vld [vmem:[%s11056_s2] ss:$0 sm:$0xff] }
 0x293   : > { %7617 = vmatmul.mubr.f32.gmra.mrb[2].mxu0 %v2760_v34 }
 0x294   : > { %7619 = vmatprep.mubr.f32.mxu0 %v2761_v45 }
 0x297   : > { %7620 = vmatmul.mubr.f32.gmra.mrb[4].mxu0 %v2762_v51 }
 0x298   : > { %7622 = vmatprep.mubr.f32.mxu0 %v2763_v52 }
 0x29b   : > { %7623 = vmatmul.mubr.f32.gmra.mrb[6].mxu0 %v2764_v43 }
 0x29c   : > { %7625 = vmatprep.mubr.f32.mxu0 %v2765_v47 }
 0x29f   : > { %7626 = vmatmul.mubr.f32.gmra.mrb[8].mxu0 %v2766_v13 }
 0x2a0   : > { %7628 = vmatprep.mubr.f32.mxu0 %v2767_v42 }
 0x2a3   : > { %7629 = vmatmul.mubr.f32.gmra.mrb[10].mxu0 %v2768_v57 }
 0x2a4   : > { %7631 = vmatprep.mubr.f32.mxu0 %v2769_v53 }
 0x2a7   : > { %7632 = vmatmul.mubr.f32.gmra.mrb[12].mxu0 %v2770_v46 }
 0x2a8   : > { %7634 = vmatprep.mubr.f32.mxu0 %v2771_v33 }
 0x2ab   : > { %7635 = vmatmul.mubr.f32.gmra.mrb[14].mxu0 %v2772_v14 }
 0x2ac   : > { %7637 = vmatprep.mubr.f32.mxu0 %v2773_v15 }
 0x2af   : > { %7638 = vmatmul.mubr.f32.gmra.mrb[16].mxu0 %v2774_v58 }
 0x2b0   : > { %7640 = vmatprep.mubr.f32.mxu0 %v2775_v16 }
 0x2b3   : > { %7641 = vmatmul.mubr.f32.gmra.mrb[18].mxu0 %v2776_v17 }
 0x2b4   : > { %7643 = vmatprep.mubr.f32.mxu0 %v2777_v48 }
 0x2b7   : > { %7644 = vmatmul.mubr.f32.gmra.mrb[20].mxu0 %v2778_v19 }
 0x2b8   : > { %7646 = vmatprep.mubr.f32.mxu0 %v2779_v20 }
 0x2bb   : > { %7647 = vmatmul.mubr.f32.gmra.mrb[22].mxu0 %v2780_v29 }
 0x2bc   : > { %7649 = vmatprep.mubr.f32.mxu0 %v2781_v21 }
 0x2bf   : > { %7650 = vmatmul.mubr.f32.gmra.mrb[24].mxu0 %v2782_v39 }
 0x2c0   : > { %7652 = vmatprep.mubr.f32.mxu0 %v2783_v25 }
 0x2c3   : > { %7653 = vmatmul.mubr.f32.gmra.mrb[26].mxu0 %v2784_v27 }
 0x2c4   : > { %7655 = vmatprep.mubr.f32.mxu0 %v10417_v24  ;;  %v3197_v24 = vld [vmem:[#allocation8] sm:$0xff] }
 0x2c7   : > { %7656 = vmatmul.mubr.f32.gmra.mrb[28].mxu0 %v10421_v26  ;;  %v8701_v26 = vpack.c.bf16 %v3198_v1, %v3197_v24 }
 0x2c8   : > { %7658 = vmatprep.mubr.f32.mxu0 %v2787_v28 }
 0x2c9   : > { %8702 = vmatprep.subr.bf16.mxu1 %v8701_v26 }
 0x2ca   : > { %8704 = vmatpush3.bf16.msra.mxu1 %v8701_v26 }
 0x2cb   : > { %7659 = vmatmul.mubr.f32.gmra.mrb[30].mxu0 %v2788_v30  ;;  %8706 = vmatprep.subr.bf16.mxu1 %v8705_v5 }
 0x2ce   : > { %8708 = vmatpush3.bf16.msra.mxu1 %v8705_v5 }
 0x2cf   : > { %8710 = vmatprep.subr.bf16.mxu1 %v8709_v10 }
 0x2d2   : > { %8712 = vmatpush3.bf16.msra.mxu1 %v8709_v10 }
 0x2d3   : > { %8714 = vmatprep.subr.bf16.mxu1 %v8713_v23 }
 0x2d6   : > { %8716 = vmatpush3.bf16.msra.mxu1 %v8713_v23 }
 0x2d7   : > { %8718 = vmatprep.subr.bf16.mxu1 %v8717_v44 }
 0x2da   : > { %8720 = vmatpush3.bf16.msra.mxu1 %v8717_v44 }
 0x2db   : > { %8722 = vmatprep.subr.bf16.mxu1 %v8721_v60 }
 0x2de   : > { %8724 = vmatpush3.bf16.msra.mxu1 %v8721_v60 }
 0x2df   : > { %8726 = vmatprep.subr.bf16.mxu1 %v8725_v2 }
 0x2e2   : > { %8728 = vmatpush3.bf16.msra.mxu1 %v8725_v2 }
 0x2e3   : > { %8730 = vmatprep.subr.bf16.mxu1 %v8729_v7 }
 0x2e6   : > { %8732 = vmatpush3.bf16.msra.mxu1 %v8729_v7 }
 0x2e7   : > { %8734 = vmatprep.subr.bf16.mxu1 %v10459_v12 }
 0x362   : > { %v7615_v34 = vpop.f32.mrb[0].mxu0 }
 0x363   : > { %v3070_v45 = vadd.f32 %v7615_v34, %v10465_v18  ;;  %v2871_v51 = vpop.f32.mrb[1].mxu0 }
 0x364   : > { %v3069_v52 = vadd.f32 %v10465_v18, %v2871_v51 }
 0x365   : > { %v3102_v43 = vmax.f32 %v3070_v45, 0.0 }
 0x366   : > { %v3101_v47 = vmax.f32 %v3069_v52, 0.0  ;;  %v7618_v13 = vpop.f32.mrb[2].mxu0 }
 0x367   : > { %3134 = vst [vmem:[#allocation2 + $0x21] sm:$0xff] %v3102_v43  ;;  %v3072_v42 = vadd.f32 %v7618_v13, %v10465_v18  ;;  %v2881_v57 = vpop.f32.mrb[3].mxu0 }
 0x368   : > { %3133 = vst [vmem:[#allocation2 + $0x19] sm:$0xff] %v3101_v47  ;;  %v3071_v53 = vadd.f32 %v10465_v18, %v2881_v57  ;;  %7696 = vmatprep.mubr.f32.mxu1 %v3101_v47 }
 0x369   : > { %v3104_v46 = vmax.f32 %v3072_v42, 0.0  ;;  %7697 = vmatmul.mubr.f32.gmra.mrb[2].mxu1 %v3102_v43 }
 0x36a   : > { %v3103_v33 = vmax.f32 %v3071_v53, 0.0  ;;  %v7621_v14 = vpop.f32.mrb[4].mxu0 }
 0x36b   : > { %3136 = vst [vmem:[#allocation2 + $0x39] sm:$0xff] %v3104_v46  ;;  %v3074_v15 = vadd.f32 %v7621_v14, %v10465_v18  ;;  %v2891_v58 = vpop.f32.mrb[5].mxu0 }
 0x36c   : > { %3135 = vst [vmem:[#allocation2 + $0x31] sm:$0xff] %v3103_v33  ;;  %v3073_v16 = vadd.f32 %v10465_v18, %v2891_v58  ;;  %7699 = vmatprep.mubr.f32.mxu1 %v3103_v33 }
 0x36d   : > { %v3106_v17 = vmax.f32 %v3074_v15, 0.0  ;;  %7700 = vmatmul.mubr.f32.gmra.mrb[4].mxu1 %v3104_v46 }
 0x36e   : > { %v3105_v48 = vmax.f32 %v3073_v16, 0.0  ;;  %v7624_v19 = vpop.f32.mrb[6].mxu0 }
 0x36f   : > { %3138 = vst [vmem:[#allocation2 + $0x51] sm:$0xff] %v3106_v17  ;;  %v3076_v20 = vadd.f32 %v7624_v19, %v10465_v18  ;;  %v2901_v29 = vpop.f32.mrb[7].mxu0 }
 0x370   : > { %3137 = vst [vmem:[#allocation2 + $0x49] sm:$0xff] %v3105_v48  ;;  %v3075_v21 = vadd.f32 %v10465_v18, %v2901_v29  ;;  %7702 = vmatprep.mubr.f32.mxu1 %v3105_v48 }
 0x371   : > { %v3108_v39 = vmax.f32 %v3076_v20, 0.0  ;;  %7703 = vmatmul.mubr.f32.gmra.mrb[6].mxu1 %v3106_v17 }
 0x372   : > { %v3107_v25 = vmax.f32 %v3075_v21, 0.0  ;;  %v7627_v27 = vpop.f32.mrb[8].mxu0 }
 0x373   : > { %3140 = vst [vmem:[#allocation2 + $0x69] sm:$0xff] %v3108_v39  ;;  %v3078_v28 = vadd.f32 %v7627_v27, %v10465_v18  ;;  %v2911_v30 = vpop.f32.mrb[9].mxu0 }
 0x374   : > { %3139 = vst [vmem:[#allocation2 + $0x61] sm:$0xff] %v3107_v25  ;;  %v3077_v31 = vadd.f32 %v10465_v18, %v2911_v30  ;;  %7705 = vmatprep.mubr.f32.mxu1 %v3107_v25 }
 0x375   : > { %v3110_v32 = vmax.f32 %v3078_v28, 0.0  ;;  %7706 = vmatmul.mubr.f32.gmra.mrb[8].mxu1 %v3108_v39 }
 0x376   : > { %v3109_v35 = vmax.f32 %v3077_v31, 0.0  ;;  %v7630_v41 = vpop.f32.mrb[10].mxu0 }
 0x377   : > { %3142 = vst [vmem:[#allocation2 + $0x81] sm:$0xff] %v3110_v32  ;;  %v3080_v36 = vadd.f32 %v7630_v41, %v10465_v18  ;;  %v2921_v59 = vpop.f32.mrb[11].mxu0 }
 0x378   : > { %3141 = vst [vmem:[#allocation2 + $0x79] sm:$0xff] %v3109_v35  ;;  %v3079_v37 = vadd.f32 %v10465_v18, %v2921_v59  ;;  %7708 = vmatprep.mubr.f32.mxu1 %v3109_v35  ;;  %v3165_v59 = vld [vmem:[#allocation2] sm:$0xff] }
 0x379   : > { %v3112_v63 = vmax.f32 %v3080_v36, 0.0  ;;  %7709 = vmatmul.mubr.f32.gmra.mrb[10].mxu1 %v3110_v32 }
 0x37a   : > { %v10479_v24 = vmax.f32 %v3079_v37, 0.0  ;;  %v7633_v1 = vpop.f32.mrb[12].mxu0 }
 0x37b   : > { %3144 = vst [vmem:[#allocation2 + $0x99] sm:$0xff] %v3112_v63  ;;  %v3082_v26 = vadd.f32 %v7633_v1, %v10465_v18  ;;  %v2931_v38 = vpop.f32.mrb[13].mxu0  ;;  %v3746_v1 = vld [vmem:[#allocation8 + $0x118] sm:$0xff] }
 0x37c   : > { %3143 = vst [vmem:[#allocation2 + $0x91] sm:$0xff] %v10479_v24  ;;  %v3081_v4 = vadd.f32 %v10465_v18, %v2931_v38  ;;  %7711 = vmatprep.mubr.f32.mxu1 %v10479_v24 }
 0x37d   : > { %v10485_v5 = vmax.f32 %v3082_v26, 0.0  ;;  %7712 = vmatmul.mubr.f32.gmra.mrb[12].mxu1 %v3112_v63  ;;  %v3745_v63 = vld [vmem:[#allocation8 + $0x110] sm:$0xff] }
 0x37e   : > { %v10487_v50 = vmax.f32 %v3081_v4, 0.0  ;;  %v7636_v9 = vpop.f32.mrb[14].mxu0  ;;  %v8737_v4 = vpack.c.bf16 %v3746_v1, %v3745_v63 }
 0x37f   : > { %3146 = vst [vmem:[#allocation2 + $0xb1] sm:$0xff] %v10485_v5  ;;  %v3084_v10 = vadd.f32 %v7636_v9, %v10465_v18  ;;  %v2941_v49 = vpop.f32.mrb[15].mxu0  ;;  %v3748_v9 = vld [vmem:[#allocation8 + $0x128] sm:$0xff] }
 0x380   : > { %3145 = vst [vmem:[#allocation2 + $0xa9] sm:$0xff] %v10487_v50  ;;  %v3083_v22 = vadd.f32 %v10465_v18, %v2941_v49  ;;  %7714 = vmatprep.mubr.f32.mxu1 %v10487_v50 }
 0x381   : > { %v10494_v23 = vmax.f32 %v3084_v10, 0.0  ;;  %7715 = vmatmul.mubr.f32.gmra.mrb[14].mxu1 %v10485_v5  ;;  %v10586_v10 = vld [vmem:[#allocation2 + $0x18] sm:$0xff] }
 0x382   : > { %v10497_v54 = vmax.f32 %v3083_v22, 0.0  ;;  %v7639_v40 = vpop.f32.mrb[16].mxu0  ;;  %v10590_v22 = vld [vmem:[#allocation2 + $0x20] sm:$0xff] }
 0x383   : > { %3148 = vst [vmem:[#allocation2 + $0xc9] sm:$0xff] %v10494_v23  ;;  %v3086_v44 = vadd.f32 %v7639_v40, %v10465_v18  ;;  %v2951_v55 = vpop.f32.mrb[17].mxu0  ;;  %v3749_v40 = vld [vmem:[#allocation8 + $0x130] sm:$0xff] }
 0x384   : > { %3147 = vst [vmem:[#allocation2 + $0xc1] sm:$0xff] %v10497_v54  ;;  %v3085_v56 = vadd.f32 %v10465_v18, %v2951_v55  ;;  %7717 = vmatprep.mubr.f32.mxu1 %v10497_v54  ;;  %v10593_v55 = vld [vmem:[#allocation2 + $0x30] sm:$0xff] }
 0x385   : > { %v10504_v60 = vmax.f32 %v3086_v44, 0.0  ;;  %7718 = vmatmul.mubr.f32.gmra.mrb[16].mxu1 %v10494_v23  ;;  %v3750_v44 = vld [vmem:[#allocation8 + $0x138] sm:$0xff] }
 0x386   : > { %v10507_v62 = vmax.f32 %v3085_v56, 0.0  ;;  %v7642_v0 = vpop.f32.mrb[18].mxu0  ;;  %v10596_v56 = vld [vmem:[#allocation2 + $0x38] sm:$0xff] }
 0x387   : > { %3150 = vst [vmem:[#allocation2 + $0xe1] sm:$0xff] %v10504_v60  ;;  %v3088_v2 = vadd.f32 %v7642_v0, %v10465_v18  ;;  %v2961_v3 = vpop.f32.mrb[19].mxu0  ;;  %v3751_v0 = vld [vmem:[#allocation8 + $0x140] sm:$0xff] }
 0x388   : > { %3149 = vst [vmem:[#allocation2 + $0xd9] sm:$0xff] %v10507_v62  ;;  %v3087_v6 = vadd.f32 %v10465_v18, %v2961_v3  ;;  %7720 = vmatprep.mubr.f32.mxu1 %v10507_v62 }
 0x389   : > { %v10514_v7 = vmax.f32 %v3088_v2, 0.0  ;;  %7721 = vmatmul.mubr.f32.gmra.mrb[18].mxu1 %v10504_v60  ;;  %v3752_v2 = vld [vmem:[#allocation8 + $0x148] sm:$0xff] }
 0x38a   : > { %v10517_v8 = vmax.f32 %v3087_v6, 0.0  ;;  %v7645_v11 = vpop.f32.mrb[20].mxu0  ;;  %v8749_v3 = vpack.c.bf16 %v3752_v2, %v3751_v0  ;;  %v10602_v6 = vld [vmem:[#allocation2 + $0x50] sm:$0xff] }
 0x38b   : > { %3152 = vst [vmem:[#allocation2 + $0xf9] sm:$0xff] %v10514_v7  ;;  %v3090_v34 = vadd.f32 %v7645_v11, %v10465_v18  ;;  %v2971_v45 = vpop.f32.mrb[21].mxu0  ;;  %v3753_v11 = vld [vmem:[#allocation8 + $0x150] sm:$0xff] }
 0x38c   : > { %3151 = vst [vmem:[#allocation2 + $0xf1] sm:$0xff] %v10517_v8  ;;  %v3089_v51 = vadd.f32 %v10465_v18, %v2971_v45  ;;  %7723 = vmatprep.mubr.f32.mxu1 %v10517_v8  ;;  %v10605_v45 = vld [vmem:[#allocation2 + $0x60] sm:$0xff] }
 0x38d   : > { %v10524_v52 = vmax.f32 %v3090_v34, 0.0  ;;  %7724 = vmatmul.mubr.f32.gmra.mrb[20].mxu1 %v10514_v7  ;;  %v3754_v34 = vld [vmem:[#allocation8 + $0x158] sm:$0xff] }
 0x38e   : > { %v10527_v43 = vmax.f32 %v3089_v51, 0.0  ;;  %v7648_v47 = vpop.f32.mrb[22].mxu0  ;;  %v8753_v51 = vpack.c.bf16 %v3754_v34, %v3753_v11  ;;  %v3711_v11 = vld [vmem:[#allocation2 + $0x2] sm:$0xff] }
 0x38f   : > { %3154 = vst [vmem:[#allocation2 + $0x111] sm:$0xff] %v10524_v52  ;;  %v3092_v13 = vadd.f32 %v7648_v47, %v10465_v18  ;;  %v2981_v42 = vpop.f32.mrb[23].mxu0  ;;  %v10608_v47 = vld [vmem:[#allocation2 + $0x68] sm:$0xff]  ;;  %v10638_v63 = vld [vmem:[#allocation2 + $0xe0] sm:$0xff] }
 0x390   : > { %3153 = vst [vmem:[#allocation2 + $0x109] sm:$0xff] %v10527_v43  ;;  %v3091_v57 = vadd.f32 %v10465_v18, %v2981_v42  ;;  %7726 = vmatprep.mubr.f32.mxu1 %v10527_v43  ;;  %v3756_v42 = vld [vmem:[#allocation8 + $0x168] sm:$0xff] }
 0x391   : > { %v10534_v53 = vmax.f32 %v3092_v13, 0.0  ;;  %7727 = vmatmul.mubr.f32.gmra.mrb[22].mxu1 %v10524_v52  ;;  %v3755_v13 = vld [vmem:[#allocation8 + $0x160] sm:$0xff] }
 0x392   : > { %v10537_v46 = vmax.f32 %v3091_v57, 0.0  ;;  %v7651_v33 = vpop.f32.mrb[24].mxu0  ;;  %v10611_v57 = vld [vmem:[#allocation2 + $0x78] sm:$0xff] }
 0x393   : > { %3156 = vst [vmem:[#allocation2 + $0x129] sm:$0xff] %v10534_v53  ;;  %v3094_v14 = vadd.f32 %v7651_v33, %v10465_v18  ;;  %v2991_v15 = vpop.f32.mrb[25].mxu0  ;;  %v8757_v33 = vpack.c.bf16 %v3756_v42, %v3755_v13  ;;  %v10641_v1 = vld [vmem:[#allocation2 + $0xf0] sm:$0xff]  ;;  %v4051_v13 = vld [vmem:[#allocation8 + $0x198] sm:$0xff] }
 0x394   : > { %3155 = vst [vmem:[#allocation2 + $0x121] sm:$0xff] %v10537_v46  ;;  %v3093_v58 = vadd.f32 %v10465_v18, %v2991_v15  ;;  %7729 = vmatprep.mubr.f32.mxu1 %v10537_v46  ;;  %v3757_v15 = vld [vmem:[#allocation8 + $0x170] sm:$0xff]  ;;  %v3712_v42 = vld [vmem:[#allocation2 + $0xa] sm:$0xff] }
 0x395   : > { %v10544_v16 = vmax.f32 %v3094_v14, 0.0  ;;  %7730 = vmatmul.mubr.f32.gmra.mrb[24].mxu1 %v10534_v53  ;;  %v10614_v14 = vld [vmem:[#allocation2 + $0x80] sm:$0xff] }
 0x396   : > { %v10547_v17 = vmax.f32 %v3093_v58, 0.0  ;;  %v7654_v48 = vpop.f32.mrb[26].mxu0  ;;  %v3758_v58 = vld [vmem:[#allocation8 + $0x178] sm:$0xff] }
 0x397   : > { %3158 = vst [vmem:[#allocation2 + $0x141] sm:$0xff] %v10544_v16  ;;  %v3096_v19 = vadd.f32 %v7654_v48, %v10465_v18  ;;  %v3001_v20 = vpop.f32.mrb[27].mxu0  ;;  %v10617_v48 = vld [vmem:[#allocation2 + $0x90] sm:$0xff] }
 0x398   : > { %3157 = vst [vmem:[#allocation2 + $0x139] sm:$0xff] %v10547_v17  ;;  %v3095_v29 = vadd.f32 %v10465_v18, %v3001_v20  ;;  %7732 = vmatprep.mubr.f32.mxu1 %v10547_v17  ;;  %v10620_v20 = vld [vmem:[#allocation2 + $0x98] sm:$0xff] }
 0x399   : > { %v10554_v21 = vmax.f32 %v3096_v19, 0.0  ;;  %7733 = vmatmul.mubr.f32.gmra.mrb[26].mxu1 %v10544_v16  ;;  %v8761_v19 = vpack.c.bf16 %v3758_v58, %v3757_v15  ;;  %v4052_v15 = vld [vmem:[#allocation8 + $0x1a0] sm:$0xff]  ;;  %v4053_v58 = vld [vmem:[#allocation8 + $0x1a8] sm:$0xff] }
 0x39a   : > { %v10557_v39 = vmax.f32 %v3095_v29, 0.0  ;;  %v7657_v25 = vpop.f32.mrb[28].mxu0  ;;  %v4048_v29 = vld [vmem:[#allocation8 + $0x180] sm:$0xff] }
 0x39b   : > { %3160 = vst [vmem:[#allocation2 + $0x159] sm:$0xff] %v10554_v21  ;;  %v3098_v27 = vadd.f32 %v7657_v25, %v10465_v18  ;;  %v3011_v28 = vpop.f32.mrb[29].mxu0  ;;  %v4049_v25 = vld [vmem:[#allocation8 + $0x188] sm:$0xff] }
 0x39c   : > { %3159 = vst [vmem:[#allocation2 + $0x151] sm:$0xff] %v10557_v39  ;;  %v3097_v30 = vadd.f32 %v10465_v18, %v3011_v28  ;;  %7735 = vmatprep.mubr.f32.mxu1 %v10557_v39  ;;  %v8765_v28 = vpack.c.bf16 %v4049_v25, %v4048_v29  ;;  %v8773_v29 = vpack.c.bf16 %v4053_v58, %v4052_v15  ;;  %v10680_v25 = vld [vmem:[#allocation2 + $0x22] sm:$0xff]  ;;  %v10692_v58 = vld [vmem:[#allocation2 + $0x52] sm:$0xff] }
 0x39d   : > { %v10564_v31 = vmax.f32 %v3098_v27, 0.0  ;;  %7736 = vmatmul.mubr.f32.gmra.mrb[28].mxu1 %v10554_v21  ;;  %v10623_v27 = vld [vmem:[#allocation2 + $0xa8] sm:$0xff]  ;;  %11228 = vst [vmem:[#allocation16_spill] sm:$0xff] %v10680_v25  ;;  %11232 = vst [vmem:[#allocation20_spill] sm:$0xff] %v10692_v58 }
 0x39e   : > { %v10567_v32 = vmax.f32 %v3097_v30, 0.0  ;;  %v7660_v35 = vpop.f32.mrb[30].mxu0  ;;  %v10626_v30 = vld [vmem:[#allocation2 + $0xb0] sm:$0xff] }
 0x39f   : > { %3162 = vst [vmem:[#allocation2 + $0x171] sm:$0xff] %v10564_v31  ;;  %v10571_v41 = vadd.f32 %v7660_v35, %v10465_v18  ;;  %v3021_v36 = vpop.f32.mrb[31].mxu0  ;;  %v10629_v35 = vld [vmem:[#allocation2 + $0xc0] sm:$0xff] }
 0x3a0   : > { %3161 = vst [vmem:[#allocation2 + $0x169] sm:$0xff] %v10567_v32  ;;  %v10575_v37 = vadd.f32 %v10465_v18, %v3021_v36  ;;  %7738 = vmatprep.mubr.f32.mxu1 %v10567_v32  ;;  %v3747_v18 = vld [vmem:[#allocation8 + $0x120] sm:$0xff]  ;;  %v10632_v36 = vld [vmem:[#allocation2 + $0xc8] sm:$0xff] }
 0x3a1   : > { %11225 = vst [vmem:[#allocation13_spill] sm:$0xff] %v10571_v41  ;;  %v11101_v26 = vmax.f32 %v10571_v41, 0.0  ;;  %7739 = vmatmul.mubr.f32.gmra.mrb[30].mxu1 %v10564_v31  ;;  %v8741_v49 = vpack.c.bf16 %v3748_v9, %v3747_v18  ;;  %v10647_v18 = vld [vmem:[#allocation2 + $0x108] sm:$0xff]  ;;  %v10650_v9 = vld [vmem:[#allocation2 + $0x110] sm:$0xff] }
 0x3a2   : > { %v11102_v38 = vmax.f32 %v10575_v37, 0.0  ;;  %7773 = vmatprep.mubr.f32.mxu1 %v3165_v59  ;;  %v10635_v59 = vld [vmem:[#allocation2 + $0xd8] sm:$0xff] }
 0x3a3   : > { %3164 = vst [vmem:[#allocation2 + $0x189] sm:$0xff] %v11101_v26  ;;  %v10665_v0 = vld [vmem:[#allocation2 + $0x150] sm:$0xff]  ;;  %v10668_v2 = vld [vmem:[#allocation2 + $0x158] sm:$0xff]  ;;  %v4054_v26 = vld [vmem:[#allocation8 + $0x1b0] sm:$0xff] }
 0x3a4   : > { %3163 = vst [vmem:[#allocation2 + $0x181] sm:$0xff] %v11102_v38  ;;  %v4055_v38 = vld [vmem:[#allocation8 + $0x1b8] sm:$0xff]  ;;  %v10683_v41 = vld [vmem:[#allocation2 + $0x32] sm:$0xff] }
 0x3a5   : > { %7774 = vmatmul.mubr.f32.vlgmr.msra.gmra.mrb[0].mxu1 %v10454_v61  ;;  %v8745_v61 = vpack.c.bf16 %v3750_v44, %v3749_v40  ;;  %v10656_v40 = vld [vmem:[#allocation2 + $0x128] sm:$0xff]  ;;  %v10659_v44 = vld [vmem:[#allocation2 + $0x138] sm:$0xff]  ;;  %11229 = vst [vmem:[#allocation17_spill] sm:$0xff] %v10683_v41 }
 0x3a6   : > { %7776 = vmatprep.mubr.f32.mxu1 %v10586_v10  ;;  %8736 = vmatpush3.bf16.msra.mxu1 %v10459_v12  ;;  %v10599_v12 = vld [vmem:[#allocation2 + $0x48] sm:$0xff] }
 0x3a7   : > { %8738 = vmatprep.subr.bf16.mxu1 %v8737_v4  ;;  %v10674_v34 = vld [vmem:[#allocation2 + $0x170] sm:$0xff] }
 0x3a8   : > { %11227 = vst [vmem:[#allocation15_spill] sm:$0xff] %v10674_v34 }
 0x3a9   : > { %7777 = vmatmul.mubr.f32.gmra.mrb[2].mxu1 %v10590_v22 }
 0x3aa   : > { %7779 = vmatprep.mubr.f32.mxu1 %v10593_v55  ;;  %8740 = vmatpush3.bf16.msra.mxu1 %v8737_v4  ;;  %v10644_v4 = vld [vmem:[#allocation2 + $0xf8] sm:$0xff] }
 0x3ab   : > { %8742 = vmatprep.subr.bf16.mxu1 %v8741_v49 }
 0x3ad   : > { %7780 = vmatmul.mubr.f32.gmra.mrb[4].mxu1 %v10596_v56 }
 0x3ae   : > { %7782 = vmatprep.mubr.f32.mxu1 %v10599_v12  ;;  %8744 = vmatpush3.bf16.msra.mxu1 %v8741_v49  ;;  %v10653_v49 = vld [vmem:[#allocation2 + $0x120] sm:$0xff] }
 0x3af   : > { %8746 = vmatprep.subr.bf16.mxu1 %v8745_v61 }
 0x3b1   : > { %7783 = vmatmul.mubr.f32.gmra.mrb[6].mxu1 %v10602_v6 }
 0x3b2   : > { %7785 = vmatprep.mubr.f32.mxu1 %v10605_v45  ;;  %8748 = vmatpush3.bf16.msra.mxu1 %v8745_v61  ;;  %v10662_v61 = vld [vmem:[#allocation2 + $0x140] sm:$0xff] }
 0x3b3   : > { %8750 = vmatprep.subr.bf16.mxu1 %v8749_v3 }
 0x3b5   : > { %7786 = vmatmul.mubr.f32.gmra.mrb[8].mxu1 %v10608_v47 }
 0x3b6   : > { %7788 = vmatprep.mubr.f32.mxu1 %v10611_v57  ;;  %8752 = vmatpush3.bf16.msra.mxu1 %v8749_v3  ;;  %v10671_v3 = vld [vmem:[#allocation2 + $0x168] sm:$0xff] }
 0x3b7   : > { %8754 = vmatprep.subr.bf16.mxu1 %v8753_v51  ;;  %11226 = vst [vmem:[#allocation14_spill] sm:$0xff] %v10671_v3 }
 0x3b9   : > { %7789 = vmatmul.mubr.f32.gmra.mrb[10].mxu1 %v10614_v14 }
 0x3ba   : > { %7791 = vmatprep.mubr.f32.mxu1 %v10617_v48  ;;  %8756 = vmatpush3.bf16.msra.mxu1 %v8753_v51  ;;  %v4050_v51 = vld [vmem:[#allocation8 + $0x190] sm:$0xff] }
 0x3bb   : > { %8758 = vmatprep.subr.bf16.mxu1 %v8757_v33 }
 0x3bd   : > { %7792 = vmatmul.mubr.f32.gmra.mrb[12].mxu1 %v10620_v20 }
 0x3be   : > { %7794 = vmatprep.mubr.f32.mxu1 %v10623_v27  ;;  %8760 = vmatpush3.bf16.msra.mxu1 %v8757_v33  ;;  %v8769_v33 = vpack.c.bf16 %v4051_v13, %v4050_v51  ;;  %v10686_v51 = vld [vmem:[#allocation2 + $0x3a] sm:$0xff]  ;;  %v4056_v13 = vld [vmem:[#allocation8 + $0x1c0] sm:$0xff] }
 0x3bf   : > { %8762 = vmatprep.subr.bf16.mxu1 %v8761_v19  ;;  %11230 = vst [vmem:[#allocation18_spill] sm:$0xff] %v10686_v51 }
 0x3c1   : > { %7795 = vmatmul.mubr.f32.gmra.mrb[14].mxu1 %v10626_v30 }
 0x3c2   : > { %7797 = vmatprep.mubr.f32.mxu1 %v10629_v35  ;;  %8764 = vmatpush3.bf16.msra.mxu1 %v8761_v19  ;;  %v10677_v19 = vld [vmem:[#allocation2 + $0x1a] sm:$0xff] }
 0x3c3   : > { %8766 = vmatprep.subr.bf16.mxu1 %v8765_v28 }
 0x3c5   : > { %7798 = vmatmul.mubr.f32.gmra.mrb[16].mxu1 %v10632_v36 }
 0x3c6   : > { %7800 = vmatprep.mubr.f32.mxu1 %v10635_v59 }
 0x3c9   : > { %7801 = vmatmul.mubr.f32.gmra.mrb[18].mxu1 %v10638_v63 }
 0x3ca   : > { %7803 = vmatprep.mubr.f32.mxu1 %v10641_v1 }
 0x3cd   : > { %7804 = vmatmul.mubr.f32.gmra.mrb[20].mxu1 %v10644_v4 }
 0x3ce   : > { %7806 = vmatprep.mubr.f32.mxu1 %v10647_v18 }
 0x3d1   : > { %7807 = vmatmul.mubr.f32.gmra.mrb[22].mxu1 %v10650_v9 }
 0x3d2   : > { %7809 = vmatprep.mubr.f32.mxu1 %v10653_v49 }
 0x3d5   : > { %7810 = vmatmul.mubr.f32.gmra.mrb[24].mxu1 %v10656_v40 }
 0x3d6   : > { %7812 = vmatprep.mubr.f32.mxu1 %v10659_v44 }
 0x3d9   : > { %7813 = vmatmul.mubr.f32.gmra.mrb[26].mxu1 %v10662_v61 }
 0x3da   : > { %7815 = vmatprep.mubr.f32.mxu1 %v10665_v0 }
 0x3dd   : > { %7816 = vmatmul.mubr.f32.gmra.mrb[28].mxu1 %v10668_v2 }
 0x3de   : > { %7818 = vmatprep.mubr.f32.mxu1 %v10671_v3 }
 0x3e1   : > { %7819 = vmatmul.mubr.f32.gmra.mrb[30].mxu1 %v10674_v34 }
 0x3e2   : > { %7853 = vmatprep.mubr.f32.mxu1 %v3711_v11  ;;  %v8777_v11 = vpack.c.bf16 %v4055_v38, %v4054_v26  ;;  %v10695_v26 = vld [vmem:[#allocation2 + $0x62] sm:$0xff] }
 0x3e3   : > { %11233 = vst [vmem:[#allocation21_spill] sm:$0xff] %v10695_v26 }
 0x3e5   : > { %7854 = vmatmul.mubr.f32.vlgmr.msra.gmra.mrb[0].mxu1 %v3712_v42  ;;  %v4057_v42 = vld [vmem:[#allocation8 + $0x1c8] sm:$0xff] }
 0x3e6   : > { %7856 = vmatprep.mubr.f32.mxu1 %v10677_v19  ;;  %8768 = vmatpush3.bf16.msra.mxu1 %v8765_v28  ;;  %v10689_v28 = vld [vmem:[#allocation2 + $0x4a] sm:$0xff]  ;;  %v8781_v15 = vpack.c.bf16 %v4057_v42, %v4056_v13  ;;  %v10704_v42 = vld [vmem:[#allocation2 + $0x82] sm:$0xff] }
 0x3e7   : > { %8770 = vmatprep.subr.bf16.mxu1 %v8769_v33  ;;  %11231 = vst [vmem:[#allocation19_spill] sm:$0xff] %v10689_v28 }
 0x3e9   : > { %7857 = vmatmul.mubr.f32.gmra.mrb[2].mxu1 %v10680_v25  ;;  %v4058_v25 = vld [vmem:[#allocation8 + $0x1d0] sm:$0xff] }
 0x3ea   : > { %7859 = vmatprep.mubr.f32.mxu1 %v10683_v41  ;;  %8772 = vmatpush3.bf16.msra.mxu1 %v8769_v33  ;;  %v4059_v41 = vld [vmem:[#allocation8 + $0x1d8] sm:$0xff] }
 0x3eb   : > { %8774 = vmatprep.subr.bf16.mxu1 %v8773_v29  ;;  %v8785_v38 = vpack.c.bf16 %v4059_v41, %v4058_v25  ;;  %v10698_v33 = vld [vmem:[#allocation2 + $0x6a] sm:$0xff]  ;;  %v10707_v41 = vld [vmem:[#allocation2 + $0x92] sm:$0xff] }
 0x3ec   : > { %11234 = vst [vmem:[#allocation22_spill] sm:$0xff] %v10698_v33 }
 0x3ed   : > { %7860 = vmatmul.mubr.f32.gmra.mrb[4].mxu1 %v10686_v51  ;;  %v4060_v51 = vld [vmem:[#allocation8 + $0x1e0] sm:$0xff] }
 0x3ee   : > { %7862 = vmatprep.mubr.f32.mxu1 %v10689_v28  ;;  %8776 = vmatpush3.bf16.msra.mxu1 %v8773_v29  ;;  %v4061_v28 = vld [vmem:[#allocation8 + $0x1e8] sm:$0xff] }
 0x3ef   : > { %8778 = vmatprep.subr.bf16.mxu1 %v8777_v11  ;;  %v10701_v29 = vld [vmem:[#allocation2 + $0x7a] sm:$0xff]  ;;  %v8789_v13 = vpack.c.bf16 %v4061_v28, %v4060_v51  ;;  %v10713_v51 = vld [vmem:[#allocation2 + $0xaa] sm:$0xff] }
 0x3f0   : > { %11235 = vst [vmem:[#allocation23_spill] sm:$0xff] %v10701_v29  ;;  %11236 = vst [vmem:[#allocation24_spill] sm:$0xff] %v10713_v51 }
 0x3f1   : > { %7863 = vmatmul.mubr.f32.gmra.mrb[6].mxu1 %v10692_v58  ;;  %v4062_v58 = vld [vmem:[#allocation8 + $0x1f0] sm:$0xff] }
 0x3f2   : > { %7865 = vmatprep.mubr.f32.mxu1 %v10695_v26  ;;  %8780 = vmatpush3.bf16.msra.mxu1 %v8777_v11  ;;  %v4063_v26 = vld [vmem:[#allocation8 + $0x1f8] sm:$0xff]  ;;  %v10710_v11 = vld [vmem:[#allocation2 + $0x9a] sm:$0xff] }
 0x3f3   : > { %8782 = vmatprep.subr.bf16.mxu1 %v8781_v15  ;;  %v8793_v25 = vpack.c.bf16 %v4063_v26, %v4062_v58  ;;  %v10722_v58 = vld [vmem:[#allocation2 + $0xca] sm:$0xff]  ;;  %v10725_v26 = vld [vmem:[#allocation2 + $0xda] sm:$0xff] }
 0x3f4   : > { %11239 = vst [vmem:[#allocation27_spill] sm:$0xff] %v10722_v58  ;;  %11240 = vst [vmem:[#allocation28_spill] sm:$0xff] %v10725_v26 }
 0x3f5   : > { %7866 = vmatmul.mubr.f32.gmra.mrb[8].mxu1 %v10698_v33  ;;  %v4353_v33 = vld [vmem:[#allocation8 + $0x200] sm:$0xff] }
 0x3f6   : > { %7868 = vmatprep.mubr.f32.mxu1 %v10701_v29  ;;  %8784 = vmatpush3.bf16.msra.mxu1 %v8781_v15  ;;  %v4354_v29 = vld [vmem:[#allocation8 + $0x208] sm:$0xff] }
 0x3f7   : > { %8786 = vmatprep.subr.bf16.mxu1 %v8785_v38  ;;  %v8797_v28 = vpack.c.bf16 %v4354_v29, %v4353_v33  ;;  %v10716_v15 = vld [vmem:[#allocation2 + $0xb2] sm:$0xff]  ;;  %v10734_v29 = vld [vmem:[#allocation2 + $0xfa] sm:$0xff] }
 0x3f8   : > { %11237 = vst [vmem:[#allocation25_spill] sm:$0xff] %v10716_v15  ;;  %v10731_v33 = vld [vmem:[#allocation2 + $0xf2] sm:$0xff]  ;;  %11243 = vst [vmem:[#allocation31_spill] sm:$0xff] %v10734_v29 }
 0x3f9   : > { %7869 = vmatmul.mubr.f32.gmra.mrb[10].mxu1 %v10704_v42  ;;  %11242 = vst [vmem:[#allocation30_spill] sm:$0xff] %v10731_v33 }
 0x3fa   : > { %7871 = vmatprep.mubr.f32.mxu1 %v10707_v41  ;;  %8788 = vmatpush3.bf16.msra.mxu1 %v8785_v38  ;;  %v10719_v38 = vld [vmem:[#allocation2 + $0xc2] sm:$0xff] }
 0x3fb   : > { %8790 = vmatprep.subr.bf16.mxu1 %v8789_v13  ;;  %11238 = vst [vmem:[#allocation26_spill] sm:$0xff] %v10719_v38 }
 0x3fd   : > { %7872 = vmatmul.mubr.f32.gmra.mrb[12].mxu1 %v10710_v11 }
 0x3fe   : > { %7874 = vmatprep.mubr.f32.mxu1 %v10713_v51  ;;  %8792 = vmatpush3.bf16.msra.mxu1 %v8789_v13  ;;  %v10728_v13 = vld [vmem:[#allocation2 + $0xe2] sm:$0xff]  ;;  %v4358_v51 = vld [vmem:[#allocation8 + $0x228] sm:$0xff] }
 0x3ff   : > { %8794 = vmatprep.subr.bf16.mxu1 %v8793_v25  ;;  %11241 = vst [vmem:[#allocation29_spill] sm:$0xff] %v10728_v13 }
 0x401   : > { %7875 = vmatmul.mubr.f32.gmra.mrb[14].mxu1 %v10716_v15  ;;  %v4357_v15 = vld [vmem:[#allocation8 + $0x220] sm:$0xff] }
 0x402   : > { %7877 = vmatprep.mubr.f32.mxu1 %v10719_v38  ;;  %8796 = vmatpush3.bf16.msra.mxu1 %v8793_v25  ;;  %v10737_v25 = vld [vmem:[#allocation2 + $0x10a] sm:$0xff]  ;;  %v4355_v38 = vld [vmem:[#allocation8 + $0x210] sm:$0xff] }
 0x403   : > { %8798 = vmatprep.subr.bf16.mxu1 %v8797_v28  ;;  %11244 = vst [vmem:[#allocation32_spill] sm:$0xff] %v10737_v25 }
 0x405   : > { %7878 = vmatmul.mubr.f32.gmra.mrb[16].mxu1 %v10722_v58  ;;  %v10740_v58 = vld [vmem:[#allocation2 + $0x112] sm:$0xff] }
 0x406   : > { %7880 = vmatprep.mubr.f32.mxu1 %v10725_v26  ;;  %11245 = vst [vmem:[#allocation33_spill] sm:$0xff] %v10740_v58  ;;  %v10743_v26 = vld [vmem:[#allocation2 + $0x122] sm:$0xff] }
 0x407   : > { %11246 = vst [vmem:[#allocation34_spill] sm:$0xff] %v10743_v26 }
 0x409   : > { %7881 = vmatmul.mubr.f32.gmra.mrb[18].mxu1 %v10728_v13  ;;  %v10746_v13 = vld [vmem:[#allocation2 + $0x12a] sm:$0xff] }
 0x40a   : > { %7883 = vmatprep.mubr.f32.mxu1 %v10731_v33  ;;  %11247 = vst [vmem:[#allocation35_spill] sm:$0xff] %v10746_v13  ;;  %v10749_v33 = vld [vmem:[#allocation2 + $0x13a] sm:$0xff] }
 0x40b   : > { %11248 = vst [vmem:[#allocation36_spill] sm:$0xff] %v10749_v33 }
 0x40d   : > { %7884 = vmatmul.mubr.f32.gmra.mrb[20].mxu1 %v10734_v29  ;;  %v10752_v29 = vld [vmem:[#allocation2 + $0x142] sm:$0xff] }
 0x40e   : > { %7886 = vmatprep.mubr.f32.mxu1 %v10737_v25  ;;  %11249 = vst [vmem:[#allocation37_spill] sm:$0xff] %v10752_v29  ;;  %v10755_v25 = vld [vmem:[#allocation2 + $0x152] sm:$0xff] }
 0x40f   : > { %11250 = vst [vmem:[#allocation38_spill] sm:$0xff] %v10755_v25 }
 0x411   : > { %7887 = vmatmul.mubr.f32.gmra.mrb[22].mxu1 %v10740_v58  ;;  %v10758_v58 = vld [vmem:[#allocation2 + $0x15a] sm:$0xff] }
 0x412   : > { %7889 = vmatprep.mubr.f32.mxu1 %v10743_v26  ;;  %11251 = vst [vmem:[#allocation39_spill] sm:$0xff] %v10758_v58  ;;  %v10761_v26 = vld [vmem:[#allocation2 + $0x16a] sm:$0xff] }
 0x413   : > { %11252 = vst [vmem:[#allocation40_spill] sm:$0xff] %v10761_v26 }
 0x415   : > { %7890 = vmatmul.mubr.f32.gmra.mrb[24].mxu1 %v10746_v13  ;;  %v10764_v13 = vld [vmem:[#allocation2 + $0x172] sm:$0xff] }
 0x416   : > { %7892 = vmatprep.mubr.f32.mxu1 %v10749_v33  ;;  %11253 = vst [vmem:[#allocation41_spill] sm:$0xff] %v10764_v13  ;;  %v4356_v33 = vld [vmem:[#allocation8 + $0x218] sm:$0xff] }
 0x419   : > { %7893 = vmatmul.mubr.f32.gmra.mrb[26].mxu1 %v10752_v29  ;;  %v8801_v29 = vpack.c.bf16 %v4356_v33, %v4355_v38  ;;  %v4362_v38 = vld [vmem:[#allocation8 + $0x248] sm:$0xff]  ;;  %v4365_v33 = vld [vmem:[#allocation8 + $0x260] sm:$0xff] }
 0x41a   : > { %7895 = vmatprep.mubr.f32.mxu1 %v10755_v25  ;;  %v4359_v25 = vld [vmem:[#allocation8 + $0x230] sm:$0xff] }
 0x41d   : > { %7896 = vmatmul.mubr.f32.gmra.mrb[28].mxu1 %v10758_v58  ;;  %v8805_v58 = vpack.c.bf16 %v4358_v51, %v4357_v15  ;;  %v4364_v51 = vld [vmem:[#allocation8 + $0x258] sm:$0xff] }
 0x41e   : > { %7898 = vmatprep.mubr.f32.mxu1 %v10761_v26  ;;  %v4360_v26 = vld [vmem:[#allocation8 + $0x238] sm:$0xff] }
 0x421   : > { %7899 = vmatmul.mubr.f32.gmra.mrb[30].mxu1 %v10764_v13  ;;  %v8809_v13 = vpack.c.bf16 %v4360_v26, %v4359_v25  ;;  %v4366_v26 = vld [vmem:[#allocation8 + $0x268] sm:$0xff]  ;;  %v4368_v25 = vld [vmem:[#allocation8 + $0x278] sm:$0xff] }
 0x422   : > { %7933 = vmatprep.mubr.f32.mxu1 %v10586_v10  ;;  %v4361_v10 = vld [vmem:[#allocation8 + $0x240] sm:$0xff] }
 0x425   : > { %7934 = vmatmul.mubr.f32.vlgmr.msra.gmra.mrb[0].mxu1 %v10590_v22  ;;  %v8813_v22 = vpack.c.bf16 %v4362_v38, %v4361_v10  ;;  %v4658_v10 = vld [vmem:[#allocation8 + $0x280] sm:$0xff]  ;;  %v4659_v38 = vld [vmem:[#allocation8 + $0x288] sm:$0xff] }
 0x426   : > { %7936 = vmatprep.mubr.f32.mxu1 %v10593_v55  ;;  %8800 = vmatpush3.bf16.msra.mxu1 %v8797_v28  ;;  %v4363_v28 = vld [vmem:[#allocation8 + $0x250] sm:$0xff] }
 0x427   : > { %8802 = vmatprep.subr.bf16.mxu1 %v8801_v29  ;;  %v8817_v15 = vpack.c.bf16 %v4364_v51, %v4363_v28  ;;  %v10797_v28 = vld [vmem:[#allocation2 + $0x180] sm:$0xff]  ;;  %v10800_v51 = vld [vmem:[#allocation2 + $0x188] sm:$0xff] }
 0x428   : > { %11254 = vst [vmem:[#allocation42_spill] sm:$0xff] %v10797_v28  ;;  %11255 = vst [vmem:[#allocation43_spill] sm:$0xff] %v10800_v51 }
 0x429   : > { %7937 = vmatmul.mubr.f32.gmra.mrb[2].mxu1 %v10596_v56 }
 0x42a   : > { %7939 = vmatprep.mubr.f32.mxu1 %v10599_v12  ;;  %8804 = vmatpush3.bf16.msra.mxu1 %v8801_v29  ;;  %v4367_v29 = vld [vmem:[#allocation8 + $0x270] sm:$0xff] }
 0x42b   : > { %8806 = vmatprep.subr.bf16.mxu1 %v8805_v58 }
 0x42d   : > { %7940 = vmatmul.mubr.f32.gmra.mrb[4].mxu1 %v10602_v6 }
 0x42e   : > { %7942 = vmatprep.mubr.f32.mxu1 %v10605_v45  ;;  %8808 = vmatpush3.bf16.msra.mxu1 %v8805_v58  ;;  %v8821_v58 = vpack.c.bf16 %v4366_v26, %v4365_v33  ;;  %v4661_v33 = vld [vmem:[#allocation8 + $0x298] sm:$0xff]  ;;  %v4321_v26 = vld [vmem:[#allocation2 + $0x19] sm:$0xff] }
 0x42f   : > { %8810 = vmatprep.subr.bf16.mxu1 %v8809_v13 }
 0x431   : > { %7943 = vmatmul.mubr.f32.gmra.mrb[6].mxu1 %v10608_v47 }
 0x432   : > { %7945 = vmatprep.mubr.f32.mxu1 %v10611_v57  ;;  %8812 = vmatpush3.bf16.msra.mxu1 %v8809_v13  ;;  %v8825_v13 = vpack.c.bf16 %v4368_v25, %v4367_v29  ;;  %v4322_v29 = vld [vmem:[#allocation2 + $0x21] sm:$0xff]  ;;  %v4662_v25 = vld [vmem:[#allocation8 + $0x2a0] sm:$0xff] }
 0x433   : > { %8814 = vmatprep.subr.bf16.mxu1 %v8813_v22 }
 0x435   : > { %7946 = vmatmul.mubr.f32.gmra.mrb[8].mxu1 %v10614_v14 }
 0x436   : > { %7948 = vmatprep.mubr.f32.mxu1 %v10617_v48  ;;  %8816 = vmatpush3.bf16.msra.mxu1 %v8813_v22  ;;  %v8829_v22 = vpack.c.bf16 %v4659_v38, %v4658_v10  ;;  %v10803_v10 = vld [vmem:[#allocation2 + $0x31] sm:$0xff] }
 0x437   : > { %8818 = vmatprep.subr.bf16.mxu1 %v8817_v15 }
 0x439   : > { %7949 = vmatmul.mubr.f32.gmra.mrb[10].mxu1 %v10620_v20 }
 0x43a   : > { %7951 = vmatprep.mubr.f32.mxu1 %v10623_v27  ;;  %8820 = vmatpush3.bf16.msra.mxu1 %v8817_v15  ;;  %v4660_v15 = vld [vmem:[#allocation8 + $0x290] sm:$0xff] }
 0x43b   : > { %8822 = vmatprep.subr.bf16.mxu1 %v8821_v58 }
 0x43d   : > { %7952 = vmatmul.mubr.f32.gmra.mrb[12].mxu1 %v10626_v30 }
 0x43e   : > { %7954 = vmatprep.mubr.f32.mxu1 %v10629_v35  ;;  %8824 = vmatpush3.bf16.msra.mxu1 %v8821_v58  ;;  %v8833_v58 = vpack.c.bf16 %v4661_v33, %v4660_v15  ;;  %v10812_v33 = vld [vmem:[#allocation2 + $0x51] sm:$0xff] }
 0x43f   : > { %8826 = vmatprep.subr.bf16.mxu1 %v8825_v13  ;;  %11258 = vst [vmem:[#allocation46_spill] sm:$0xff] %v10812_v33 }
 0x441   : > { %7955 = vmatmul.mubr.f32.gmra.mrb[14].mxu1 %v10632_v36 }
 0x442   : > { %7957 = vmatprep.mubr.f32.mxu1 %v10635_v59  ;;  %8828 = vmatpush3.bf16.msra.mxu1 %v8825_v13  ;;  %v4663_v13 = vld [vmem:[#allocation8 + $0x2a8] sm:$0xff] }
 0x443   : > { %8830 = vmatprep.subr.bf16.mxu1 %v8829_v22  ;;  %v8837_v38 = vpack.c.bf16 %v4663_v13, %v4662_v25  ;;  %v10818_v13 = vld [vmem:[#allocation2 + $0x69] sm:$0xff] }
 0x444   : > { %11260 = vst [vmem:[#allocation48_spill] sm:$0xff] %v10818_v13 }
 0x445   : > { %7958 = vmatmul.mubr.f32.gmra.mrb[16].mxu1 %v10638_v63 }
 0x446   : > { %7960 = vmatprep.mubr.f32.mxu1 %v10641_v1 }
 0x449   : > { %7961 = vmatmul.mubr.f32.gmra.mrb[18].mxu1 %v10644_v4 }
 0x44a   : > { %7963 = vmatprep.mubr.f32.mxu1 %v10647_v18 }
 0x44d   : > { %7964 = vmatmul.mubr.f32.gmra.mrb[20].mxu1 %v10650_v9 }
 0x44e   : > { %7966 = vmatprep.mubr.f32.mxu1 %v10653_v49 }
 0x451   : > { %7967 = vmatmul.mubr.f32.gmra.mrb[22].mxu1 %v10656_v40 }
 0x452   : > { %7969 = vmatprep.mubr.f32.mxu1 %v10659_v44 }
 0x455   : > { %7970 = vmatmul.mubr.f32.gmra.mrb[24].mxu1 %v10662_v61 }
 0x456   : > { %7972 = vmatprep.mubr.f32.mxu1 %v10665_v0 }
 0x459   : > { %7973 = vmatmul.mubr.f32.gmra.mrb[26].mxu1 %v10668_v2 }
 0x45a   : > { %7975 = vmatprep.mubr.f32.mxu1 %v10671_v3  ;;  %v4665_v3 = vld [vmem:[#allocation8 + $0x2b8] sm:$0xff] }
 0x45d   : > { %7976 = vmatmul.mubr.f32.gmra.mrb[28].mxu1 %v10674_v34  ;;  %v4664_v34 = vld [vmem:[#allocation8 + $0x2b0] sm:$0xff] }
 0x45e   : > { %7978 = vmatprep.mubr.f32.mxu1 %v10797_v28  ;;  %v10806_v28 = vld [vmem:[#allocation2 + $0x39] sm:$0xff]  ;;  %v8841_v15 = vpack.c.bf16 %v4665_v3, %v4664_v34 }
 0x45f   : > { %11256 = vst [vmem:[#allocation44_spill] sm:$0xff] %v10806_v28  ;;  %v10821_v3 = vld [vmem:[#allocation2 + $0x79] sm:$0xff] }
 0x461   : > { %7979 = vmatmul.mubr.f32.gmra.mrb[30].mxu1 %v10800_v51  ;;  %v10809_v51 = vld [vmem:[#allocation2 + $0x49] sm:$0xff] }
 0x462   : > { %8013 = vmatprep.mubr.f32.mxu1 %v4321_v26  ;;  %11257 = vst [vmem:[#allocation45_spill] sm:$0xff] %v10809_v51  ;;  %v4666_v26 = vld [vmem:[#allocation8 + $0x2c0] sm:$0xff] }
 0x465   : > { %8014 = vmatmul.mubr.f32.vlgmr.msra.gmra.mrb[0].mxu1 %v4322_v29  ;;  %v4667_v29 = vld [vmem:[#allocation8 + $0x2c8] sm:$0xff] }
 0x466   : > { %8016 = vmatprep.mubr.f32.mxu1 %v10803_v10  ;;  %8832 = vmatpush3.bf16.msra.mxu1 %v8829_v22  ;;  %v10815_v22 = vld [vmem:[#allocation2 + $0x61] sm:$0xff]  ;;  %v8845_v25 = vpack.c.bf16 %v4667_v29, %v4666_v26  ;;  %v10828_v26 = vld [vmem:[#allocation2 + $0x99] sm:$0xff] }
 0x467   : > { %8834 = vmatprep.subr.bf16.mxu1 %v8833_v58  ;;  %11259 = vst [vmem:[#allocation47_spill] sm:$0xff] %v10815_v22  ;;  %v4672_v29 = vld [vmem:[#allocation8 + $0x2f0] sm:$0xff] }
 0x469   : > { %8017 = vmatmul.mubr.f32.gmra.mrb[2].mxu1 %v10806_v28  ;;  %v4668_v28 = vld [vmem:[#allocation8 + $0x2d0] sm:$0xff] }
 0x46a   : > { %8019 = vmatprep.mubr.f32.mxu1 %v10809_v51  ;;  %8836 = vmatpush3.bf16.msra.mxu1 %v8833_v58  ;;  %v4669_v51 = vld [vmem:[#allocation8 + $0x2d8] sm:$0xff] }
 0x46b   : > { %8838 = vmatprep.subr.bf16.mxu1 %v8837_v38  ;;  %v8849_v34 = vpack.c.bf16 %v4669_v51, %v4668_v28  ;;  %v10824_v58 = vld [vmem:[#allocation2 + $0x81] sm:$0xff]  ;;  %v4963_v51 = vld [vmem:[#allocation8 + $0x300] sm:$0xff] }
 0x46d   : > { %8020 = vmatmul.mubr.f32.gmra.mrb[4].mxu1 %v10812_v33  ;;  %v4670_v33 = vld [vmem:[#allocation8 + $0x2e0] sm:$0xff] }
 0x46e   : > { %8022 = vmatprep.mubr.f32.mxu1 %v10815_v22  ;;  %8840 = vmatpush3.bf16.msra.mxu1 %v8837_v38  ;;  %v4671_v22 = vld [vmem:[#allocation8 + $0x2e8] sm:$0xff] }
 0x46f   : > { %8842 = vmatprep.subr.bf16.mxu1 %v8841_v15  ;;  %v8853_v38 = vpack.c.bf16 %v4671_v22, %v4670_v33  ;;  %v4973_v22 = vld [vmem:[#allocation8 + $0x350] sm:$0xff] }
 0x471   : > { %8023 = vmatmul.mubr.f32.gmra.mrb[6].mxu1 %v10818_v13  ;;  %v4673_v13 = vld [vmem:[#allocation8 + $0x2f8] sm:$0xff] }
 0x472   : > { %8025 = vmatprep.mubr.f32.mxu1 %v10821_v3  ;;  %8844 = vmatpush3.bf16.msra.mxu1 %v8841_v15  ;;  %v8857_v28 = vpack.c.bf16 %v4673_v13, %v4672_v29  ;;  %v4964_v15 = vld [vmem:[#allocation8 + $0x308] sm:$0xff]  ;;  %v4975_v29 = vld [vmem:[#allocation8 + $0x360] sm:$0xff] }
 0x473   : > { %8846 = vmatprep.subr.bf16.mxu1 %v8845_v25  ;;  %v11270_v13 = vld [vmem:[#allocation22_spill] sm:$0xff] }
 0x475   : > { %8026 = vmatmul.mubr.f32.gmra.mrb[8].mxu1 %v10824_v58 }
 0x476   : > { %8028 = vmatprep.mubr.f32.mxu1 %v10479_v24  ;;  %8848 = vmatpush3.bf16.msra.mxu1 %v8845_v25  ;;  %v8861_v24 = vpack.c.bf16 %v4964_v15, %v4963_v51  ;;  %v4974_v25 = vld [vmem:[#allocation8 + $0x358] sm:$0xff]  ;;  %v4977_v15 = vld [vmem:[#allocation8 + $0x370] sm:$0xff] }
 0x477   : > { %8850 = vmatprep.subr.bf16.mxu1 %v8849_v34 }
 0x479   : > { %8029 = vmatmul.mubr.f32.gmra.mrb[10].mxu1 %v10828_v26 }
 0x47a   : > { %8031 = vmatprep.mubr.f32.mxu1 %v10487_v50  ;;  %8852 = vmatpush3.bf16.msra.mxu1 %v8849_v34  ;;  %v4965_v50 = vld [vmem:[#allocation8 + $0x310] sm:$0xff] }
 0x47b   : > { %8854 = vmatprep.subr.bf16.mxu1 %v8853_v38  ;;  %v11271_v34 = vld [vmem:[#allocation23_spill] sm:$0xff] }
 0x47d   : > { %8032 = vmatmul.mubr.f32.gmra.mrb[12].mxu1 %v10485_v5  ;;  %v11261_v5 = vmax.f32 %v10575_v37, 0.0  ;;  %v11268_v37 = vld [vmem:[#allocation20_spill] sm:$0xff] }
 0x47e   : > { %8034 = vmatprep.mubr.f32.mxu1 %v10497_v54  ;;  %8856 = vmatpush3.bf16.msra.mxu1 %v8853_v38  ;;  %v11262_v54 = vld [vmem:[#allocation13_spill] sm:$0xff]  ;;  %v8881_v38 = vpack.c.bf16 %v4974_v25, %v4973_v22  ;;  %v5270_v22 = vld [vmem:[#allocation8 + $0x390] sm:$0xff]  ;;  %v5271_v25 = vld [vmem:[#allocation8 + $0x398] sm:$0xff] }
 0x47f   : > { %8858 = vmatprep.subr.bf16.mxu1 %v8857_v28 }
 0x481   : > { %8035 = vmatmul.mubr.f32.gmra.mrb[14].mxu1 %v10494_v23  ;;  %v4966_v23 = vld [vmem:[#allocation8 + $0x318] sm:$0xff] }
 0x482   : > { %8037 = vmatprep.mubr.f32.mxu1 %v10507_v62  ;;  %8860 = vmatpush3.bf16.msra.mxu1 %v8857_v28  ;;  %v8865_v62 = vpack.c.bf16 %v4966_v23, %v4965_v50  ;;  %v4976_v28 = vld [vmem:[#allocation8 + $0x368] sm:$0xff]  ;;  %v5268_v23 = vld [vmem:[#allocation8 + $0x380] sm:$0xff] }
 0x483   : > { %8862 = vmatprep.subr.bf16.mxu1 %v8861_v24  ;;  %v8885_v51 = vpack.c.bf16 %v4976_v28, %v4975_v29  ;;  %v5274_v28 = vld [vmem:[#allocation8 + $0x3b0] sm:$0xff] }
 0x485   : > { %8038 = vmatmul.mubr.f32.gmra.mrb[16].mxu1 %v10504_v60  ;;  %v11263_v60 = vmax.f32 %v11262_v54, 0.0  ;;  %v5269_v54 = vld [vmem:[#allocation8 + $0x388] sm:$0xff] }
 0x486   : > { %8040 = vmatprep.mubr.f32.mxu1 %v10517_v8  ;;  %v4968_v8 = vld [vmem:[#allocation8 + $0x328] sm:$0xff] }
 0x489   : > { %8041 = vmatmul.mubr.f32.gmra.mrb[18].mxu1 %v10514_v7  ;;  %v4967_v7 = vld [vmem:[#allocation8 + $0x320] sm:$0xff] }
 0x48a   : > { %8043 = vmatprep.mubr.f32.mxu1 %v10527_v43  ;;  %v11265_v43 = vld [vmem:[#allocation17_spill] sm:$0xff] }
 0x48d   : > { %8044 = vmatmul.mubr.f32.gmra.mrb[20].mxu1 %v10524_v52  ;;  %v11264_v52 = vld [vmem:[#allocation16_spill] sm:$0xff] }
 0x48e   : > { %8046 = vmatprep.mubr.f32.mxu1 %v10537_v46  ;;  %v4969_v46 = vld [vmem:[#allocation8 + $0x330] sm:$0xff] }
 0x491   : > { %8047 = vmatmul.mubr.f32.gmra.mrb[22].mxu1 %v10534_v53  ;;  %v8869_v53 = vpack.c.bf16 %v4968_v8, %v4967_v7  ;;  %v11276_v7 = vld [vmem:[#allocation28_spill] sm:$0xff]  ;;  %v11278_v8 = vld [vmem:[#allocation30_spill] sm:$0xff] }
 0x492   : > { %8049 = vmatprep.mubr.f32.mxu1 %v10547_v17  ;;  %v11266_v17 = vld [vmem:[#allocation18_spill] sm:$0xff] }
 0x495   : > { %8050 = vmatmul.mubr.f32.gmra.mrb[24].mxu1 %v10544_v16  ;;  %v4970_v16 = vld [vmem:[#allocation8 + $0x338] sm:$0xff] }
 0x496   : > { %8052 = vmatprep.mubr.f32.mxu1 %v10557_v39  ;;  %v8873_v39 = vpack.c.bf16 %v4970_v16, %v4969_v46  ;;  %v11282_v46 = vld [vmem:[#allocation34_spill] sm:$0xff]  ;;  %v11283_v16 = vld [vmem:[#allocation35_spill] sm:$0xff] }
 0x499   : > { %8053 = vmatmul.mubr.f32.gmra.mrb[26].mxu1 %v10554_v21  ;;  %v11267_v21 = vld [vmem:[#allocation19_spill] sm:$0xff] }
 0x49a   : > { %8055 = vmatprep.mubr.f32.mxu1 %v10567_v32  ;;  %v4972_v32 = vld [vmem:[#allocation8 + $0x348] sm:$0xff] }
 0x49d   : > { %8056 = vmatmul.mubr.f32.gmra.mrb[28].mxu1 %v10564_v31  ;;  %v4971_v31 = vld [vmem:[#allocation8 + $0x340] sm:$0xff] }
 0x49e   : > { %8058 = vmatprep.mubr.f32.mxu1 %v11261_v5  ;;  %v8877_v33 = vpack.c.bf16 %v4972_v32, %v4971_v31  ;;  %v11272_v5 = vld [vmem:[#allocation24_spill] sm:$0xff]  ;;  %v11287_v31 = vld [vmem:[#allocation39_spill] sm:$0xff] }
 0x49f   : > { %v11288_v32 = vld [vmem:[#allocation40_spill] sm:$0xff] }
 0x4a1   : > { %8059 = vmatmul.mubr.f32.gmra.mrb[30].mxu1 %v11263_v60  ;;  %v11273_v60 = vld [vmem:[#allocation25_spill] sm:$0xff] }
 0x4a2   : > { %8093 = vmatprep.mubr.f32.mxu1 %v10677_v19  ;;  %v11269_v19 = vld [vmem:[#allocation21_spill] sm:$0xff] }
 0x4a5   : > { %8094 = vmatmul.mubr.f32.vlgmr.msra.gmra.mrb[0].mxu1 %v11264_v52  ;;  %v11279_v52 = vld [vmem:[#allocation31_spill] sm:$0xff] }
 0x4a6   : > { %8096 = vmatprep.mubr.f32.mxu1 %v11265_v43  ;;  %8864 = vmatpush3.bf16.msra.mxu1 %v8861_v24  ;;  %v4978_v24 = vld [vmem:[#allocation8 + $0x378] sm:$0xff] }
 0x4a7   : > { %8866 = vmatprep.subr.bf16.mxu1 %v8865_v62  ;;  %v8889_v50 = vpack.c.bf16 %v4978_v24, %v4977_v15  ;;  %v11280_v43 = vld [vmem:[#allocation32_spill] sm:$0xff]  ;;  %v5277_v24 = vld [vmem:[#allocation8 + $0x3c8] sm:$0xff] }
 0x4a9   : > { %8097 = vmatmul.mubr.f32.gmra.mrb[2].mxu1 %v11266_v17  ;;  %v11284_v17 = vld [vmem:[#allocation36_spill] sm:$0xff] }
 0x4aa   : > { %8099 = vmatprep.mubr.f32.mxu1 %v11267_v21  ;;  %8868 = vmatpush3.bf16.msra.mxu1 %v8865_v62  ;;  %v11274_v62 = vld [vmem:[#allocation26_spill] sm:$0xff]  ;;  %v11285_v21 = vld [vmem:[#allocation37_spill] sm:$0xff] }
 0x4ab   : > { %8870 = vmatprep.subr.bf16.mxu1 %v8869_v53 }
 0x4ad   : > { %8100 = vmatmul.mubr.f32.gmra.mrb[4].mxu1 %v11268_v37  ;;  %v11289_v37 = vld [vmem:[#allocation41_spill] sm:$0xff] }
 0x4ae   : > { %8102 = vmatprep.mubr.f32.mxu1 %v11269_v19  ;;  %8872 = vmatpush3.bf16.msra.mxu1 %v8869_v53  ;;  %v11281_v53 = vld [vmem:[#allocation33_spill] sm:$0xff]  ;;  %v10883_v19 = vld [vmem:[#allocation2 + $0x182] sm:$0xff] }
 0x4af   : > { %8874 = vmatprep.subr.bf16.mxu1 %v8873_v39 }
 0x4b1   : > { %8103 = vmatmul.mubr.f32.gmra.mrb[6].mxu1 %v11270_v13  ;;  %v8897_v13 = vpack.c.bf16 %v5271_v25, %v5270_v22  ;;  %v5250_v22 = vld [vmem:[#allocation2 + $0xd9] sm:$0xff]  ;;  %v5252_v25 = vld [vmem:[#allocation2 + $0xf1] sm:$0xff] }
 0x4b2   : > { %8105 = vmatprep.mubr.f32.mxu1 %v11271_v34  ;;  %8876 = vmatpush3.bf16.msra.mxu1 %v8873_v39  ;;  %v11286_v39 = vld [vmem:[#allocation38_spill] sm:$0xff]  ;;  %v5272_v34 = vld [vmem:[#allocation8 + $0x3a0] sm:$0xff] }
 0x4b3   : > { %8878 = vmatprep.subr.bf16.mxu1 %v8877_v33 }
 0x4b5   : > { %8106 = vmatmul.mubr.f32.gmra.mrb[8].mxu1 %v10704_v42  ;;  %v8893_v42 = vpack.c.bf16 %v5269_v54, %v5268_v23  ;;  %v5283_v23 = vld [vmem:[#allocation8 + $0x3f8] sm:$0xff]  ;;  %v5574_v54 = vld [vmem:[#allocation8 + $0x408] sm:$0xff] }
 0x4b6   : > { %8108 = vmatprep.mubr.f32.mxu1 %v10707_v41  ;;  %8880 = vmatpush3.bf16.msra.mxu1 %v8877_v33  ;;  %v11275_v41 = vld [vmem:[#allocation27_spill] sm:$0xff]  ;;  %v10886_v33 = vld [vmem:[#allocation2 + $0x18a] sm:$0xff] }
 0x4b7   : > { %8882 = vmatprep.subr.bf16.mxu1 %v8881_v38 }
 0x4b9   : > { %8109 = vmatmul.mubr.f32.gmra.mrb[10].mxu1 %v10710_v11  ;;  %v11277_v11 = vld [vmem:[#allocation29_spill] sm:$0xff] }
 0x4ba   : > { %8111 = vmatprep.mubr.f32.mxu1 %v11272_v5  ;;  %8884 = vmatpush3.bf16.msra.mxu1 %v8881_v38  ;;  %v5273_v38 = vld [vmem:[#allocation8 + $0x3a8] sm:$0xff]  ;;  %v5279_v5 = vld [vmem:[#allocation8 + $0x3d8] sm:$0xff] }
 0x4bb   : > { %8886 = vmatprep.subr.bf16.mxu1 %v8885_v51  ;;  %v8901_v29 = vpack.c.bf16 %v5273_v38, %v5272_v34  ;;  %v5254_v34 = vld [vmem:[#allocation2 + $0x109] sm:$0xff]  ;;  %v5255_v38 = vld [vmem:[#allocation2 + $0x111] sm:$0xff] }
 0x4bd   : > { %8112 = vmatmul.mubr.f32.gmra.mrb[12].mxu1 %v11273_v60  ;;  %v11296_v60 = vld [vmem:[#allocation46_spill] sm:$0xff] }
 0x4be   : > { %8114 = vmatprep.mubr.f32.mxu1 %v11274_v62  ;;  %8888 = vmatpush3.bf16.msra.mxu1 %v8885_v51  ;;  %v5275_v51 = vld [vmem:[#allocation8 + $0x3b8] sm:$0xff]  ;;  %v11297_v62 = vld [vmem:[#allocation47_spill] sm:$0xff] }
 0x4bf   : > { %8890 = vmatprep.subr.bf16.mxu1 %v8889_v50  ;;  %v8905_v15 = vpack.c.bf16 %v5275_v51, %v5274_v28  ;;  %v5257_v28 = vld [vmem:[#allocation2 + $0x129] sm:$0xff]  ;;  %v5258_v51 = vld [vmem:[#allocation2 + $0x139] sm:$0xff] }
 0x4c1   : > { %8115 = vmatmul.mubr.f32.gmra.mrb[14].mxu1 %v11275_v41  ;;  %v5582_v41 = vld [vmem:[#allocation8 + $0x448] sm:$0xff] }
 0x4c2   : > { %8117 = vmatprep.mubr.f32.mxu1 %v11276_v7  ;;  %8892 = vmatpush3.bf16.msra.mxu1 %v8889_v50  ;;  %v5281_v50 = vld [vmem:[#allocation8 + $0x3e8] sm:$0xff]  ;;  %v11298_v7 = vld [vmem:[#allocation48_spill] sm:$0xff] }
 0x4c3   : > { %8894 = vmatprep.subr.bf16.mxu1 %v8893_v42 }
 0x4c5   : > { %8118 = vmatmul.mubr.f32.gmra.mrb[16].mxu1 %v11277_v11 }
 0x4c6   : > { %8120 = vmatprep.mubr.f32.mxu1 %v11278_v8  ;;  %v5583_v8 = vld [vmem:[#allocation8 + $0x450] sm:$0xff] }
 0x4c9   : > { %8121 = vmatmul.mubr.f32.gmra.mrb[18].mxu1 %v11279_v52  ;;  %v5584_v52 = vld [vmem:[#allocation8 + $0x458] sm:$0xff] }
 0x4ca   : > { %8123 = vmatprep.mubr.f32.mxu1 %v11280_v43  ;;  %v5244_v43 = vld [vmem:[#allocation2 + $0x91] sm:$0xff] }
 0x4cd   : > { %8124 = vmatmul.mubr.f32.gmra.mrb[20].mxu1 %v11281_v53  ;;  %v8945_v53 = vpack.c.bf16 %v5584_v52, %v5583_v8  ;;  %v10933_v8 = vld [vmem:[%s11058_s4] ss:$0 sm:$0xff] }
 0x4ce   : > { %8126 = vmatprep.mubr.f32.mxu1 %v11282_v46  ;;  %v5585_v46 = vld [vmem:[#allocation8 + $0x460] sm:$0xff] }
 0x4d1   : > { %8127 = vmatmul.mubr.f32.gmra.mrb[22].mxu1 %v11283_v16  ;;  %v5586_v16 = vld [vmem:[#allocation8 + $0x468] sm:$0xff] }
 0x4d2   : > { %8129 = vmatprep.mubr.f32.mxu1 %v11284_v17  ;;  %v5246_v17 = vld [vmem:[#allocation2 + $0xa9] sm:$0xff] }
 0x4d5   : > { %8130 = vmatmul.mubr.f32.gmra.mrb[24].mxu1 %v11285_v21  ;;  %v5247_v21 = vld [vmem:[#allocation2 + $0xb1] sm:$0xff] }
 0x4d6   : > { %8132 = vmatprep.mubr.f32.mxu1 %v11286_v39  ;;  %v5587_v39 = vld [vmem:[#allocation8 + $0x470] sm:$0xff] }
 0x4d9   : > { %8133 = vmatmul.mubr.f32.gmra.mrb[26].mxu1 %v11287_v31  ;;  %v5588_v31 = vld [vmem:[#allocation8 + $0x478] sm:$0xff] }
 0x4da   : > { %8135 = vmatprep.mubr.f32.mxu1 %v11288_v32  ;;  %v5248_v32 = vld [vmem:[#allocation2 + $0xc1] sm:$0xff] }
 0x4dd   : > { %8136 = vmatmul.mubr.f32.gmra.mrb[28].mxu1 %v11289_v37  ;;  %v5249_v37 = vld [vmem:[#allocation2 + $0xc9] sm:$0xff] }
 0x4de   : > { %8138 = vmatprep.mubr.f32.mxu1 %v10883_v19 }
 0x4e1   : > { %8139 = vmatmul.mubr.f32.gmra.mrb[30].mxu1 %v10886_v33 }
 0x4e2   : > { %8173 = vmatprep.mubr.f32.mxu1 %v10593_v55  ;;  %v5276_v55 = vld [vmem:[#allocation8 + $0x3c0] sm:$0xff] }
 0x4e5   : > { %8174 = vmatmul.mubr.f32.vlgmr.msra.gmra.mrb[0].mxu1 %v10596_v56  ;;  %v8909_v56 = vpack.c.bf16 %v5277_v24, %v5276_v55  ;;  %v5260_v55 = vld [vmem:[#allocation2 + $0x151] sm:$0xff]  ;;  %v5261_v24 = vld [vmem:[#allocation2 + $0x159] sm:$0xff] }
 0x4e6   : > { %8176 = vmatprep.mubr.f32.mxu1 %v10599_v12  ;;  %8896 = vmatpush3.bf16.msra.mxu1 %v8893_v42  ;;  %v5278_v12 = vld [vmem:[#allocation8 + $0x3d0] sm:$0xff] }
 0x4e7   : > { %8898 = vmatprep.subr.bf16.mxu1 %v8897_v13 }
 0x4e9   : > { %8177 = vmatmul.mubr.f32.gmra.mrb[2].mxu1 %v10602_v6  ;;  %v8913_v6 = vpack.c.bf16 %v5279_v5, %v5278_v12  ;;  %v5263_v12 = vld [vmem:[#allocation2 + $0x171] sm:$0xff]  ;;  %v5264_v5 = vld [vmem:[#allocation2 + $0x181] sm:$0xff] }
 0x4ea   : > { %8179 = vmatprep.mubr.f32.mxu1 %v10605_v45  ;;  %8900 = vmatpush3.bf16.msra.mxu1 %v8897_v13  ;;  %v5280_v45 = vld [vmem:[#allocation8 + $0x3e0] sm:$0xff]  ;;  %v5253_v13 = vld [vmem:[#allocation2 + $0xf9] sm:$0xff] }
 0x4eb   : > { %8902 = vmatprep.subr.bf16.mxu1 %v8901_v29 }
 0x4ed   : > { %8180 = vmatmul.mubr.f32.gmra.mrb[4].mxu1 %v10608_v47  ;;  %v8917_v47 = vpack.c.bf16 %v5281_v50, %v5280_v45  ;;  %v5265_v45 = vld [vmem:[#allocation2 + $0x189] sm:$0xff]  ;;  %v5267_v50 = vld [vmem:[#allocation2 + $0x1a1] sm:$0xff] }
 0x4ee   : > { %8182 = vmatprep.mubr.f32.mxu1 %v10611_v57  ;;  %8904 = vmatpush3.bf16.msra.mxu1 %v8901_v29  ;;  %v5282_v57 = vld [vmem:[#allocation8 + $0x3f0] sm:$0xff] }
 0x4ef   : > { %8906 = vmatprep.subr.bf16.mxu1 %v8905_v15  ;;  %v5256_v29 = vld [vmem:[#allocation2 + $0x121] sm:$0xff] }
 0x4f1   : > { %8183 = vmatmul.mubr.f32.gmra.mrb[6].mxu1 %v10614_v14  ;;  %v8921_v14 = vpack.c.bf16 %v5283_v23, %v5282_v57  ;;  %v5542_v57 = vld [vmem:[#allocation2 + $0x3a] sm:$0xff]  ;;  %v5543_v23 = vld [vmem:[#allocation2 + $0x4a] sm:$0xff] }
 0x4f2   : > { %8185 = vmatprep.mubr.f32.mxu1 %v10617_v48  ;;  %8908 = vmatpush3.bf16.msra.mxu1 %v8905_v15  ;;  %v5573_v48 = vld [vmem:[#allocation8 + $0x400] sm:$0xff]  ;;  %v5259_v15 = vld [vmem:[#allocation2 + $0x141] sm:$0xff] }
 0x4f3   : > { %8910 = vmatprep.subr.bf16.mxu1 %v8909_v56 }
 0x4f5   : > { %8186 = vmatmul.mubr.f32.gmra.mrb[8].mxu1 %v10620_v20  ;;  %v8925_v20 = vpack.c.bf16 %v5574_v54, %v5573_v48  ;;  %v5545_v48 = vld [vmem:[#allocation2 + $0x62] sm:$0xff]  ;;  %v5546_v54 = vld [vmem:[#allocation2 + $0x6a] sm:$0xff] }
 0x4f6   : > { %8188 = vmatprep.mubr.f32.mxu1 %v10623_v27  ;;  %8912 = vmatpush3.bf16.msra.mxu1 %v8909_v56  ;;  %v11290_v27 = vld [vmem:[#allocation14_spill] sm:$0xff]  ;;  %v5262_v56 = vld [vmem:[#allocation2 + $0x169] sm:$0xff] }
 0x4f7   : > { %8914 = vmatprep.subr.bf16.mxu1 %v8913_v6 }
 0x4f9   : > { %8189 = vmatmul.mubr.f32.gmra.mrb[10].mxu1 %v10626_v30  ;;  %v11291_v30 = vld [vmem:[#allocation15_spill] sm:$0xff] }
 0x4fa   : > { %8191 = vmatprep.mubr.f32.mxu1 %v10629_v35  ;;  %8916 = vmatpush3.bf16.msra.mxu1 %v8913_v6  ;;  %v11292_v35 = vld [vmem:[#allocation42_spill] sm:$0xff] }
 0x4fb   : > { %8918 = vmatprep.subr.bf16.mxu1 %v8917_v47  ;;  %v5266_v6 = vld [vmem:[#allocation2 + $0x199] sm:$0xff] }
 0x4fd   : > { %8192 = vmatmul.mubr.f32.gmra.mrb[12].mxu1 %v10632_v36  ;;  %v4961_v36 = vld [vmem:[#allocation2 + $0x198] sm:$0xff] }
 0x4fe   : > { %8194 = vmatprep.mubr.f32.mxu1 %v10635_v59  ;;  %8920 = vmatpush3.bf16.msra.mxu1 %v8917_v47  ;;  %v11293_v59 = vld [vmem:[#allocation43_spill] sm:$0xff]  ;;  %v5541_v47 = vld [vmem:[#allocation2 + $0x32] sm:$0xff] }
 0x4ff   : > { %8922 = vmatprep.subr.bf16.mxu1 %v8921_v14 }
 0x501   : > { %8195 = vmatmul.mubr.f32.gmra.mrb[14].mxu1 %v10638_v63  ;;  %v5575_v63 = vld [vmem:[#allocation8 + $0x410] sm:$0xff] }
 0x502   : > { %8197 = vmatprep.mubr.f32.mxu1 %v10641_v1  ;;  %8924 = vmatpush3.bf16.msra.mxu1 %v8921_v14  ;;  %v5576_v1 = vld [vmem:[#allocation8 + $0x418] sm:$0xff]  ;;  %v5544_v14 = vld [vmem:[#allocation2 + $0x52] sm:$0xff] }
 0x503   : > { %8926 = vmatprep.subr.bf16.mxu1 %v8925_v20 }
 0x505   : > { %8198 = vmatmul.mubr.f32.gmra.mrb[16].mxu1 %v10644_v4  ;;  %v9544_v4 = vld [vmem:[#allocation2 + $0x8] sm:$0xff] }
 0x506   : > { %8200 = vmatprep.mubr.f32.mxu1 %v10647_v18  ;;  %v8929_v18 = vpack.c.bf16 %v5576_v1, %v5575_v63  ;;  %v5553_v63 = vld [vmem:[#allocation2 + $0xc2] sm:$0xff]  ;;  %v5554_v1 = vld [vmem:[#allocation2 + $0xca] sm:$0xff] }
 0x509   : > { %8201 = vmatmul.mubr.f32.gmra.mrb[18].mxu1 %v10650_v9  ;;  %v5577_v9 = vld [vmem:[#allocation8 + $0x420] sm:$0xff] }
 0x50a   : > { %8203 = vmatprep.mubr.f32.mxu1 %v10653_v49  ;;  %v5578_v49 = vld [vmem:[#allocation8 + $0x428] sm:$0xff] }
 0x50d   : > { %8204 = vmatmul.mubr.f32.gmra.mrb[20].mxu1 %v10656_v40  ;;  %v11294_v40 = vld [vmem:[#allocation44_spill] sm:$0xff] }
 0x50e   : > { %8206 = vmatprep.mubr.f32.mxu1 %v10659_v44  ;;  %v11295_v44 = vld [vmem:[#allocation45_spill] sm:$0xff] }
 0x511   : > { %8207 = vmatmul.mubr.f32.gmra.mrb[22].mxu1 %v10662_v61  ;;  %v8933_v61 = vpack.c.bf16 %v5578_v49, %v5577_v9  ;;  %v5557_v9 = vld [vmem:[#allocation2 + $0xf2] sm:$0xff]  ;;  %v5558_v49 = vld [vmem:[#allocation2 + $0xfa] sm:$0xff] }
 0x512   : > { %8209 = vmatprep.mubr.f32.mxu1 %v10665_v0  ;;  %v5579_v0 = vld [vmem:[#allocation8 + $0x430] sm:$0xff] }
 0x515   : > { %8210 = vmatmul.mubr.f32.gmra.mrb[24].mxu1 %v10668_v2  ;;  %v5580_v2 = vld [vmem:[#allocation8 + $0x438] sm:$0xff] }
 0x516   : > { %8212 = vmatprep.mubr.f32.mxu1 %v11290_v27  ;;  %v8937_v42 = vpack.c.bf16 %v5580_v2, %v5579_v0  ;;  %v5548_v27 = vld [vmem:[#allocation2 + $0x82] sm:$0xff]  ;;  %v5562_v0 = vld [vmem:[#allocation2 + $0x12a] sm:$0xff]  ;;  %v5563_v2 = vld [vmem:[#allocation2 + $0x13a] sm:$0xff] }
 0x519   : > { %8213 = vmatmul.mubr.f32.gmra.mrb[26].mxu1 %v11291_v30  ;;  %v5549_v30 = vld [vmem:[#allocation2 + $0x92] sm:$0xff] }
 0x51a   : > { %8215 = vmatprep.mubr.f32.mxu1 %v11292_v35  ;;  %v5550_v35 = vld [vmem:[#allocation2 + $0x9a] sm:$0xff] }
 0x51d   : > { %8216 = vmatmul.mubr.f32.gmra.mrb[28].mxu1 %v11293_v59  ;;  %v5552_v59 = vld [vmem:[#allocation2 + $0xb2] sm:$0xff] }
 0x51e   : > { %8218 = vmatprep.mubr.f32.mxu1 %v4961_v36  ;;  %v5551_v36 = vld [vmem:[#allocation2 + $0xaa] sm:$0xff] }
 0x521   : > { %8219 = vmatmul.mubr.f32.gmra.mrb[30].mxu1 %v9544_v4  ;;  %v5555_v4 = vld [vmem:[#allocation2 + $0xda] sm:$0xff] }
 0x522   : > { %8253 = vmatprep.mubr.f32.mxu1 %v10803_v10  ;;  %v5581_v10 = vld [vmem:[#allocation8 + $0x440] sm:$0xff] }
 0x523   : > { %v8941_v11 = vpack.c.bf16 %v5582_v41, %v5581_v10  ;;  %v5567_v10 = vld [vmem:[#allocation2 + $0x16a] sm:$0xff]  ;;  %v5568_v41 = vld [vmem:[#allocation2 + $0x172] sm:$0xff] }
 0x525   : > { %8254 = vmatmul.mubr.f32.vlgmr.msra.gmra.mrb[0].mxu1 %v11294_v40  ;;  %v5559_v40 = vld [vmem:[#allocation2 + $0x10a] sm:$0xff] }
 0x526   : > { %8256 = vmatprep.mubr.f32.mxu1 %v11295_v44  ;;  %8928 = vmatpush3.bf16.msra.mxu1 %v8925_v20  ;;  %v5547_v20 = vld [vmem:[#allocation2 + $0x7a] sm:$0xff]  ;;  %v5560_v44 = vld [vmem:[#allocation2 + $0x112] sm:$0xff] }
 0x527   : > { %8930 = vmatprep.subr.bf16.mxu1 %v8929_v18 }
 0x529   : > { %8257 = vmatmul.mubr.f32.gmra.mrb[2].mxu1 %v11296_v60  ;;  %v5564_v60 = vld [vmem:[#allocation2 + $0x142] sm:$0xff] }
 0x52a   : > { %8259 = vmatprep.mubr.f32.mxu1 %v11297_v62  ;;  %8932 = vmatpush3.bf16.msra.mxu1 %v8929_v18  ;;  %v5556_v18 = vld [vmem:[#allocation2 + $0xe2] sm:$0xff]  ;;  %v5565_v62 = vld [vmem:[#allocation2 + $0x152] sm:$0xff] }
 0x52b   : > { %8934 = vmatprep.subr.bf16.mxu1 %v8933_v61 }
 0x52d   : > { %8260 = vmatmul.mubr.f32.gmra.mrb[4].mxu1 %v11298_v7  ;;  %v5571_v7 = vld [vmem:[#allocation2 + $0x19a] sm:$0xff] }
 0x52e   : > { %8262 = vmatprep.mubr.f32.mxu1 %v10821_v3  ;;  %8936 = vmatpush3.bf16.msra.mxu1 %v8933_v61  ;;  %v8949_v3 = vpack.c.bf16 %v5586_v16, %v5585_v46  ;;  %v5561_v61 = vld [vmem:[#allocation2 + $0x122] sm:$0xff] }
 0x52f   : > { %8938 = vmatprep.subr.bf16.mxu1 %v8937_v42 }
 0x531   : > { %8263 = vmatmul.mubr.f32.gmra.mrb[6].mxu1 %v10824_v58  ;;  %v8953_v58 = vpack.c.bf16 %v5588_v31, %v5587_v39 }
 0x532   : > { %8265 = vmatprep.mubr.f32.mxu1 %v5244_v43  ;;  %8940 = vmatpush3.bf16.msra.mxu1 %v8937_v42  ;;  %v5566_v42 = vld [vmem:[#allocation2 + $0x15a] sm:$0xff] }
 0x533   : > { %8942 = vmatprep.subr.bf16.mxu1 %v8941_v11 }
 0x535   : > { %8266 = vmatmul.mubr.f32.gmra.mrb[8].mxu1 %v10828_v26  ;;  %v5251_v26 = vld [vmem:[#allocation2 + $0xe1] sm:$0xff] }
 0x536   : > { %8268 = vmatprep.mubr.f32.mxu1 %v5246_v17  ;;  %8944 = vmatpush3.bf16.msra.mxu1 %v8941_v11  ;;  %v5572_v11 = vld [vmem:[#allocation2 + $0x1a2] sm:$0xff] }
 0x537   : > { %8946 = vmatprep.subr.bf16.mxu1 %v8945_v53 }
 0x539   : > { %8269 = vmatmul.mubr.f32.gmra.mrb[10].mxu1 %v5247_v21 }
 0x53a   : > { %8271 = vmatprep.mubr.f32.mxu1 %v5248_v32  ;;  %8948 = vmatpush3.bf16.msra.mxu1 %v8945_v53 }
 0x53b   : > { %8950 = vmatprep.subr.bf16.mxu1 %v8949_v3 }
 0x53d   : > { %8272 = vmatmul.mubr.f32.gmra.mrb[12].mxu1 %v5249_v37 }
 0x53e   : > { %8274 = vmatprep.mubr.f32.mxu1 %v5250_v22  ;;  %8952 = vmatpush3.bf16.msra.mxu1 %v8949_v3 }
 0x53f   : > { %8954 = vmatprep.subr.bf16.mxu1 %v8953_v58 }
 0x541   : > { %8275 = vmatmul.mubr.f32.gmra.mrb[14].mxu1 %v5251_v26 }
 0x542   : > { %8277 = vmatprep.mubr.f32.mxu1 %v5252_v25  ;;  %8956 = vmatpush3.bf16.msra.mxu1 %v8953_v58 }
 0x545   : > { %8278 = vmatmul.mubr.f32.gmra.mrb[16].mxu1 %v5253_v13 }
 0x546   : > { %8280 = vmatprep.mubr.f32.mxu1 %v5254_v34 }
 0x549   : > { %8281 = vmatmul.mubr.f32.gmra.mrb[18].mxu1 %v5255_v38 }
 0x54a   : > { %8283 = vmatprep.mubr.f32.mxu1 %v5256_v29 }
 0x54d   : > { %8284 = vmatmul.mubr.f32.gmra.mrb[20].mxu1 %v5257_v28 }
 0x54e   : > { %8286 = vmatprep.mubr.f32.mxu1 %v5258_v51 }
 0x551   : > { %8287 = vmatmul.mubr.f32.gmra.mrb[22].mxu1 %v5259_v15 }
 0x552   : > { %8289 = vmatprep.mubr.f32.mxu1 %v5260_v55 }
 0x555   : > { %8290 = vmatmul.mubr.f32.gmra.mrb[24].mxu1 %v5261_v24 }
 0x556   : > { %8292 = vmatprep.mubr.f32.mxu1 %v5262_v56 }
 0x559   : > { %8293 = vmatmul.mubr.f32.gmra.mrb[26].mxu1 %v5263_v12 }
 0x55a   : > { %8295 = vmatprep.mubr.f32.mxu1 %v5264_v5 }
 0x55d   : > { %8296 = vmatmul.mubr.f32.gmra.mrb[28].mxu1 %v5265_v45 }
 0x55e   : > { %8298 = vmatprep.mubr.f32.mxu1 %v5266_v6 }
 0x561   : > { %8299 = vmatmul.mubr.f32.gmra.mrb[30].mxu1 %v5267_v50 }
 0x562   : > { %8333 = vmatprep.mubr.f32.mxu1 %v5541_v47 }
 0x565   : > { %8334 = vmatmul.mubr.f32.vlgmr.msra.gmra.mrb[0].mxu1 %v5542_v57 }
 0x566   : > { %8336 = vmatprep.mubr.f32.mxu1 %v5543_v23 }
 0x569   : > { %8337 = vmatmul.mubr.f32.gmra.mrb[2].mxu1 %v5544_v14 }
 0x56a   : > { %8339 = vmatprep.mubr.f32.mxu1 %v5545_v48 }
 0x56d   : > { %8340 = vmatmul.mubr.f32.gmra.mrb[4].mxu1 %v5546_v54 }
 0x56e   : > { %8342 = vmatprep.mubr.f32.mxu1 %v5547_v20 }
 0x571   : > { %8343 = vmatmul.mubr.f32.gmra.mrb[6].mxu1 %v5548_v27 }
 0x572   : > { %8345 = vmatprep.mubr.f32.mxu1 %v5549_v30 }
 0x575   : > { %8346 = vmatmul.mubr.f32.gmra.mrb[8].mxu1 %v5550_v35 }
 0x576   : > { %8348 = vmatprep.mubr.f32.mxu1 %v5551_v36 }
 0x579   : > { %8349 = vmatmul.mubr.f32.gmra.mrb[10].mxu1 %v5552_v59 }
 0x57a   : > { %8351 = vmatprep.mubr.f32.mxu1 %v5553_v63 }
 0x57d   : > { %8352 = vmatmul.mubr.f32.gmra.mrb[12].mxu1 %v5554_v1 }
 0x57e   : > { %8354 = vmatprep.mubr.f32.mxu1 %v5555_v4 }
 0x581   : > { %8355 = vmatmul.mubr.f32.gmra.mrb[14].mxu1 %v5556_v18 }
 0x582   : > { %8357 = vmatprep.mubr.f32.mxu1 %v5557_v9 }
 0x585   : > { %8358 = vmatmul.mubr.f32.gmra.mrb[16].mxu1 %v5558_v49 }
 0x586   : > { %8360 = vmatprep.mubr.f32.mxu1 %v5559_v40 }
 0x589   : > { %8361 = vmatmul.mubr.f32.gmra.mrb[18].mxu1 %v5560_v44 }
 0x58a   : > { %8363 = vmatprep.mubr.f32.mxu1 %v5561_v61 }
 0x58d   : > { %8364 = vmatmul.mubr.f32.gmra.mrb[20].mxu1 %v5562_v0 }
 0x58e   : > { %8366 = vmatprep.mubr.f32.mxu1 %v5563_v2 }
 0x591   : > { %8367 = vmatmul.mubr.f32.gmra.mrb[22].mxu1 %v5564_v60 }
 0x592   : > { %8369 = vmatprep.mubr.f32.mxu1 %v5565_v62 }
 0x595   : > { %8370 = vmatmul.mubr.f32.gmra.mrb[24].mxu1 %v5566_v42 }
 0x596   : > { %8372 = vmatprep.mubr.f32.mxu1 %v5567_v10 }
 0x599   : > { %8373 = vmatmul.mubr.f32.gmra.mrb[26].mxu1 %v5568_v41 }
 0x59a   : > { %8375 = vmatprep.mubr.f32.mxu1 %v10883_v19 }
 0x59d   : > { %8376 = vmatmul.mubr.f32.gmra.mrb[28].mxu1 %v10886_v33 }
 0x59e   : > { %8378 = vmatprep.mubr.f32.mxu1 %v5571_v7 }
 0x5a1   : > { %8379 = vmatmul.mubr.f32.gmra.mrb[30].mxu1 %v5572_v11 }
 0x638   : > { %v8335_v52 = vpop.f32.mrb[0].mxu1 }
 0x639   : > { %v5854_v43 = vadd.f32 %v8335_v52, %v10933_v8  ;;  %v5655_v53 = vpop.f32.mrb[1].mxu1 }
 0x63a   : > { %v5853_v46 = vadd.f32 %v10933_v8, %v5655_v53 }
 0x63b   : > { %v5886_v16 = vmax.f32 %v5854_v43, 0.0 }
 0x63c   : > { %v5885_v17 = vmax.f32 %v5853_v46, 0.0  ;;  %v8338_v19 = vpop.f32.mrb[2].mxu1 }
 0x63d   : > { %5918 = vst [vmem:[%s10939_s10 + $0x8] sm:$0xff] %v5886_v16  ;;  %v5856_v33 = vadd.f32 %v8338_v19, %v10933_v8  ;;  %v5665_v3 = vpop.f32.mrb[3].mxu1 }
 0x63e   : > { %5917 = vst [vmem:[%s10939_s10] sm:$0xff] %v5885_v17  ;;  %v5855_v21 = vadd.f32 %v10933_v8, %v5665_v3 }
 0x63f   : > { %v5888_v39 = vmax.f32 %v5856_v33, 0.0 }
 0x640   : > { %v5887_v31 = vmax.f32 %v5855_v21, 0.0  ;;  %v8341_v32 = vpop.f32.mrb[4].mxu1 }
 0x641   : > { %5920 = vst [vmem:[%s10939_s10 + $0x18] sm:$0xff] %v5888_v39  ;;  %v5858_v58 = vadd.f32 %v8341_v32, %v10933_v8  ;;  %v5675_v37 = vpop.f32.mrb[5].mxu1 }
 0x642   : > { %5919 = vst [vmem:[%s10939_s10 + $0x10] sm:$0xff] %v5887_v31  ;;  %v5857_v22 = vadd.f32 %v10933_v8, %v5675_v37 }
 0x643   : > { %v5890_v26 = vmax.f32 %v5858_v58, 0.0 }
 0x644   : > { %v5889_v25 = vmax.f32 %v5857_v22, 0.0  ;;  %v8344_v13 = vpop.f32.mrb[6].mxu1 }
 0x645   : > { %5922 = vst [vmem:[%s10939_s10 + $0x28] sm:$0xff] %v5890_v26  ;;  %v5860_v34 = vadd.f32 %v8344_v13, %v10933_v8  ;;  %v5685_v38 = vpop.f32.mrb[7].mxu1 }
 0x646   : > { %5921 = vst [vmem:[%s10939_s10 + $0x20] sm:$0xff] %v5889_v25  ;;  %v5859_v29 = vadd.f32 %v10933_v8, %v5685_v38 }
 0x647   : > { %v5892_v28 = vmax.f32 %v5860_v34, 0.0 }
 0x648   : > { %v5891_v51 = vmax.f32 %v5859_v29, 0.0  ;;  %v8347_v15 = vpop.f32.mrb[8].mxu1 }
 0x649   : > { %5924 = vst [vmem:[%s10939_s10 + $0x38] sm:$0xff] %v5892_v28  ;;  %v5862_v55 = vadd.f32 %v8347_v15, %v10933_v8  ;;  %v5695_v24 = vpop.f32.mrb[9].mxu1 }
 0x64a   : > { %5923 = vst [vmem:[%s10939_s10 + $0x30] sm:$0xff] %v5891_v51  ;;  %v5861_v56 = vadd.f32 %v10933_v8, %v5695_v24 }
 0x64b   : > { %v5894_v12 = vmax.f32 %v5862_v55, 0.0 }
 0x64c   : > { %v5893_v5 = vmax.f32 %v5861_v56, 0.0  ;;  %v8350_v6 = vpop.f32.mrb[10].mxu1 }
 0x64d   : > { %5926 = vst [vmem:[%s10939_s10 + $0x48] sm:$0xff] %v5894_v12  ;;  %v5864_v45 = vadd.f32 %v8350_v6, %v10933_v8  ;;  %v5705_v50 = vpop.f32.mrb[11].mxu1 }
 0x64e   : > { %5925 = vst [vmem:[%s10939_s10 + $0x40] sm:$0xff] %v5893_v5  ;;  %v5863_v47 = vadd.f32 %v10933_v8, %v5705_v50 }
 0x64f   : > { %v5896_v57 = vmax.f32 %v5864_v45, 0.0 }
 0x650   : > { %v5895_v23 = vmax.f32 %v5863_v47, 0.0  ;;  %v8353_v14 = vpop.f32.mrb[12].mxu1 }
 0x651   : > { %5928 = vst [vmem:[%s10939_s10 + $0x58] sm:$0xff] %v5896_v57  ;;  %v5866_v48 = vadd.f32 %v8353_v14, %v10933_v8  ;;  %v5715_v54 = vpop.f32.mrb[13].mxu1 }
 0x652   : > { %5927 = vst [vmem:[%s10939_s10 + $0x50] sm:$0xff] %v5895_v23  ;;  %v5865_v20 = vadd.f32 %v10933_v8, %v5715_v54 }
 0x653   : > { %v5898_v27 = vmax.f32 %v5866_v48, 0.0 }
 0x654   : > { %v5897_v30 = vmax.f32 %v5865_v20, 0.0  ;;  %v8356_v35 = vpop.f32.mrb[14].mxu1 }
 0x655   : > { %5930 = vst [vmem:[%s10939_s10 + $0x68] sm:$0xff] %v5898_v27  ;;  %v5868_v36 = vadd.f32 %v8356_v35, %v10933_v8  ;;  %v5725_v59 = vpop.f32.mrb[15].mxu1 }
 0x656   : > { %5929 = vst [vmem:[%s10939_s10 + $0x60] sm:$0xff] %v5897_v30  ;;  %v5867_v63 = vadd.f32 %v10933_v8, %v5725_v59 }
 0x657   : > { %v5900_v1 = vmax.f32 %v5868_v36, 0.0 }
 0x658   : > { %v5899_v4 = vmax.f32 %v5867_v63, 0.0  ;;  %v8359_v18 = vpop.f32.mrb[16].mxu1 }
 0x659   : > { %5932 = vst [vmem:[%s10939_s10 + $0x78] sm:$0xff] %v5900_v1  ;;  %v5870_v9 = vadd.f32 %v8359_v18, %v10933_v8  ;;  %v5735_v49 = vpop.f32.mrb[17].mxu1 }
 0x65a   : > { %5931 = vst [vmem:[%s10939_s10 + $0x70] sm:$0xff] %v5899_v4  ;;  %v5869_v40 = vadd.f32 %v10933_v8, %v5735_v49 }
 0x65b   : > { %v5902_v44 = vmax.f32 %v5870_v9, 0.0 }
 0x65c   : > { %v5901_v61 = vmax.f32 %v5869_v40, 0.0  ;;  %v8362_v0 = vpop.f32.mrb[18].mxu1 }
 0x65d   : > { %5934 = vst [vmem:[%s10939_s10 + $0x88] sm:$0xff] %v5902_v44  ;;  %v5872_v2 = vadd.f32 %v8362_v0, %v10933_v8  ;;  %v5745_v60 = vpop.f32.mrb[19].mxu1 }
 0x65e   : > { %5933 = vst [vmem:[%s10939_s10 + $0x80] sm:$0xff] %v5901_v61  ;;  %v5871_v62 = vadd.f32 %v10933_v8, %v5745_v60 }
 0x65f   : > { %v5904_v42 = vmax.f32 %v5872_v2, 0.0 }
 0x660   : > { %v5903_v10 = vmax.f32 %v5871_v62, 0.0  ;;  %v8365_v41 = vpop.f32.mrb[20].mxu1 }
 0x661   : > { %5936 = vst [vmem:[%s10939_s10 + $0x98] sm:$0xff] %v5904_v42  ;;  %v5874_v7 = vadd.f32 %v8365_v41, %v10933_v8  ;;  %v5755_v11 = vpop.f32.mrb[21].mxu1 }
 0x662   : > { %5935 = vst [vmem:[%s10939_s10 + $0x90] sm:$0xff] %v5903_v10  ;;  %v5873_v52 = vadd.f32 %v10933_v8, %v5755_v11 }
 0x663   : > { %v5906_v43 = vmax.f32 %v5874_v7, 0.0 }
 0x664   : > { %v5905_v53 = vmax.f32 %v5873_v52, 0.0  ;;  %v8368_v46 = vpop.f32.mrb[22].mxu1 }
 0x665   : > { %5938 = vst [vmem:[%s10939_s10 + $0xa8] sm:$0xff] %v5906_v43  ;;  %v5876_v16 = vadd.f32 %v8368_v46, %v10933_v8  ;;  %v5765_v17 = vpop.f32.mrb[23].mxu1 }
 0x666   : > { %5937 = vst [vmem:[%s10939_s10 + $0xa0] sm:$0xff] %v5905_v53  ;;  %v5875_v19 = vadd.f32 %v10933_v8, %v5765_v17 }
 0x667   : > { %v5908_v33 = vmax.f32 %v5876_v16, 0.0 }
 0x668   : > { %v5907_v3 = vmax.f32 %v5875_v19, 0.0  ;;  %v8371_v21 = vpop.f32.mrb[24].mxu1 }
 0x669   : > { %5940 = vst [vmem:[%s10939_s10 + $0xb8] sm:$0xff] %v5908_v33  ;;  %v5878_v39 = vadd.f32 %v8371_v21, %v10933_v8  ;;  %v5775_v31 = vpop.f32.mrb[25].mxu1 }
 0x66a   : > { %5939 = vst [vmem:[%s10939_s10 + $0xb0] sm:$0xff] %v5907_v3  ;;  %v5877_v32 = vadd.f32 %v10933_v8, %v5775_v31 }
 0x66b   : > { %v5910_v58 = vmax.f32 %v5878_v39, 0.0 }
 0x66c   : > { %v5909_v37 = vmax.f32 %v5877_v32, 0.0  ;;  %v8374_v22 = vpop.f32.mrb[26].mxu1 }
 0x66d   : > { %5942 = vst [vmem:[%s10939_s10 + $0xc8] sm:$0xff] %v5910_v58  ;;  %v5880_v26 = vadd.f32 %v8374_v22, %v10933_v8  ;;  %v5785_v25 = vpop.f32.mrb[27].mxu1 }
 0x66e   : > { %5941 = vst [vmem:[%s10939_s10 + $0xc0] sm:$0xff] %v5909_v37  ;;  %v5879_v13 = vadd.f32 %v10933_v8, %v5785_v25 }
 0x66f   : > { %v5912_v34 = vmax.f32 %v5880_v26, 0.0 }
 0x670   : > { %v5911_v38 = vmax.f32 %v5879_v13, 0.0  ;;  %v8377_v29 = vpop.f32.mrb[28].mxu1 }
 0x671   : > { %5944 = vst [vmem:[%s10939_s10 + $0xd8] sm:$0xff] %v5912_v34  ;;  %v5882_v28 = vadd.f32 %v8377_v29, %v10933_v8  ;;  %v5795_v51 = vpop.f32.mrb[29].mxu1 }
 0x672   : > { %5943 = vst [vmem:[%s10939_s10 + $0xd0] sm:$0xff] %v5911_v38  ;;  %v5881_v15 = vadd.f32 %v10933_v8, %v5795_v51 }
 0x673   : > { %v5914_v55 = vmax.f32 %v5882_v28, 0.0 }
 0x674   : > { %v5913_v24 = vmax.f32 %v5881_v15, 0.0  ;;  %v8380_v56 = vpop.f32.mrb[30].mxu1 }
 0x675   : > { %5946 = vst [vmem:[%s10939_s10 + $0xe8] sm:$0xff] %v5914_v55  ;;  %v5884_v12 = vadd.f32 %v8380_v56, %v10933_v8  ;;  %v5805_v5 = vpop.f32.mrb[31].mxu1 }
 0x676   : > { %5945 = vst [vmem:[%s10939_s10 + $0xe0] sm:$0xff] %v5913_v24  ;;  %v5883_v6 = vadd.f32 %v10933_v8, %v5805_v5 }
 0x677   : > { %v5916_v45 = vmax.f32 %v5884_v12, 0.0 }
 0x678   : > { %v5915_v50 = vmax.f32 %v5883_v6, 0.0 }
 0x679   : > { %5948 = vst [vmem:[%s10939_s10 + $0xf8] sm:$0xff] %v5916_v45 }
 0x67a   : > { %5947 = vst [vmem:[%s10939_s10 + $0xf0] sm:$0xff] %v5915_v50 }
 0x67b   : > { %9644 = shalt.err (!%p9641_p1)
}
 0x67c   : > { %s9645_s12 = scalar_lea.hbm %s11006_s11, 4096  ;;  %s9649_s15 = scalar_lea.hbm %s11059_s5, 8192 }
 0x67d   : > { %p9646_p13 = scmp.ne.s32.totalorder %s11006_s11, %s9645_s12  ;;  %p9650_p4 = scmp.lt.u32.totalorder %s11006_s11, %s11059_s5 }
 0x67e   : > { %p9651_p5 = scmp.lt.u32.totalorder %s9649_s15, %s9645_s12  ;;  %p9653_p11 = scmp.lt.u32.totalorder %s9645_s12, %s11006_s11 }
 0x67f   : > { %p9647_p6 = pnand %p9646_p13, %p11299_p0 }
 0x680   : > { %p9652_p8 = por %p9651_p5, %p9650_p4 }
 0x681   : > { %p9648_p10 = pneg %p9647_p6 }
 0x682   : > { %p9654_p2 = por %p9653_p11, %p9652_p8 }
 0x684   : > { %p9655_p3 = pnand %p9654_p2, %p9648_p10 }
 0x686   : > { %9658 = shalt.err (!%p9655_p3)
}
 0x687   : > { %s9710_s28 = smov 128   ;;  %s9711_s9 = smov 8  }
 0x688   : > { %9479 = dma.vmem_to_hbm [thread:$0]  (%p11299_p0), %s11008_s13, 4096, %s11006_s11, %s5950_s22, %s9710_s28, %s9710_s28, %s9711_s9  }
 0x689 PF: > { %s5978_s30 = sand.u32 1, %s9689_s18   ;;  %p11300_p7 = scmp.ne.s32.totalorder %s11140_s25, 0 }
 0x68a   : > { %p11301_p9 = scmp.ge.s32.totalorder %s9701_s21, 2  ;;  %s5979_s17 = scalar_lea.sflag [#allocation5], %s5978_s30 }
 0x68c   : > { %p9493_p12 = pnand %p11301_p9, %p11300_p7 }
 0x68e   : > { %9684 = dma.done.wait (!%p9493_p12), %s5979_s17, 4096  }
 0x68f   : > { %9686 = vsyncadd (!%p9493_p12), %s5979_s17, 4294963200  ;;  %p19_p1 = scmp.ge.s32.totalorder %s9858_s29, 4   ;;  %s11302_s18 = smov %s9693_s19 }
 0x690   : > { %s11303_s19 = smov %s9697_s20  ;;  %s11304_s20 = smov %s9874_s27 }
 0x691   : > { %s11305_s21 = smov %s9858_s29  ;;  %21 = sbr.rel (!%p19_p1) target bundleno = 6 (0x6), region = 96 }
 0x698   :  { %5984 = vsyncpa [#allocation4], 1 }
 0x699   :  { %5986 = vsyncpa [#allocation4 + $0x1], 1 }
 0x69a   :  { %5987 = vsyncpa [#allocation7], 1 }
 0x69b   :  { %5988 = vsyncpa [#allocation5], 1 }
 0x69c   :  { %5990 = vsyncpa [#allocation5 + $0x1], 1 }

</bundles_post_ra>
